<compile_context>
chip_gen: v5e
topology: v5e:2x2
jax: 0.10.0
libtpu: 0.0.40
codegen_flags: <defaults>
</compile_context>

<pallas_src>
import functools

import jax
import jax.numpy as jnp
from jax.experimental import pallas as pl
from jax.experimental.pallas import tpu as pltpu

LANE = 128      # TPU lane width: pad last dims to this for dense loads/stores
SUBLANE = 8     # minimum second-to-last tile granule


def _round_up(x, m):
    return (x + m - 1) // m * m


def policy_net_kernel(obs_ref,
                      w1_ref, b1_ref,
                      w2_ref, b2_ref,
                      w3_ref, b3_ref,
                      w4_ref, b4_ref,
                      wa_ref, ba_ref,
                      out_ref):
    """One (TM, *) batch tile of the PolicyNet forward.

    h_k = relu(h_{k-1} @ W_k + b_k)  for k = 1..4,   p = h4 @ Wa + ba

    Matmul operands stay in the weight dtype (bf16), accumulation is f32
    (preferred_element_type); bias-add and ReLU are done in f32.
    """
    cdt = w1_ref.dtype  # compute dtype for MXU operands (bf16 by default)

    x = obs_ref[...]                                                       # (TM, K_pad)

    h = jnp.dot(x, w1_ref[...], preferred_element_type=jnp.float32) + b1_ref[...]
    h = jnp.maximum(h, 0.0)

    h = jnp.dot(h.astype(cdt), w2_ref[...],
                preferred_element_type=jnp.float32) + b2_ref[...]
    h = jnp.maximum(h, 0.0)

    h = jnp.dot(h.astype(cdt), w3_ref[...],
                preferred_element_type=jnp.float32) + b3_ref[...]
    h = jnp.maximum(h, 0.0)

    h = jnp.dot(h.astype(cdt), w4_ref[...],
                preferred_element_type=jnp.float32) + b4_ref[...]
    h = jnp.maximum(h, 0.0)

    p = jnp.dot(h.astype(cdt), wa_ref[...],
                preferred_element_type=jnp.float32) + ba_ref[...]
    out_ref[...] = p.astype(out_ref.dtype)                                 # (TM, 128) lane-dense


def policy_net_forward(obs, params, action_dim, *, tm_max=256):
    """Gridded Pallas call. obs: (batch, state_dim) f32. Returns (batch, action_dim) f32."""
    (w1, b1), (w2, b2), (w3, b3), (w4, b4), (wa, ba) = params
    batch, state_dim = obs.shape
    k_pad = w1.shape[0]          # padded input width of layer 1 (multiple of 128)
    n_pad = wa.shape[1]          # padded action head width (multiple of 128)
    cdt = w1.dtype

    tm = min(tm_max, _round_up(batch, SUBLANE))
    batch_pad = _round_up(batch, tm)
    grid = (batch_pad // tm,)

    # Pad obs once in the wrapper (zeros): lane-dense loads + full-K layer-1 matmul.
    x = jnp.zeros((batch_pad, k_pad), cdt).at[:batch, :state_dim].set(obs.astype(cdt))

    const_map = lambda i: (0, 0)            # weights/biases: VMEM-resident across steps
    param_arrays = (w1, b1, w2, b2, w3, b3, w4, b4, wa, ba)
    param_specs = [pl.BlockSpec(a.shape, const_map) for a in param_arrays]

    out = pl.pallas_call(
        policy_net_kernel,
        out_shape=jax.ShapeDtypeStruct((batch_pad, n_pad), jnp.float32),
        grid=grid,
        in_specs=[pl.BlockSpec((tm, k_pad), lambda i: (i, 0))] + param_specs,
        out_specs=pl.BlockSpec((tm, n_pad), lambda i: (i, 0)),
        compiler_params=pltpu.CompilerParams(
            dimension_semantics=("parallel",),   # batch tiles are independent -> megacore
        ),
    )(x, *param_arrays)

    return out[:batch, :action_dim]


def init_policy_params(key, state_dim, action_dim, hidden_dim=256,
                       param_dtype=jnp.bfloat16):
    """PyTorch-nn.Linear-style init (uniform +/- 1/sqrt(fan_in)).

    Weights are (in, out) = W^T vs PyTorch, zero-padded to lane-aligned shapes at
    init time, and cast to `param_dtype`. Biases stay f32 (elementwise path)."""
    k_pad = _round_up(state_dim, LANE)
    n_pad = _round_up(action_dim, LANE)

    def linear(k, in_dim, out_dim, in_pad, out_pad):
        kw, kb = jax.random.split(k)
        bound = 1.0 / jnp.sqrt(jnp.float32(in_dim))
        w = jax.random.uniform(kw, (in_dim, out_dim), jnp.float32, -bound, bound)
        b = jax.random.uniform(kb, (1, out_dim), jnp.float32, -bound, bound)
        w_p = jnp.zeros((in_pad, out_pad), jnp.float32).at[:in_dim, :out_dim].set(w)
        b_p = jnp.zeros((1, out_pad), jnp.float32).at[:, :out_dim].set(b)
        return w_p.astype(param_dtype), b_p

    k1, k2, k3, k4, k5 = jax.random.split(key, 5)
    return [
        linear(k1, state_dim, hidden_dim, k_pad, hidden_dim),
        linear(k2, hidden_dim, hidden_dim, hidden_dim, hidden_dim),
        linear(k3, hidden_dim, hidden_dim, hidden_dim, hidden_dim),
        linear(k4, hidden_dim, hidden_dim, hidden_dim, hidden_dim),
        linear(k5, hidden_dim, action_dim, hidden_dim, n_pad),
    ]


def reference_forward(obs, params, action_dim):
    """Plain-JAX reference emulating the kernel's mixed precision (bf16 operands,
    f32 accumulation) for a tight correctness check."""
    (w1, b1), (w2, b2), (w3, b3), (w4, b4), (wa, ba) = params
    cdt = w1.dtype
    k_pad = w1.shape[0]
    x = jnp.zeros((obs.shape[0], k_pad), cdt).at[:, :obs.shape[1]].set(obs.astype(cdt))

    h = jnp.maximum(jnp.dot(x, w1, preferred_element_type=jnp.float32) + b1, 0.0)
    for (w, b) in ((w2, b2), (w3, b3), (w4, b4)):
        h = jnp.maximum(
            jnp.dot(h.astype(cdt), w, preferred_element_type=jnp.float32) + b, 0.0)
    p = jnp.dot(h.astype(cdt), wa, preferred_element_type=jnp.float32) + ba
    return p[:, :action_dim]


if __name__ == "__main__":
    batch = 1000            # non-multiple of the tile -> exercises batch padding
    state_dim = 16
    action_dim = 8
    hidden_dim = 256        # module default

    key = jax.random.PRNGKey(0)
    k_obs, k_params = jax.random.split(key)
    obs = jax.random.normal(k_obs, (batch, state_dim), jnp.float32)
    params = init_policy_params(k_params, state_dim, action_dim, hidden_dim,
                                param_dtype=jnp.bfloat16)

    fwd = jax.jit(functools.partial(policy_net_forward, action_dim=action_dim))
    out = jax.block_until_ready(fwd(obs, params))

    ref = reference_forward(obs, params, action_dim)
    assert out.shape == (batch, action_dim)
    max_err = float(jnp.max(jnp.abs(out - ref)))
    assert jnp.allclose(out, ref, atol=5e-3, rtol=5e-3), f"mismatch vs reference, max|err|={max_err}"

    print("KERNEL_OK")
</pallas_src>

<mosaic_0001>
module attributes {stable_mosaic.version = 11 : i64} {
  func.func @policy_net_kernel(%arg0: i32, %arg1: memref<256x128xbf16, #tpu.memory_space<vmem>>, %arg2: memref<128x256xbf16, #tpu.memory_space<vmem>>, %arg3: memref<1x256xf32, #tpu.memory_space<vmem>>, %arg4: memref<256x256xbf16, #tpu.memory_space<vmem>>, %arg5: memref<1x256xf32, #tpu.memory_space<vmem>>, %arg6: memref<256x256xbf16, #tpu.memory_space<vmem>>, %arg7: memref<1x256xf32, #tpu.memory_space<vmem>>, %arg8: memref<256x256xbf16, #tpu.memory_space<vmem>>, %arg9: memref<1x256xf32, #tpu.memory_space<vmem>>, %arg10: memref<256x128xbf16, #tpu.memory_space<vmem>>, %arg11: memref<1x128xf32, #tpu.memory_space<vmem>>, %arg12: memref<256x128xf32, #tpu.memory_space<vmem>>) attributes {dimension_semantics = [#tpu.dimension_semantics<parallel>], iteration_bounds = array<i64: 4>, scalar_prefetch = 0 : i64, scratch_operands = 0 : i64, tpu.core_type = #tpu.core_type<tc>, window_params = [{transform_indices = @transform_0, window_bounds = array<i64: 256, 128>}, {pipeline_mode = #tpu.pipeline_mode<synchronous>, transform_indices = @transform_1, window_bounds = array<i64: 128, 256>}, {pipeline_mode = #tpu.pipeline_mode<synchronous>, transform_indices = @transform_2, window_bounds = array<i64: 1, 256>}, {pipeline_mode = #tpu.pipeline_mode<synchronous>, transform_indices = @transform_3, window_bounds = array<i64: 256, 256>}, {pipeline_mode = #tpu.pipeline_mode<synchronous>, transform_indices = @transform_4, window_bounds = array<i64: 1, 256>}, {pipeline_mode = #tpu.pipeline_mode<synchronous>, transform_indices = @transform_5, window_bounds = array<i64: 256, 256>}, {pipeline_mode = #tpu.pipeline_mode<synchronous>, transform_indices = @transform_6, window_bounds = array<i64: 1, 256>}, {pipeline_mode = #tpu.pipeline_mode<synchronous>, transform_indices = @transform_7, window_bounds = array<i64: 256, 256>}, {pipeline_mode = #tpu.pipeline_mode<synchronous>, transform_indices = @transform_8, window_bounds = array<i64: 1, 256>}, {pipeline_mode = #tpu.pipeline_mode<synchronous>, transform_indices = @transform_9, window_bounds = array<i64: 256, 128>}, {pipeline_mode = #tpu.pipeline_mode<synchronous>, transform_indices = @transform_10, window_bounds = array<i64: 1, 128>}, {transform_indices = @transform_11, window_bounds = array<i64: 256, 128>}]} {
    %c0 = arith.constant 0 : index
    %c0_0 = arith.constant 0 : index
    %0 = vector.load %arg1[%c0, %c0_0] : memref<256x128xbf16, #tpu.memory_space<vmem>>, vector<256x128xbf16>
    %c0_1 = arith.constant 0 : index
    %c0_2 = arith.constant 0 : index
    %1 = vector.load %arg2[%c0_1, %c0_2] : memref<128x256xbf16, #tpu.memory_space<vmem>>, vector<128x256xbf16>
    %cst = arith.constant dense<0.000000e+00> : vector<256x256xf32>
    %2 = tpu.matmul %0, %1, %cst {dimension_numbers = #tpu.dot_dimension_numbers<[1], [0], [0], [1], [0, 0, 1, 1], [], []>} : vector<256x128xbf16>, vector<128x256xbf16>, vector<256x256xf32> -> vector<256x256xf32>
    %c0_3 = arith.constant 0 : index
    %c0_4 = arith.constant 0 : index
    %3 = vector.load %arg3[%c0_3, %c0_4] : memref<1x256xf32, #tpu.memory_space<vmem>>, vector<1x256xf32>
    %4 = vector.broadcast %3 : vector<1x256xf32> to vector<256x256xf32>
    %5 = arith.addf %2, %4 : vector<256x256xf32>
    %cst_5 = arith.constant 0.000000e+00 : f32
    %6 = vector.broadcast %cst_5 : f32 to vector<256x256xf32>
    %7 = arith.maximumf %5, %6 : vector<256x256xf32>
    %8 = arith.truncf %7 : vector<256x256xf32> to vector<256x256xbf16>
    %c0_6 = arith.constant 0 : index
    %c0_7 = arith.constant 0 : index
    %9 = vector.load %arg4[%c0_6, %c0_7] : memref<256x256xbf16, #tpu.memory_space<vmem>>, vector<256x256xbf16>
    %cst_8 = arith.constant dense<0.000000e+00> : vector<256x256xf32>
    %10 = tpu.matmul %8, %9, %cst_8 {dimension_numbers = #tpu.dot_dimension_numbers<[1], [0], [0], [1], [0, 0, 1, 1], [], []>} : vector<256x256xbf16>, vector<256x256xbf16>, vector<256x256xf32> -> vector<256x256xf32>
    %c0_9 = arith.constant 0 : index
    %c0_10 = arith.constant 0 : index
    %11 = vector.load %arg5[%c0_9, %c0_10] : memref<1x256xf32, #tpu.memory_space<vmem>>, vector<1x256xf32>
    %12 = vector.broadcast %11 : vector<1x256xf32> to vector<256x256xf32>
    %13 = arith.addf %10, %12 : vector<256x256xf32>
    %cst_11 = arith.constant 0.000000e+00 : f32
    %14 = vector.broadcast %cst_11 : f32 to vector<256x256xf32>
    %15 = arith.maximumf %13, %14 : vector<256x256xf32>
    %16 = arith.truncf %15 : vector<256x256xf32> to vector<256x256xbf16>
    %c0_12 = arith.constant 0 : index
    %c0_13 = arith.constant 0 : index
    %17 = vector.load %arg6[%c0_12, %c0_13] : memref<256x256xbf16, #tpu.memory_space<vmem>>, vector<256x256xbf16>
    %cst_14 = arith.constant dense<0.000000e+00> : vector<256x256xf32>
    %18 = tpu.matmul %16, %17, %cst_14 {dimension_numbers = #tpu.dot_dimension_numbers<[1], [0], [0], [1], [0, 0, 1, 1], [], []>} : vector<256x256xbf16>, vector<256x256xbf16>, vector<256x256xf32> -> vector<256x256xf32>
    %c0_15 = arith.constant 0 : index
    %c0_16 = arith.constant 0 : index
    %19 = vector.load %arg7[%c0_15, %c0_16] : memref<1x256xf32, #tpu.memory_space<vmem>>, vector<1x256xf32>
    %20 = vector.broadcast %19 : vector<1x256xf32> to vector<256x256xf32>
    %21 = arith.addf %18, %20 : vector<256x256xf32>
    %cst_17 = arith.constant 0.000000e+00 : f32
    %22 = vector.broadcast %cst_17 : f32 to vector<256x256xf32>
    %23 = arith.maximumf %21, %22 : vector<256x256xf32>
    %24 = arith.truncf %23 : vector<256x256xf32> to vector<256x256xbf16>
    %c0_18 = arith.constant 0 : index
    %c0_19 = arith.constant 0 : index
    %25 = vector.load %arg8[%c0_18, %c0_19] : memref<256x256xbf16, #tpu.memory_space<vmem>>, vector<256x256xbf16>
    %cst_20 = arith.constant dense<0.000000e+00> : vector<256x256xf32>
    %26 = tpu.matmul %24, %25, %cst_20 {dimension_numbers = #tpu.dot_dimension_numbers<[1], [0], [0], [1], [0, 0, 1, 1], [], []>} : vector<256x256xbf16>, vector<256x256xbf16>, vector<256x256xf32> -> vector<256x256xf32>
    %c0_21 = arith.constant 0 : index
    %c0_22 = arith.constant 0 : index
    %27 = vector.load %arg9[%c0_21, %c0_22] : memref<1x256xf32, #tpu.memory_space<vmem>>, vector<1x256xf32>
    %28 = vector.broadcast %27 : vector<1x256xf32> to vector<256x256xf32>
    %29 = arith.addf %26, %28 : vector<256x256xf32>
    %cst_23 = arith.constant 0.000000e+00 : f32
    %30 = vector.broadcast %cst_23 : f32 to vector<256x256xf32>
    %31 = arith.maximumf %29, %30 : vector<256x256xf32>
    %32 = arith.truncf %31 : vector<256x256xf32> to vector<256x256xbf16>
    %c0_24 = arith.constant 0 : index
    %c0_25 = arith.constant 0 : index
    %33 = vector.load %arg10[%c0_24, %c0_25] : memref<256x128xbf16, #tpu.memory_space<vmem>>, vector<256x128xbf16>
    %cst_26 = arith.constant dense<0.000000e+00> : vector<256x128xf32>
    %34 = tpu.matmul %32, %33, %cst_26 {dimension_numbers = #tpu.dot_dimension_numbers<[1], [0], [0], [1], [0, 0, 1, 1], [], []>} : vector<256x256xbf16>, vector<256x128xbf16>, vector<256x128xf32> -> vector<256x128xf32>
    %c0_27 = arith.constant 0 : index
    %c0_28 = arith.constant 0 : index
    %35 = vector.load %arg11[%c0_27, %c0_28] : memref<1x128xf32, #tpu.memory_space<vmem>>, vector<1x128xf32>
    %36 = vector.broadcast %35 : vector<1x128xf32> to vector<256x128xf32>
    %37 = arith.addf %34, %36 : vector<256x128xf32>
    %c0_29 = arith.constant 0 : index
    %c0_30 = arith.constant 0 : index
    %38 = vector.load %arg12[%c0_29, %c0_30] : memref<256x128xf32, #tpu.memory_space<vmem>>, vector<256x128xf32>
    tpu.vector_store %arg12[%c0_29, %c0_30], %37 {strides = array<i32>} : memref<256x128xf32, #tpu.memory_space<vmem>>, vector<256x128xf32>,
    return
  }
  func.func @transform_0(%arg0: i32) -> (i32, i32) {
    %c0_i32 = arith.constant 0 : i32
    %c0_i32_0 = arith.constant 0 : i32
    return %arg0, %c0_i32 : i32, i32
  }
  func.func @transform_1(%arg0: i32) -> (i32, i32) {
    %c0_i32 = arith.constant 0 : i32
    %c0_i32_0 = arith.constant 0 : i32
    %c0_i32_1 = arith.constant 0 : i32
    return %c0_i32, %c0_i32_0 : i32, i32
  }
  func.func @transform_2(%arg0: i32) -> (i32, i32) {
    %c0_i32 = arith.constant 0 : i32
    %c0_i32_0 = arith.constant 0 : i32
    %c0_i32_1 = arith.constant 0 : i32
    return %c0_i32, %c0_i32_0 : i32, i32
  }
  func.func @transform_3(%arg0: i32) -> (i32, i32) {
    %c0_i32 = arith.constant 0 : i32
    %c0_i32_0 = arith.constant 0 : i32
    %c0_i32_1 = arith.constant 0 : i32
    return %c0_i32, %c0_i32_0 : i32, i32
  }
  func.func @transform_4(%arg0: i32) -> (i32, i32) {
    %c0_i32 = arith.constant 0 : i32
    %c0_i32_0 = arith.constant 0 : i32
    %c0_i32_1 = arith.constant 0 : i32
    return %c0_i32, %c0_i32_0 : i32, i32
  }
  func.func @transform_5(%arg0: i32) -> (i32, i32) {
    %c0_i32 = arith.constant 0 : i32
    %c0_i32_0 = arith.constant 0 : i32
    %c0_i32_1 = arith.constant 0 : i32
    return %c0_i32, %c0_i32_0 : i32, i32
  }
  func.func @transform_6(%arg0: i32) -> (i32, i32) {
    %c0_i32 = arith.constant 0 : i32
    %c0_i32_0 = arith.constant 0 : i32
    %c0_i32_1 = arith.constant 0 : i32
    return %c0_i32, %c0_i32_0 : i32, i32
  }
  func.func @transform_7(%arg0: i32) -> (i32, i32) {
    %c0_i32 = arith.constant 0 : i32
    %c0_i32_0 = arith.constant 0 : i32
    %c0_i32_1 = arith.constant 0 : i32
    return %c0_i32, %c0_i32_0 : i32, i32
  }
  func.func @transform_8(%arg0: i32) -> (i32, i32) {
    %c0_i32 = arith.constant 0 : i32
    %c0_i32_0 = arith.constant 0 : i32
    %c0_i32_1 = arith.constant 0 : i32
    return %c0_i32, %c0_i32_0 : i32, i32
  }
  func.func @transform_9(%arg0: i32) -> (i32, i32) {
    %c0_i32 = arith.constant 0 : i32
    %c0_i32_0 = arith.constant 0 : i32
    %c0_i32_1 = arith.constant 0 : i32
    return %c0_i32, %c0_i32_0 : i32, i32
  }
  func.func @transform_10(%arg0: i32) -> (i32, i32) {
    %c0_i32 = arith.constant 0 : i32
    %c0_i32_0 = arith.constant 0 : i32
    %c0_i32_1 = arith.constant 0 : i32
    return %c0_i32, %c0_i32_0 : i32, i32
  }
  func.func @transform_11(%arg0: i32) -> (i32, i32) {
    %c0_i32 = arith.constant 0 : i32
    %c0_i32_0 = arith.constant 0 : i32
    return %arg0, %c0_i32 : i32, i32
  }
}

</mosaic_0001>

<bundles_post_ra>
// kernel: policy_net_forward.1
= control target key start
LH: loop header
LB: loop body
LE: loop exit
PB: predicated region body
PF: predicated region fallthrough
CT: control target
= control target key end

     0   :  { %s4050_s17 = smov 0   ;;  %s5610_s0 = inlined_call_operand.vmem [shape: bf16[1024,128], index: 0, kind: input, shape index: {}]   ;;  %s5611_s1 = inlined_call_operand.vmem [shape: bf16[128,256], index: 1, kind: input, shape index: {}]   ;;  %s5612_s2 = inlined_call_operand.vmem [shape: f32[1,256], index: 2, kind: input, shape index: {}]   ;;  %s5613_s3 = inlined_call_operand.vmem [shape: bf16[256,256], index: 3, kind: input, shape index: {}]   ;;  %s5614_s4 = inlined_call_operand.vmem [shape: f32[1,256], index: 4, kind: input, shape index: {}]   ;;  %s5615_s5 = inlined_call_operand.vmem [shape: bf16[256,256], index: 5, kind: input, shape index: {}]   ;;  %s5616_s6 = inlined_call_operand.vmem [shape: f32[1,256], index: 6, kind: input, shape index: {}]   ;;  %s5617_s7 = inlined_call_operand.vmem [shape: bf16[256,256], index: 7, kind: input, shape index: {}]   ;;  %s5618_s8 = inlined_call_operand.vmem [shape: f32[1,256], index: 8, kind: input, shape index: {}]   ;;  %s5619_s9 = inlined_call_operand.vmem [shape: bf16[256,128], index: 9, kind: input, shape index: {}]   ;;  %s5620_s10 = inlined_call_operand.vmem [shape: f32[1,128], index: 10, kind: input, shape index: {}]   ;;  %s5621_s11 = inlined_call_operand.vmem [shape: f32[1024,128], index: 11, kind: output, shape index: {}]  }
   0x1 LB: > { %s3242_s18 = sadd.s32 4294967295, %s3988_s17   ;;  %p3246_p0 = scmp.ge.s32.totalorder %s3988_s17, 1  ;;  %s3988_s17 = sphi %s4050_s17, %s21_s17  }
   0x2   : > { %p338_p1 = scmp.lt.s32.totalorder %s3988_s17, 5 }
   0x4   : > { %p339_p2 = pnand %p3246_p0, %p338_p1 }
   0x5   : > { %s3247_s25 = sshll.u32 (!%p339_p2), %s3242_s18, 5 }
   0x6   : > { %342 = sbr.rel (%p339_p2) target bundleno = 1338 (0x53a), region = 64  ;;  %p379_p3 = scmp.lt.s32.totalorder (!%p339_p2), %s3247_s25, 127 }
   0xb   : > { %v3373_v0 = vld [vmem:[%s5611_s1 + $0x70] sm:$0xf]  ;;  %v3860_v1 = vld [vmem:[%s5611_s1 + $0x74] sm:$0xf0]  ;;  %v3859_v2 = vld [vmem:[%s5611_s1 + $0x74] sm:$0xf] }
   0xc   : > { %v3374_v3 = vor.u32 %v3860_v1, %v3373_v0  ;;  %v3375_v4 = vld [vmem:[%s5611_s1 + $0x78] sm:$0xf0]  ;;  %v3365_v5 = vld [vmem:[%s5611_s1 + $0x60] sm:$0xf]  ;;  %v3858_v6 = vld [vmem:[%s5611_s1 + $0x64] sm:$0xf0] }
   0xd   : > { %v3378_v7 = vor.u32 %v3859_v2, %v3375_v4  ;;  %v3857_v8 = vld [vmem:[%s5611_s1 + $0x64] sm:$0xf]  ;;  %v3367_v9 = vld [vmem:[%s5611_s1 + $0x68] sm:$0xf0]  ;;  %v3366_v10 = vor.u32 %v3858_v6, %v3365_v5  ;;  %v3357_v12 = vld [vmem:[%s5611_s1 + $0x50] sm:$0xf] }
   0xe   : > { %620 = vmatpush.bf16.msra.mxu0 %v3374_v3  ;;  %v3370_v11 = vor.u32 %v3857_v8, %v3367_v9  ;;  %v3856_v13 = vld [vmem:[%s5611_s1 + $0x54] sm:$0xf0]  ;;  %v3855_v14 = vld [vmem:[%s5611_s1 + $0x54] sm:$0xf]  ;;  %v3359_v15 = vld [vmem:[%s5611_s1 + $0x58] sm:$0xf0] }
   0xf   : > { %709 = vmatpush.bf16.msra.mxu1 %v3378_v7  ;;  %v3358_v16 = vor.u32 %v3856_v13, %v3357_v12  ;;  %v3362_v17 = vor.u32 %v3855_v14, %v3359_v15  ;;  %v3349_v18 = vld [vmem:[%s5611_s1 + $0x40] sm:$0xf]  ;;  %v3854_v19 = vld [vmem:[%s5611_s1 + $0x44] sm:$0xf0]  ;;  %v3853_v20 = vld [vmem:[%s5611_s1 + $0x44] sm:$0xf] }
  0x10   : > { %v3351_v21 = vld [vmem:[%s5611_s1 + $0x48] sm:$0xf0]  ;;  %v3350_v22 = vor.u32 %v3854_v19, %v3349_v18  ;;  %v3341_v24 = vld [vmem:[%s5611_s1 + $0x30] sm:$0xf]  ;;  %v3852_v25 = vld [vmem:[%s5611_s1 + $0x34] sm:$0xf0] }
  0x11   : > { %v3354_v23 = vor.u32 %v3853_v20, %v3351_v21  ;;  %v3851_v26 = vld [vmem:[%s5611_s1 + $0x34] sm:$0xf]  ;;  %v3343_v27 = vld [vmem:[%s5611_s1 + $0x38] sm:$0xf0]  ;;  %v3342_v28 = vor.u32 %v3852_v25, %v3341_v24  ;;  %v3333_v30 = vld [vmem:[%s5611_s1 + $0x20] sm:$0xf] }
  0x12   : > { %621 = vmatpush.bf16.msra.mxu0 %v3366_v10  ;;  %v3346_v29 = vor.u32 %v3851_v26, %v3343_v27  ;;  %v3850_v31 = vld [vmem:[%s5611_s1 + $0x24] sm:$0xf0]  ;;  %v3849_v32 = vld [vmem:[%s5611_s1 + $0x24] sm:$0xf]  ;;  %v3335_v33 = vld [vmem:[%s5611_s1 + $0x28] sm:$0xf0] }
  0x13   : > { %710 = vmatpush.bf16.msra.mxu1 %v3370_v11  ;;  %v3334_v34 = vor.u32 %v3850_v31, %v3333_v30  ;;  %v3338_v35 = vor.u32 %v3849_v32, %v3335_v33  ;;  %v3325_v36 = vld [vmem:[%s5611_s1 + $0x10] sm:$0xf]  ;;  %v3848_v37 = vld [vmem:[%s5611_s1 + $0x14] sm:$0xf0]  ;;  %s5623_s25 = smov (!%p379_p3, %s3247_s25), 127 }
  0x14   : > { %v3847_v38 = vld [vmem:[%s5611_s1 + $0x14] sm:$0xf]  ;;  %v3327_v39 = vld [vmem:[%s5611_s1 + $0x18] sm:$0xf0]  ;;  %v3326_v40 = vor.u32 %v3848_v37, %v3325_v36  ;;  %v3317_v41 = vld [vmem:[%s5611_s1] sm:$0xf] }
  0x15   : > { %v3330_v42 = vor.u32 %v3847_v38, %v3327_v39  ;;  %v3846_v43 = vld [vmem:[%s5611_s1 + $0x4] sm:$0xf0]  ;;  %v3845_v44 = vld [vmem:[%s5611_s1 + $0x4] sm:$0xf]  ;;  %s3248_s12 = sshll.u32 %s5623_s25, 2 }
  0x16   : > { %622 = vmatpush.bf16.msra.mxu0 %v3358_v16  ;;  %v3319_v45 = vld [vmem:[%s5611_s1 + $0x8] sm:$0xf0]  ;;  %v3875_v46 = vld [vmem:[%s5613_s3 + $0x74] sm:$0xf]  ;;  %v3439_v47 = vld [vmem:[%s5613_s3 + $0x78] sm:$0xf0]  ;;  %v3318_v50 = vor.u32 %v3846_v43, %v3317_v41  ;;  %s4174_s27 = scalar_lea.vmem %s5610_s0, %s3248_s12 }
  0x17   : > { %711 = vmatpush.bf16.msra.mxu1 %v3362_v17  ;;  %v3891_v48 = vld [vmem:[%s5613_s3 + $0xf4] sm:$0xf]  ;;  %v3503_v49 = vld [vmem:[%s5613_s3 + $0xf8] sm:$0xf0]  ;;  %v3322_v51 = vor.u32 %v3845_v44, %v3319_v45  ;;  %v3442_v52 = vor.u32 %v3875_v46, %v3439_v47  ;;  %v3829_v54 = vld [vmem:[%s4174_s27] sm:$0xff]  ;;  %s3250_s12 = sshll.u32 %s5623_s25, 3 }
  0x18   : > { %v3506_v53 = vor.u32 %v3891_v48, %v3503_v49  ;;  %v3873_v55 = vld [vmem:[%s5613_s3 + $0x64] sm:$0xf]  ;;  %v3431_v56 = vld [vmem:[%s5613_s3 + $0x68] sm:$0xf0]  ;;  %v3831_v62 = vld [vmem:[%s4174_s27 + $0x10] sm:$0xff]  ;;  %s5521_s18 = scalar_lea.vmem %s5621_s11, %s3250_s12 }
  0x19   : > { %v3889_v57 = vld [vmem:[%s5613_s3 + $0xe4] sm:$0xf]  ;;  %v3434_v58 = vor.u32 %v3873_v55, %v3431_v56  ;;  %v3495_v59 = vld [vmem:[%s5613_s3 + $0xe8] sm:$0xf0]  ;;  %v3871_v63 = vld [vmem:[%s5613_s3 + $0x54] sm:$0xf] }
  0x1a   : > { %623 = vmatpush.bf16.msra.mxu0 %v3350_v22  ;;  %v3498_v60 = vor.u32 %v3889_v57, %v3495_v59  ;;  %v3830_v61 = vld [vmem:[%s4174_s27 + $0x8] sm:$0xff]  ;;  %v3423_v0 = vld [vmem:[%s5613_s3 + $0x58] sm:$0xf0]  ;;  %v3887_v1 = vld [vmem:[%s5613_s3 + $0xd4] sm:$0xf] }
  0x1b   : > { %712 = vmatpush.bf16.msra.mxu1 %v3354_v23  ;;  %v3426_v2 = vor.u32 %v3871_v63, %v3423_v0  ;;  %v3487_v3 = vld [vmem:[%s5613_s3 + $0xd8] sm:$0xf0]  ;;  %v3833_v6 = vld [vmem:[%s4174_s27 + $0x20] sm:$0xff]  ;;  %v3415_v8 = vld [vmem:[%s5613_s3 + $0x48] sm:$0xf0] }
  0x1c   : > { %v3490_v4 = vor.u32 %v3887_v1, %v3487_v3  ;;  %v3832_v5 = vld [vmem:[%s4174_s27 + $0x18] sm:$0xff]  ;;  %v3869_v7 = vld [vmem:[%s5613_s3 + $0x44] sm:$0xf]  ;;  %v3479_v11 = vld [vmem:[%s5613_s3 + $0xc8] sm:$0xf0] }
  0x1d   : > { %v3885_v9 = vld [vmem:[%s5613_s3 + $0xc4] sm:$0xf]  ;;  %v3418_v10 = vor.u32 %v3869_v7, %v3415_v8  ;;  %v3437_v12 = vld [vmem:[%s5613_s3 + $0x70] sm:$0xf]  ;;  %v3876_v13 = vld [vmem:[%s5613_s3 + $0x74] sm:$0xf0] }
  0x1e   : > { %624 = vmatpush.bf16.msra.mxu0 %v3342_v28  ;;  %v3482_v14 = vor.u32 %v3885_v9, %v3479_v11  ;;  %v3438_v15 = vor.u32 %v3876_v13, %v3437_v12  ;;  %v3501_v16 = vld [vmem:[%s5613_s3 + $0xf0] sm:$0xf]  ;;  %v3892_v17 = vld [vmem:[%s5613_s3 + $0xf4] sm:$0xf0]  ;;  %v3834_v19 = vld [vmem:[%s4174_s27 + $0x28] sm:$0xff] }
  0x1f   : > { %713 = vmatpush.bf16.msra.mxu1 %v3346_v29  ;;  %v3502_v18 = vor.u32 %v3892_v17, %v3501_v16  ;;  %v3429_v20 = vld [vmem:[%s5613_s3 + $0x60] sm:$0xf]  ;;  %v3874_v21 = vld [vmem:[%s5613_s3 + $0x64] sm:$0xf0]  ;;  %v3421_v26 = vld [vmem:[%s5613_s3 + $0x50] sm:$0xf] }
  0x20   : > { %1092 = vmatpush.bf16.msra.mxu2 %v3438_v15  ;;  %v3493_v22 = vld [vmem:[%s5613_s3 + $0xe0] sm:$0xf]  ;;  %v3430_v23 = vor.u32 %v3874_v21, %v3429_v20  ;;  %v3890_v24 = vld [vmem:[%s5613_s3 + $0xe4] sm:$0xf0]  ;;  %v3872_v27 = vld [vmem:[%s5613_s3 + $0x54] sm:$0xf0] }
  0x21   : > { %1181 = vmatpush.bf16.msra.mxu3 %v3502_v18  ;;  %v3494_v25 = vor.u32 %v3890_v24, %v3493_v22  ;;  %v3485_v28 = vld [vmem:[%s5613_s3 + $0xd0] sm:$0xf]  ;;  %v3422_v29 = vor.u32 %v3872_v27, %v3421_v26  ;;  %v3888_v30 = vld [vmem:[%s5613_s3 + $0xd4] sm:$0xf0]  ;;  %v3413_v32 = vld [vmem:[%s5613_s3 + $0x40] sm:$0xf] }
  0x22   : > { %625 = vmatpush.bf16.msra.mxu0 %v3334_v34  ;;  %v3486_v31 = vor.u32 %v3888_v30, %v3485_v28  ;;  %v3870_v33 = vld [vmem:[%s5613_s3 + $0x44] sm:$0xf0]  ;;  %v3477_v34 = vld [vmem:[%s5613_s3 + $0xc0] sm:$0xf]  ;;  %v3405_v38 = vld [vmem:[%s5613_s3 + $0x30] sm:$0xf] }
  0x23   : > { %714 = vmatpush.bf16.msra.mxu1 %v3338_v35  ;;  %v3886_v35 = vld [vmem:[%s5613_s3 + $0xc4] sm:$0xf0]  ;;  %v3414_v36 = vor.u32 %v3870_v33, %v3413_v32  ;;  %v3868_v39 = vld [vmem:[%s5613_s3 + $0x34] sm:$0xf0]  ;;  %v3835_v41 = vld [vmem:[%s4174_s27 + $0x30] sm:$0xff] }
  0x24   : > { %1093 = vmatpush.bf16.msra.mxu2 %v3430_v23  ;;  %v3478_v37 = vor.u32 %v3886_v35, %v3477_v34  ;;  %v3884_v43 = vld [vmem:[%s5613_s3 + $0xb4] sm:$0xf0]  ;;  %v3397_v45 = vld [vmem:[%s5613_s3 + $0x20] sm:$0xf]  ;;  %v3866_v46 = vld [vmem:[%s5613_s3 + $0x24] sm:$0xf0] }
  0x25   : > { %1182 = vmatpush.bf16.msra.mxu3 %v3494_v25  ;;  %v3398_v47 = vor.u32 %v3866_v46, %v3397_v45  ;;  %v3461_v48 = vld [vmem:[%s5613_s3 + $0xa0] sm:$0xf]  ;;  %v3882_v49 = vld [vmem:[%s5613_s3 + $0xa4] sm:$0xf0]  ;;  %v3471_v55 = vld [vmem:[%s5613_s3 + $0xb8] sm:$0xf0] }
  0x26   : > { %626 = vmatpush.bf16.msra.mxu0 %v3326_v40  ;;  %v3469_v40 = vld [vmem:[%s5613_s3 + $0xb0] sm:$0xf]  ;;  %v3381_v63 = vld [vmem:[%s5613_s3] sm:$0xf]  ;;  %v3862_v0 = vld [vmem:[%s5613_s3 + $0x4] sm:$0xf0] }
  0x27   : > { %715 = vmatpush.bf16.msra.mxu1 %v3330_v42  ;;  %v3406_v42 = vor.u32 %v3868_v39, %v3405_v38  ;;  %v3470_v44 = vor.u32 %v3884_v43, %v3469_v40  ;;  %v3389_v57 = vld [vmem:[%s5613_s3 + $0x10] sm:$0xf]  ;;  %v3445_v1 = vld [vmem:[%s5613_s3 + $0x80] sm:$0xf]  ;;  %v3878_v3 = vld [vmem:[%s5613_s3 + $0x84] sm:$0xf0] }
  0x28   : > { %1094 = vmatpush.bf16.msra.mxu2 %v3422_v29  ;;  %v3453_v59 = vld [vmem:[%s5613_s3 + $0x90] sm:$0xf]  ;;  %v3908_v7 = vld [vmem:[%s5615_s5 + $0x74] sm:$0xf0]  ;;  %v3837_v12 = vld [vmem:[%s4174_s27 + $0x40] sm:$0xff] }
  0x29   : > { %1183 = vmatpush.bf16.msra.mxu3 %v3486_v31  ;;  %v3629_v9 = vld [vmem:[%s5615_s5 + $0xf0] sm:$0xf]  ;;  %v438_v13 = vld [vmem:[%s5612_s2] sm:$0x3]  ;;  %v3865_v18 = vld [vmem:[%s5613_s3 + $0x24] sm:$0xf] }
  0x2a   : > { %627 = vmatpush.bf16.msra.mxu0 %v3318_v50  ;;  %v3867_v50 = vld [vmem:[%s5613_s3 + $0x34] sm:$0xf]  ;;  %v4344_v16 = vperm.slane %v438_v13, 0  ;;  %v4346_v17 = vperm.slane %v438_v13, 1  ;;  %v3881_v21 = vld [vmem:[%s5613_s3 + $0xa4] sm:$0xf] }
  0x2b   : > { %716 = vmatpush.bf16.msra.mxu1 %v3322_v51  ;;  %v3407_v51 = vld [vmem:[%s5613_s3 + $0x38] sm:$0xf0]  ;;  %v3463_v22 = vld [vmem:[%s5613_s3 + $0xa8] sm:$0xf0]  ;;  %v3557_v38 = vld [vmem:[%s5615_s5 + $0x60] sm:$0xf] }
  0x2c   : > { %1095 = vmatpush.bf16.msra.mxu2 %v3414_v36  ;;  %v3466_v23 = vor.u32 %v3881_v21, %v3463_v22  ;;  %v3838_v36 = vld [vmem:[%s4174_s27 + $0x48] sm:$0xff]  ;;  %v3613_v22 = vld [vmem:[%s5615_s5 + $0xd0] sm:$0xf] }
  0x2d   : > { %628 = vmatmul.bf16.vlgmr.msra.gmra.mxu0 %v3829_v54  ;;  %1184 = vmatpush.bf16.msra.mxu3 %v3478_v37  ;;  %v3906_v39 = vld [vmem:[%s5615_s5 + $0x64] sm:$0xf0] }
  0x2e   : > { %1270 = vmatpush.bf16.msrb.mxu0 %v3442_v52  ;;  %717 = vmatmul.bf16.vlgmr.msra.gmra.mxu1 %v3829_v54  ;;  %v3462_v52 = vor.u32 %v3882_v49, %v3461_v48  ;;  %v3410_v54 = vor.u32 %v3867_v50, %v3407_v51  ;;  %v3922_v43 = vld [vmem:[%s5615_s5 + $0xe4] sm:$0xf0] }
  0x2f   : > { %1359 = vmatpush.bf16.msrb.mxu1 %v3506_v53  ;;  %v3883_v53 = vld [vmem:[%s5613_s3 + $0xb4] sm:$0xf] }
  0x30   : > { %1096 = vmatpush.bf16.msra.mxu2 %v3406_v42  ;;  %v3474_v56 = vor.u32 %v3883_v53, %v3471_v55  ;;  %v3621_v42 = vld [vmem:[%s5615_s5 + $0xe0] sm:$0xf] }
  0x31   : > { %1185 = vmatpush.bf16.msra.mxu3 %v3470_v44  ;;  %v3622_v44 = vor.u32 %v3922_v43, %v3621_v42  ;;  %v3861_v42 = vld [vmem:[%s5613_s3 + $0x4] sm:$0xf]  ;;  %v3383_v43 = vld [vmem:[%s5613_s3 + $0x8] sm:$0xf0] }
  0x32   : > { %1271 = vmatpush.bf16.msrb.mxu0 %v3434_v58  ;;  %v3864_v58 = vld [vmem:[%s5613_s3 + $0x14] sm:$0xf0] }
  0x33   : > { %1360 = vmatpush.bf16.msrb.mxu1 %v3498_v60  ;;  %v3390_v60 = vor.u32 %v3864_v58, %v3389_v57  ;;  %v3839_v57 = vld [vmem:[%s4174_s27 + $0x50] sm:$0xff] }
  0x34   : > { %1097 = vmatpush.bf16.msra.mxu2 %v3398_v47 }
  0x35   : > { %1186 = vmatpush.bf16.msra.mxu3 %v3462_v52 }
  0x36   : > { %1272 = vmatpush.bf16.msrb.mxu0 %v3426_v2  ;;  %v3382_v2 = vor.u32 %v3862_v0, %v3381_v63  ;;  %v3879_v63 = vld [vmem:[%s5613_s3 + $0x94] sm:$0xf]  ;;  %v3455_v0 = vld [vmem:[%s5613_s3 + $0x98] sm:$0xf0] }
  0x37   : > { %1361 = vmatpush.bf16.msrb.mxu1 %v3490_v4  ;;  %v3446_v4 = vor.u32 %v3878_v3, %v3445_v1  ;;  %v3458_v1 = vor.u32 %v3879_v63, %v3455_v0  ;;  %v3541_v0 = vld [vmem:[%s5615_s5 + $0x40] sm:$0xf] }
  0x38   : > { %1098 = vmatpush.bf16.msra.mxu2 %v3390_v60  ;;  %v3863_v60 = vld [vmem:[%s5613_s3 + $0x14] sm:$0xf] }
  0x3a   : > { %1273 = vmatpush.bf16.msrb.mxu0 %v3418_v10  ;;  %v3924_v10 = vld [vmem:[%s5615_s5 + $0xf4] sm:$0xf0] }
  0x3b   : > { %1362 = vmatpush.bf16.msrb.mxu1 %v3482_v14  ;;  %v3630_v11 = vor.u32 %v3924_v10, %v3629_v9 }
  0x3c   : > { %1099 = vmatpush.bf16.msra.mxu2 %v3382_v2 }
  0x3d   : > { %633 = vmatmul.bf16.gmra.mxu0 %v3830_v61 }
  0x3e   : > { %722 = vmatmul.bf16.gmra.mxu1 %v3830_v61  ;;  %1274 = vmatpush.bf16.msrb.mxu0 %v3410_v54  ;;  %v3880_v61 = vld [vmem:[%s5613_s3 + $0x94] sm:$0xf0] }
  0x3f   : > { %1363 = vmatpush.bf16.msrb.mxu1 %v3474_v56 }
  0x43   : > { %1364 = vmatpush.bf16.msrb.mxu1 %v3466_v23  ;;  %v3920_v23 = vld [vmem:[%s5615_s5 + $0xd4] sm:$0xf0] }
  0x47   : > { %1365 = vmatpush.bf16.msrb.mxu1 %v3458_v1  ;;  %v3902_v1 = vld [vmem:[%s5615_s5 + $0x44] sm:$0xf0] }
  0x4d   : > { %638 = vmatmul.bf16.gmra.mxu0 %v3831_v62 }
  0x4e   : > { %727 = vmatmul.bf16.gmra.mxu1 %v3831_v62  ;;  %v3454_v62 = vor.u32 %v3880_v61, %v3453_v59  ;;  %v3391_v61 = vld [vmem:[%s5613_s3 + $0x18] sm:$0xf0] }
  0x50   : > { %1187 = vmatpush.bf16.msra.mxu3 %v3454_v62  ;;  %v3394_v62 = vor.u32 %v3863_v60, %v3391_v61 }
  0x54   : > { %1188 = vmatpush.bf16.msra.mxu3 %v3446_v4 }
  0x58   : > { %1831 = vmatpush.bf16.msrb.mxu3 %v3630_v11 }
  0x5c   : > { %1832 = vmatpush.bf16.msrb.mxu3 %v3622_v44  ;;  %v3386_v44 = vor.u32 %v3861_v42, %v3383_v43 }
  0x5d   : > { %643 = vmatmul.bf16.gmra.mxu0 %v3832_v5 }
  0x5e   : > { %732 = vmatmul.bf16.gmra.mxu1 %v3832_v5  ;;  %v3836_v5 = vld [vmem:[%s4174_s27 + $0x38] sm:$0xff] }
  0x6d   : > { %648 = vmatmul.bf16.gmra.mxu0 %v3833_v6 }
  0x6e   : > { %737 = vmatmul.bf16.gmra.mxu1 %v3833_v6  ;;  %v3565_v6 = vld [vmem:[%s5615_s5 + $0x70] sm:$0xf] }
  0x6f   : > { %v3566_v8 = vor.u32 %v3908_v7, %v3565_v6 }
  0x71   : > { %1742 = vmatpush.bf16.msrb.mxu2 %v3566_v8 }
  0x7d   : > { %653 = vmatmul.bf16.gmra.mxu0 %v3834_v19 }
  0x7e   : > { %742 = vmatmul.bf16.gmra.mxu1 %v3834_v19  ;;  %v3399_v19 = vld [vmem:[%s5613_s3 + $0x28] sm:$0xf0] }
  0x7f   : > { %v3402_v20 = vor.u32 %v3865_v18, %v3399_v19  ;;  %v3549_v18 = vld [vmem:[%s5615_s5 + $0x50] sm:$0xf]  ;;  %v3904_v19 = vld [vmem:[%s5615_s5 + $0x54] sm:$0xf0] }
  0x80   : > { %v3550_v21 = vor.u32 %v3904_v19, %v3549_v18 }
  0x81   : > { %1275 = vmatpush.bf16.msrb.mxu0 %v3402_v20 }
  0x85   : > { %1276 = vmatpush.bf16.msrb.mxu0 %v3394_v62  ;;  %v3842_v62 = vld [vmem:[%s4174_s27 + $0x68] sm:$0xff] }
  0x89   : > { %1277 = vmatpush.bf16.msrb.mxu0 %v3386_v44 }
  0x8d   : > { %658 = vmatmul.bf16.gmra.mxu0 %v3835_v41 }
  0x8e   : > { %747 = vmatmul.bf16.gmra.mxu1 %v3835_v41  ;;  %v3558_v41 = vor.u32 %v3906_v39, %v3557_v38  ;;  %v3841_v39 = vld [vmem:[%s4174_s27 + $0x60] sm:$0xff] }
  0x90   : > { %1743 = vmatpush.bf16.msrb.mxu2 %v3558_v41 }
  0x94   : > { %1744 = vmatpush.bf16.msrb.mxu2 %v3550_v21 }
  0x9d   : > { %663 = vmatmul.bf16.gmra.mxu0 %v3836_v5 }
  0x9e   : > { %752 = vmatmul.bf16.gmra.mxu1 %v3836_v5 }
  0xaa   : > { %v629_v14 = vpop.f32.mrf.mxu0 }
  0xab   : > { %v718_v15 = vpop.f32.mrf.mxu1  ;;  %v630_v24 = vadd.f32 %v629_v14, %v4344_v16  ;;  %v3840_v14 = vld [vmem:[%s4174_s27 + $0x58] sm:$0xff] }
  0xac   : > { %v719_v25 = vadd.f32 %v718_v15, %v4346_v17 }
  0xad   : > { %668 = vmatmul.bf16.gmra.mxu0 %v3837_v12  ;;  %v798_v30 = vmax.f32 %v630_v24, 0.0  ;;  %v3614_v24 = vor.u32 %v3920_v23, %v3613_v22  ;;  %v3843_v23 = vld [vmem:[%s4174_s27 + $0x70] sm:$0xff] }
  0xae   : > { %757 = vmatmul.bf16.gmra.mxu1 %v3837_v12  ;;  %v799_v32 = vmax.f32 %v719_v25, 0.0 }
  0xaf   : > { %1833 = vmatpush.bf16.msrb.mxu3 %v3614_v24 }
  0xb2   : > { %v631_v26 = vpop.f32.mrf.mxu0 }
  0xb3   : > { %v632_v27 = vadd.f32 %v631_v26, %v4344_v16  ;;  %v720_v28 = vpop.f32.mrf.mxu1 }
  0xb4   : > { %v721_v29 = vadd.f32 %v720_v28, %v4346_v17 }
  0xb5   : > { %v800_v31 = vmax.f32 %v632_v27, 0.0 }
  0xb6   : > { %v801_v33 = vmax.f32 %v721_v29, 0.0 }
  0xb7   : > { %v4364_v34 = vpack.c.bf16 %v800_v31, %v798_v30 }
  0xb8   : > { %v4366_v35 = vpack.c.bf16 %v801_v33, %v799_v32 }
  0xb9   : > { %1100 = vmatmul.bf16.vlgmr.msra.gmra.mxu2 %v4364_v34 }
  0xba   : > { %1189 = vmatmul.bf16.vlgmr.msra.gmra.mxu3 %v4366_v35  ;;  %v634_v37 = vpop.f32.mrf.mxu0 }
  0xbb   : > { %v723_v40 = vpop.f32.mrf.mxu1  ;;  %v635_v45 = vadd.f32 %v634_v37, %v4344_v16 }
  0xbc   : > { %v724_v46 = vadd.f32 %v723_v40, %v4346_v17 }
  0xbd   : > { %673 = vmatmul.bf16.gmra.mxu0 %v3838_v36  ;;  %v802_v51 = vmax.f32 %v635_v45, 0.0  ;;  %v3877_v45 = vld [vmem:[%s5613_s3 + $0x84] sm:$0xf] }
  0xbe   : > { %762 = vmatmul.bf16.gmra.mxu1 %v3838_v36  ;;  %v803_v53 = vmax.f32 %v724_v46, 0.0  ;;  %v3447_v46 = vld [vmem:[%s5613_s3 + $0x88] sm:$0xf0] }
  0xc2   : > { %v636_v47 = vpop.f32.mrf.mxu0 }
  0xc3   : > { %v637_v48 = vadd.f32 %v636_v47, %v4344_v16  ;;  %v725_v49 = vpop.f32.mrf.mxu1  ;;  %v3450_v47 = vor.u32 %v3877_v45, %v3447_v46 }
  0xc4   : > { %v726_v50 = vadd.f32 %v725_v49, %v4346_v17 }
  0xc5   : > { %v804_v52 = vmax.f32 %v637_v48, 0.0  ;;  %1366 = vmatpush.bf16.msrb.mxu1 %v3450_v47 }
  0xc6   : > { %v805_v54 = vmax.f32 %v726_v50, 0.0 }
  0xc7   : > { %v4387_v55 = vpack.c.bf16 %v804_v52, %v802_v51 }
  0xc8   : > { %v4389_v56 = vpack.c.bf16 %v805_v54, %v803_v53 }
  0xc9   : > { %1105 = vmatmul.bf16.gmra.mxu2 %v4387_v55 }
  0xca   : > { %1194 = vmatmul.bf16.gmra.mxu3 %v4389_v56  ;;  %v639_v58 = vpop.f32.mrf.mxu0 }
  0xcb   : > { %v728_v59 = vpop.f32.mrf.mxu1  ;;  %v640_v2 = vadd.f32 %v639_v58, %v4344_v16 }
  0xcc   : > { %v729_v3 = vadd.f32 %v728_v59, %v4346_v17 }
  0xcd   : > { %678 = vmatmul.bf16.gmra.mxu0 %v3839_v57  ;;  %v806_v8 = vmax.f32 %v640_v2, 0.0 }
  0xce   : > { %767 = vmatmul.bf16.gmra.mxu1 %v3839_v57  ;;  %v807_v10 = vmax.f32 %v729_v3, 0.0  ;;  %v3542_v3 = vor.u32 %v3902_v1, %v3541_v0 }
  0xd0   : > { %1745 = vmatpush.bf16.msrb.mxu2 %v3542_v3 }
  0xd2   : > { %v641_v4 = vpop.f32.mrf.mxu0 }
  0xd3   : > { %v642_v5 = vadd.f32 %v641_v4, %v4344_v16  ;;  %v730_v6 = vpop.f32.mrf.mxu1  ;;  %v3605_v4 = vld [vmem:[%s5615_s5 + $0xc0] sm:$0xf] }
  0xd4   : > { %v731_v7 = vadd.f32 %v730_v6, %v4346_v17 }
  0xd5   : > { %v808_v9 = vmax.f32 %v642_v5, 0.0  ;;  %v3918_v5 = vld [vmem:[%s5615_s5 + $0xc4] sm:$0xf0] }
  0xd6   : > { %v809_v11 = vmax.f32 %v731_v7, 0.0  ;;  %v3606_v6 = vor.u32 %v3918_v5, %v3605_v4 }
  0xd7   : > { %v4410_v12 = vpack.c.bf16 %v808_v9, %v806_v8 }
  0xd8   : > { %v4412_v13 = vpack.c.bf16 %v809_v11, %v807_v10  ;;  %1834 = vmatpush.bf16.msrb.mxu3 %v3606_v6 }
  0xd9   : > { %1110 = vmatmul.bf16.gmra.mxu2 %v4410_v12 }
  0xda   : > { %1199 = vmatmul.bf16.gmra.mxu3 %v4412_v13  ;;  %v644_v15 = vpop.f32.mrf.mxu0 }
  0xdb   : > { %v733_v20 = vpop.f32.mrf.mxu1  ;;  %v645_v25 = vadd.f32 %v644_v15, %v4344_v16 }
  0xdc   : > { %v734_v26 = vadd.f32 %v733_v20, %v4346_v17 }
  0xdd   : > { %683 = vmatmul.bf16.gmra.mxu0 %v3840_v14  ;;  %v810_v31 = vmax.f32 %v645_v25, 0.0 }
  0xde   : > { %772 = vmatmul.bf16.gmra.mxu1 %v3840_v14  ;;  %v811_v33 = vmax.f32 %v734_v26, 0.0  ;;  %v3907_v26 = vld [vmem:[%s5615_s5 + $0x74] sm:$0xf] }
  0xe2   : > { %v646_v27 = vpop.f32.mrf.mxu0 }
  0xe3   : > { %v647_v28 = vadd.f32 %v646_v27, %v4344_v16  ;;  %v735_v29 = vpop.f32.mrf.mxu1  ;;  %v3567_v27 = vld [vmem:[%s5615_s5 + $0x78] sm:$0xf0] }
  0xe4   : > { %v736_v30 = vadd.f32 %v735_v29, %v4346_v17  ;;  %v3923_v29 = vld [vmem:[%s5615_s5 + $0xf4] sm:$0xf] }
  0xe5   : > { %v812_v32 = vmax.f32 %v647_v28, 0.0  ;;  %v3570_v28 = vor.u32 %v3907_v26, %v3567_v27 }
  0xe6   : > { %v813_v36 = vmax.f32 %v736_v30, 0.0  ;;  %v3631_v30 = vld [vmem:[%s5615_s5 + $0xf8] sm:$0xf0] }
  0xe7   : > { %v4433_v37 = vpack.c.bf16 %v812_v32, %v810_v31  ;;  %v3634_v31 = vor.u32 %v3923_v29, %v3631_v30  ;;  %1920 = vmatpush.bf16.msra.mxu0 %v3570_v28 }
  0xe8   : > { %v4435_v38 = vpack.c.bf16 %v813_v36, %v811_v33 }
  0xe9   : > { %1115 = vmatmul.bf16.gmra.mxu2 %v4433_v37  ;;  %2009 = vmatpush.bf16.msra.mxu1 %v3634_v31  ;;  %v4552_v31 = vld [vmem:[%s5614_s4] sm:$0x3] }
  0xea   : > { %1204 = vmatmul.bf16.gmra.mxu3 %v4435_v38  ;;  %v649_v40 = vpop.f32.mrf.mxu0 }
  0xeb   : > { %v738_v41 = vpop.f32.mrf.mxu1  ;;  %v650_v48 = vadd.f32 %v649_v40, %v4344_v16 }
  0xec   : > { %v739_v49 = vadd.f32 %v738_v41, %v4346_v17 }
  0xed   : > { %688 = vmatmul.bf16.gmra.mxu0 %v3841_v39  ;;  %v814_v54 = vmax.f32 %v650_v48, 0.0  ;;  %v3844_v48 = vld [vmem:[%s4174_s27 + $0x78] sm:$0xff] }
  0xee   : > { %777 = vmatmul.bf16.gmra.mxu1 %v3841_v39  ;;  %v815_v58 = vmax.f32 %v739_v49, 0.0 }
  0xf2   : > { %v651_v50 = vpop.f32.mrf.mxu0 }
  0xf3   : > { %v652_v51 = vadd.f32 %v651_v50, %v4344_v16  ;;  %v740_v52 = vpop.f32.mrf.mxu1  ;;  %v3533_v50 = vld [vmem:[%s5615_s5 + $0x30] sm:$0xf] }
  0xf4   : > { %v741_v53 = vadd.f32 %v740_v52, %v4346_v17 }
  0xf5   : > { %v816_v57 = vmax.f32 %v652_v51, 0.0  ;;  %v3900_v51 = vld [vmem:[%s5615_s5 + $0x34] sm:$0xf0] }
  0xf6   : > { %v817_v59 = vmax.f32 %v741_v53, 0.0  ;;  %v3534_v53 = vor.u32 %v3900_v51, %v3533_v50  ;;  %v3914_v50 = vld [vmem:[%s5615_s5 + $0xa4] sm:$0xf0] }
  0xf7   : > { %v4456_v60 = vpack.c.bf16 %v816_v57, %v814_v54  ;;  %v3597_v54 = vld [vmem:[%s5615_s5 + $0xb0] sm:$0xf]  ;;  %v3916_v57 = vld [vmem:[%s5615_s5 + $0xb4] sm:$0xf0] }
  0xf8   : > { %v4458_v61 = vpack.c.bf16 %v817_v59, %v815_v58  ;;  %1746 = vmatpush.bf16.msrb.mxu2 %v3534_v53  ;;  %v3598_v58 = vor.u32 %v3916_v57, %v3597_v54 }
  0xf9   : > { %1120 = vmatmul.bf16.gmra.mxu2 %v4456_v60 }
  0xfa   : > { %1209 = vmatmul.bf16.gmra.mxu3 %v4458_v61  ;;  %v654_v63 = vpop.f32.mrf.mxu0 }
  0xfb   : > { %v743_v2 = vpop.f32.mrf.mxu1  ;;  %v655_v7 = vadd.f32 %v654_v63, %v4344_v16  ;;  %1835 = vmatpush.bf16.msrb.mxu3 %v3598_v58 }
  0xfc   : > { %v744_v8 = vadd.f32 %v743_v2, %v4346_v17 }
  0xfd   : > { %693 = vmatmul.bf16.gmra.mxu0 %v3842_v62  ;;  %v818_v15 = vmax.f32 %v655_v7, 0.0 }
  0xfe   : > { %782 = vmatmul.bf16.gmra.mxu1 %v3842_v62  ;;  %v819_v19 = vmax.f32 %v744_v8, 0.0 }
 0x102   : > { %v656_v9 = vpop.f32.mrf.mxu0 }
 0x103   : > { %v657_v10 = vadd.f32 %v656_v9, %v4344_v16  ;;  %v745_v11 = vpop.f32.mrf.mxu1 }
 0x104   : > { %v746_v14 = vadd.f32 %v745_v11, %v4346_v17 }
 0x105   : > { %v820_v18 = vmax.f32 %v657_v10, 0.0 }
 0x106   : > { %v821_v20 = vmax.f32 %v746_v14, 0.0  ;;  %v3905_v14 = vld [vmem:[%s5615_s5 + $0x64] sm:$0xf] }
 0x107   : > { %v4479_v21 = vpack.c.bf16 %v820_v18, %v818_v15  ;;  %v3559_v15 = vld [vmem:[%s5615_s5 + $0x68] sm:$0xf0]  ;;  %v3921_v18 = vld [vmem:[%s5615_s5 + $0xe4] sm:$0xf] }
 0x108   : > { %v4481_v22 = vpack.c.bf16 %v821_v20, %v819_v19 }
 0x109   : > { %1125 = vmatmul.bf16.gmra.mxu2 %v4479_v21 }
 0x10a   : > { %1214 = vmatmul.bf16.gmra.mxu3 %v4481_v22  ;;  %v659_v24 = vpop.f32.mrf.mxu0 }
 0x10b   : > { %v748_v25 = vpop.f32.mrf.mxu1  ;;  %v660_v32 = vadd.f32 %v659_v24, %v4344_v16 }
 0x10c   : > { %v749_v33 = vadd.f32 %v748_v25, %v4346_v17 }
 0x10d   : > { %698 = vmatmul.bf16.gmra.mxu0 %v3843_v23  ;;  %v822_v42 = vmax.f32 %v660_v32, 0.0 }
 0x10e   : > { %787 = vmatmul.bf16.gmra.mxu1 %v3843_v23  ;;  %v823_v44 = vmax.f32 %v749_v33, 0.0 }
 0x112   : > { %v661_v36 = vpop.f32.mrf.mxu0 }
 0x113   : > { %v662_v39 = vadd.f32 %v661_v36, %v4344_v16  ;;  %v750_v40 = vpop.f32.mrf.mxu1  ;;  %v4560_v36 = vperm.slane %v4552_v31, 0 }
 0x114   : > { %v751_v41 = vadd.f32 %v750_v40, %v4346_v17  ;;  %v3525_v40 = vld [vmem:[%s5615_s5 + $0x20] sm:$0xf] }
 0x115   : > { %v824_v43 = vmax.f32 %v662_v39, 0.0 }
 0x116   : > { %v825_v45 = vmax.f32 %v751_v41, 0.0  ;;  %v3898_v41 = vld [vmem:[%s5615_s5 + $0x24] sm:$0xf0] }
 0x117   : > { %v4502_v46 = vpack.c.bf16 %v824_v43, %v822_v42  ;;  %v3526_v43 = vor.u32 %v3898_v41, %v3525_v40 }
 0x118   : > { %v4504_v47 = vpack.c.bf16 %v825_v45, %v823_v44 }
 0x119   : > { %1130 = vmatmul.bf16.gmra.mxu2 %v4502_v46 }
 0x11a   : > { %1219 = vmatmul.bf16.gmra.mxu3 %v4504_v47  ;;  %v664_v49 = vpop.f32.mrf.mxu0  ;;  %1747 = vmatpush.bf16.msrb.mxu2 %v3526_v43 }
 0x11b   : > { %v753_v52 = vpop.f32.mrf.mxu1  ;;  %v665_v59 = vadd.f32 %v664_v49, %v4344_v16  ;;  %v3589_v49 = vld [vmem:[%s5615_s5 + $0xa0] sm:$0xf] }
 0x11c   : > { %v754_v62 = vadd.f32 %v753_v52, %v4346_v17  ;;  %v3590_v52 = vor.u32 %v3914_v50, %v3589_v49 }
 0x11d   : > { %703 = vmatmul.bf16.gmra.mxu0 %v3844_v48  ;;  %v826_v3 = vmax.f32 %v665_v59, 0.0 }
 0x11e   : > { %792 = vmatmul.bf16.gmra.mxu1 %v3844_v48  ;;  %v827_v5 = vmax.f32 %v754_v62, 0.0  ;;  %1836 = vmatpush.bf16.msrb.mxu3 %v3590_v52 }
 0x122   : > { %v666_v63 = vpop.f32.mrf.mxu0 }
 0x123   : > { %v667_v0 = vadd.f32 %v666_v63, %v4344_v16  ;;  %v755_v1 = vpop.f32.mrf.mxu1 }
 0x124   : > { %v756_v2 = vadd.f32 %v755_v1, %v4346_v17 }
 0x125   : > { %v828_v4 = vmax.f32 %v667_v0, 0.0 }
 0x126   : > { %v829_v6 = vmax.f32 %v756_v2, 0.0 }
 0x127   : > { %v4525_v7 = vpack.c.bf16 %v828_v4, %v826_v3 }
 0x128   : > { %v4527_v8 = vpack.c.bf16 %v829_v6, %v827_v5 }
 0x129   : > { %1135 = vmatmul.bf16.gmra.mxu2 %v4525_v7 }
 0x12a   : > { %1224 = vmatmul.bf16.gmra.mxu3 %v4527_v8  ;;  %v669_v9 = vpop.f32.mrf.mxu0 }
 0x12b   : > { %v758_v10 = vpop.f32.mrf.mxu1  ;;  %v670_v11 = vadd.f32 %v669_v9, %v4344_v16 }
 0x12c   : > { %v759_v19 = vadd.f32 %v758_v10, %v4346_v17 }
 0x12d   : > { %1278 = vmatmul.bf16.vlgmr.msrb.gmra.mxu0 %v4364_v34  ;;  %v3562_v34 = vor.u32 %v3905_v14, %v3559_v15  ;;  %v830_v27 = vmax.f32 %v670_v11, 0.0 }
 0x12e   : > { %1367 = vmatmul.bf16.vlgmr.msrb.gmra.mxu1 %v4366_v35  ;;  %v3623_v35 = vld [vmem:[%s5615_s5 + $0xe8] sm:$0xf0]  ;;  %v831_v29 = vmax.f32 %v759_v19, 0.0 }
 0x12f   : > { %v3626_v25 = vor.u32 %v3921_v18, %v3623_v35  ;;  %1921 = vmatpush.bf16.msra.mxu0 %v3562_v34 }
 0x131   : > { %2010 = vmatpush.bf16.msra.mxu1 %v3626_v25 }
 0x132   : > { %v671_v20 = vpop.f32.mrf.mxu0 }
 0x133   : > { %v672_v23 = vadd.f32 %v671_v20, %v4344_v16  ;;  %v760_v24 = vpop.f32.mrf.mxu1 }
 0x134   : > { %v761_v26 = vadd.f32 %v760_v24, %v4346_v17  ;;  %v3551_v24 = vld [vmem:[%s5615_s5 + $0x58] sm:$0xf0] }
 0x135   : > { %v832_v28 = vmax.f32 %v672_v23, 0.0  ;;  %v3903_v23 = vld [vmem:[%s5615_s5 + $0x54] sm:$0xf] }
 0x136   : > { %v833_v30 = vmax.f32 %v761_v26, 0.0 }
 0x137   : > { %v4554_v32 = vpack.c.bf16 %v832_v28, %v830_v27  ;;  %v3554_v27 = vor.u32 %v3903_v23, %v3551_v24 }
 0x138   : > { %v4556_v33 = vpack.c.bf16 %v833_v30, %v831_v29 }
 0x139   : > { %1140 = vmatmul.bf16.gmra.mxu2 %v4554_v32  ;;  %1922 = vmatpush.bf16.msra.mxu0 %v3554_v27 }
 0x13a   : > { %1229 = vmatmul.bf16.gmra.mxu3 %v4556_v33  ;;  %v674_v39 = vpop.f32.mrf.mxu0 }
 0x13b   : > { %v763_v42 = vpop.f32.mrf.mxu1  ;;  %v675_v53 = vadd.f32 %v674_v39, %v4344_v16 }
 0x13c   : > { %v1101_v44 = vpop.f32.mrf.mxu2  ;;  %v764_v54 = vadd.f32 %v763_v42, %v4346_v17 }
 0x13d   : > { %v1102_v45 = vadd.f32 %v1101_v44, %v4560_v36  ;;  %v1190_v48 = vpop.f32.mrf.mxu3  ;;  %1283 = vmatmul.bf16.gmra.mxu0 %v4387_v55  ;;  %v834_v62 = vmax.f32 %v675_v53, 0.0 }
 0x13e   : > { %1372 = vmatmul.bf16.gmra.mxu1 %v4389_v56  ;;  %v835_v2 = vmax.f32 %v764_v54, 0.0 }
 0x13f   : > { %v1191_v51 = vadd.f32 %v1190_v48, %v1102_v45 }
 0x141   : > { %v1448_v9 = vmax.f32 %v1191_v51, 0.0 }
 0x142   : > { %v676_v57 = vpop.f32.mrf.mxu0 }
 0x143   : > { %v677_v55 = vadd.f32 %v676_v57, %v4344_v16  ;;  %v765_v58 = vpop.f32.mrf.mxu1  ;;  %v3517_v57 = vld [vmem:[%s5615_s5 + $0x10] sm:$0xf] }
 0x144   : > { %v766_v56 = vadd.f32 %v765_v58, %v4346_v17  ;;  %v1103_v59 = vpop.f32.mrf.mxu2 }
 0x145   : > { %v836_v63 = vmax.f32 %v677_v55, 0.0  ;;  %v1104_v0 = vadd.f32 %v1103_v59, %v4560_v36  ;;  %v1192_v1 = vpop.f32.mrf.mxu3  ;;  %v3896_v55 = vld [vmem:[%s5615_s5 + $0x14] sm:$0xf0] }
 0x146   : > { %v837_v3 = vmax.f32 %v766_v56, 0.0  ;;  %v3518_v56 = vor.u32 %v3896_v55, %v3517_v57 }
 0x147   : > { %v1193_v4 = vadd.f32 %v1192_v1, %v1104_v0  ;;  %v4583_v5 = vpack.c.bf16 %v836_v63, %v834_v62  ;;  %v3581_v1 = vld [vmem:[%s5615_s5 + $0x90] sm:$0xf] }
 0x148   : > { %v4585_v6 = vpack.c.bf16 %v837_v3, %v835_v2  ;;  %1748 = vmatpush.bf16.msrb.mxu2 %v3518_v56  ;;  %v3912_v2 = vld [vmem:[%s5615_s5 + $0x94] sm:$0xf0] }
 0x149   : > { %v1450_v10 = vmax.f32 %v1193_v4, 0.0  ;;  %1145 = vmatmul.bf16.gmra.mxu2 %v4583_v5  ;;  %v3582_v4 = vor.u32 %v3912_v2, %v3581_v1 }
 0x14a   : > { %1234 = vmatmul.bf16.gmra.mxu3 %v4585_v6  ;;  %v679_v11 = vpop.f32.mrf.mxu0 }
 0x14b   : > { %v4589_v14 = vpack.c.bf16 %v1450_v10, %v1448_v9  ;;  %v768_v15 = vpop.f32.mrf.mxu1  ;;  %v680_v35 = vadd.f32 %v679_v11, %v4344_v16  ;;  %1837 = vmatpush.bf16.msrb.mxu3 %v3582_v4 }
 0x14c   : > { %v1106_v18 = vpop.f32.mrf.mxu2  ;;  %v769_v25 = vadd.f32 %v768_v15, %v4346_v17 }
 0x14d   : > { %v1107_v19 = vadd.f32 %v1106_v18, %v4560_v36  ;;  %v1195_v20 = vpop.f32.mrf.mxu3  ;;  %1288 = vmatmul.bf16.gmra.mxu0 %v4410_v12  ;;  %v3919_v12 = vld [vmem:[%s5615_s5 + $0xd4] sm:$0xf]  ;;  %v838_v41 = vmax.f32 %v680_v35, 0.0 }
 0x14e   : > { %1377 = vmatmul.bf16.gmra.mxu1 %v4412_v13  ;;  %v3615_v13 = vld [vmem:[%s5615_s5 + $0xd8] sm:$0xf0]  ;;  %v839_v45 = vmax.f32 %v769_v25, 0.0 }
 0x14f   : > { %v1196_v34 = vadd.f32 %v1195_v20, %v1107_v19  ;;  %v3618_v30 = vor.u32 %v3919_v12, %v3615_v13 }
 0x151   : > { %2011 = vmatpush.bf16.msra.mxu1 %v3618_v30  ;;  %v1452_v52 = vmax.f32 %v1196_v34, 0.0 }
 0x152   : > { %v681_v26 = vpop.f32.mrf.mxu0 }
 0x153   : > { %v682_v28 = vadd.f32 %v681_v26, %v4344_v16  ;;  %v770_v29 = vpop.f32.mrf.mxu1 }
 0x154   : > { %v771_v39 = vadd.f32 %v770_v29, %v4346_v17  ;;  %v1108_v40 = vpop.f32.mrf.mxu2 }
 0x155   : > { %v840_v42 = vmax.f32 %v682_v28, 0.0  ;;  %v1109_v43 = vadd.f32 %v1108_v40, %v4560_v36  ;;  %v1197_v44 = vpop.f32.mrf.mxu3 }
 0x156   : > { %v841_v48 = vmax.f32 %v771_v39, 0.0 }
 0x157   : > { %v1198_v49 = vadd.f32 %v1197_v44, %v1109_v43  ;;  %v4611_v50 = vpack.c.bf16 %v840_v42, %v838_v41  ;;  %v3901_v44 = vld [vmem:[%s5615_s5 + $0x44] sm:$0xf] }
 0x158   : > { %v4613_v51 = vpack.c.bf16 %v841_v48, %v839_v45  ;;  %v3543_v45 = vld [vmem:[%s5615_s5 + $0x48] sm:$0xf0] }
 0x159   : > { %v1454_v53 = vmax.f32 %v1198_v49, 0.0  ;;  %1150 = vmatmul.bf16.gmra.mxu2 %v4611_v50 }
 0x15a   : > { %1239 = vmatmul.bf16.gmra.mxu3 %v4613_v51  ;;  %v684_v54 = vpop.f32.mrf.mxu0 }
 0x15b   : > { %v773_v58 = vpop.f32.mrf.mxu1  ;;  %v4623_v59 = vpack.c.bf16 %v1454_v53, %v1452_v52  ;;  %v685_v9 = vadd.f32 %v684_v54, %v4344_v16  ;;  %v3546_v52 = vor.u32 %v3901_v44, %v3543_v45 }
 0x15c   : > { %v1111_v62 = vpop.f32.mrf.mxu2  ;;  %v774_v10 = vadd.f32 %v773_v58, %v4346_v17 }
 0x15d   : > { %v1112_v63 = vadd.f32 %v1111_v62, %v4560_v36  ;;  %v1200_v0 = vpop.f32.mrf.mxu3  ;;  %1293 = vmatmul.bf16.gmra.mxu0 %v4433_v37  ;;  %v842_v19 = vmax.f32 %v685_v9, 0.0 }
 0x15e   : > { %1382 = vmatmul.bf16.gmra.mxu1 %v4435_v38  ;;  %v843_v23 = vmax.f32 %v774_v10, 0.0  ;;  %1923 = vmatpush.bf16.msra.mxu0 %v3546_v52 }
 0x15f   : > { %v1201_v3 = vadd.f32 %v1200_v0, %v1112_v63 }
 0x161   : > { %v1456_v12 = vmax.f32 %v1201_v3, 0.0 }
 0x162   : > { %v686_v11 = vpop.f32.mrf.mxu0 }
 0x163   : > { %v687_v37 = vadd.f32 %v686_v11, %v4344_v16  ;;  %v775_v15 = vpop.f32.mrf.mxu1 }
 0x164   : > { %v776_v38 = vadd.f32 %v775_v15, %v4346_v17  ;;  %v1113_v18 = vpop.f32.mrf.mxu2  ;;  %v3509_v15 = vld [vmem:[%s5615_s5] sm:$0xf] }
 0x165   : > { %v844_v20 = vmax.f32 %v687_v37, 0.0  ;;  %v1114_v34 = vadd.f32 %v1113_v18, %v4560_v36  ;;  %v1202_v35 = vpop.f32.mrf.mxu3 }
 0x166   : > { %v845_v24 = vmax.f32 %v776_v38, 0.0  ;;  %v3894_v38 = vld [vmem:[%s5615_s5 + $0x4] sm:$0xf0] }
 0x167   : > { %v1203_v25 = vadd.f32 %v1202_v35, %v1114_v34  ;;  %v4639_v26 = vpack.c.bf16 %v844_v20, %v842_v19  ;;  %v3510_v19 = vor.u32 %v3894_v38, %v3509_v15 }
 0x168   : > { %v4641_v27 = vpack.c.bf16 %v845_v24, %v843_v23  ;;  %v3573_v24 = vld [vmem:[%s5615_s5 + $0x80] sm:$0xf] }
 0x169   : > { %v1458_v13 = vmax.f32 %v1203_v25, 0.0  ;;  %1155 = vmatmul.bf16.gmra.mxu2 %v4639_v26  ;;  %v3910_v25 = vld [vmem:[%s5615_s5 + $0x84] sm:$0xf0] }
 0x16a   : > { %1244 = vmatmul.bf16.gmra.mxu3 %v4641_v27  ;;  %v689_v28 = vpop.f32.mrf.mxu0  ;;  %1749 = vmatpush.bf16.msrb.mxu2 %v3510_v19 }
 0x16b   : > { %v778_v29 = vpop.f32.mrf.mxu1  ;;  %v4645_v30 = vpack.c.bf16 %v1458_v13, %v1456_v12  ;;  %v690_v43 = vadd.f32 %v689_v28, %v4344_v16  ;;  %v3574_v13 = vor.u32 %v3910_v25, %v3573_v24 }
 0x16c   : > { %v1116_v39 = vpop.f32.mrf.mxu2  ;;  %v779_v48 = vadd.f32 %v778_v29, %v4346_v17 }
 0x16d   : > { %v1117_v40 = vadd.f32 %v1116_v39, %v4560_v36  ;;  %v1205_v41 = vpop.f32.mrf.mxu3  ;;  %1298 = vmatmul.bf16.gmra.mxu0 %v4456_v60  ;;  %v3917_v60 = vld [vmem:[%s5615_s5 + $0xc4] sm:$0xf]  ;;  %v846_v56 = vmax.f32 %v690_v43, 0.0  ;;  %1838 = vmatpush.bf16.msrb.mxu3 %v3574_v13 }
 0x16e   : > { %1387 = vmatmul.bf16.gmra.mxu1 %v4458_v61  ;;  %v3607_v61 = vld [vmem:[%s5615_s5 + $0xc8] sm:$0xf0]  ;;  %v847_v1 = vmax.f32 %v779_v48, 0.0 }
 0x16f   : > { %v1206_v42 = vadd.f32 %v1205_v41, %v1117_v40  ;;  %v3610_v57 = vor.u32 %v3917_v60, %v3607_v61 }
 0x171   : > { %2012 = vmatpush.bf16.msra.mxu1 %v3610_v57  ;;  %v1460_v10 = vmax.f32 %v1206_v42, 0.0 }
 0x172   : > { %v691_v49 = vpop.f32.mrf.mxu0 }
 0x173   : > { %v692_v53 = vadd.f32 %v691_v49, %v4344_v16  ;;  %v780_v54 = vpop.f32.mrf.mxu1 }
 0x174   : > { %v781_v55 = vadd.f32 %v780_v54, %v4346_v17  ;;  %v1118_v58 = vpop.f32.mrf.mxu2 }
 0x175   : > { %v848_v62 = vmax.f32 %v692_v53, 0.0  ;;  %v1119_v63 = vadd.f32 %v1118_v58, %v4560_v36  ;;  %v1207_v0 = vpop.f32.mrf.mxu3 }
 0x176   : > { %v849_v2 = vmax.f32 %v781_v55, 0.0 }
 0x177   : > { %v1208_v3 = vadd.f32 %v1207_v0, %v1119_v63  ;;  %v4667_v4 = vpack.c.bf16 %v848_v62, %v846_v56 }
 0x178   : > { %v4669_v9 = vpack.c.bf16 %v849_v2, %v847_v1  ;;  %v3899_v2 = vld [vmem:[%s5615_s5 + $0x34] sm:$0xf] }
 0x179   : > { %v1462_v11 = vmax.f32 %v1208_v3, 0.0  ;;  %1160 = vmatmul.bf16.gmra.mxu2 %v4667_v4  ;;  %v3535_v3 = vld [vmem:[%s5615_s5 + $0x38] sm:$0xf0] }
 0x17a   : > { %1249 = vmatmul.bf16.gmra.mxu3 %v4669_v9  ;;  %v694_v37 = vpop.f32.mrf.mxu0 }
 0x17b   : > { %v783_v18 = vpop.f32.mrf.mxu1  ;;  %v4679_v20 = vpack.c.bf16 %v1462_v11, %v1460_v10  ;;  %v695_v28 = vadd.f32 %v694_v37, %v4344_v16  ;;  %v3538_v37 = vor.u32 %v3899_v2, %v3535_v3 }
 0x17c   : > { %v1121_v34 = vpop.f32.mrf.mxu2  ;;  %v784_v29 = vadd.f32 %v783_v18, %v4346_v17 }
 0x17d   : > { %v1122_v35 = vadd.f32 %v1121_v34, %v4560_v36  ;;  %v1210_v23 = vpop.f32.mrf.mxu3  ;;  %1303 = vmatmul.bf16.gmra.mxu0 %v4479_v21  ;;  %v850_v42 = vmax.f32 %v695_v28, 0.0 }
 0x17e   : > { %1392 = vmatmul.bf16.gmra.mxu1 %v4481_v22  ;;  %v851_v48 = vmax.f32 %v784_v29, 0.0  ;;  %1924 = vmatpush.bf16.msra.mxu0 %v3538_v37 }
 0x17f   : > { %v1211_v12 = vadd.f32 %v1210_v23, %v1122_v35 }
 0x181   : > { %v1464_v53 = vmax.f32 %v1211_v12, 0.0 }
 0x182   : > { %v696_v39 = vpop.f32.mrf.mxu0 }
 0x183   : > { %v697_v21 = vadd.f32 %v696_v39, %v4344_v16  ;;  %v785_v40 = vpop.f32.mrf.mxu1 }
 0x184   : > { %v786_v22 = vadd.f32 %v785_v40, %v4346_v17  ;;  %v1123_v41 = vpop.f32.mrf.mxu2 }
 0x185   : > { %v852_v43 = vmax.f32 %v697_v21, 0.0  ;;  %v1124_v44 = vadd.f32 %v1123_v41, %v4560_v36  ;;  %v1212_v45 = vpop.f32.mrf.mxu3  ;;  %v3940_v41 = vld [vmem:[%s5617_s7 + $0x74] sm:$0xf0] }
 0x186   : > { %v853_v49 = vmax.f32 %v786_v22, 0.0  ;;  %v3693_v22 = vld [vmem:[%s5617_s7 + $0x70] sm:$0xf] }
 0x187   : > { %v1213_v52 = vadd.f32 %v1212_v45, %v1124_v44  ;;  %v4695_v60 = vpack.c.bf16 %v852_v43, %v850_v42  ;;  %v3694_v43 = vor.u32 %v3940_v41, %v3693_v22  ;;  %v3913_v22 = vld [vmem:[%s5615_s5 + $0xa4] sm:$0xf] }
 0x188   : > { %v4697_v61 = vpack.c.bf16 %v853_v49, %v851_v48 }
 0x189   : > { %v1466_v54 = vmax.f32 %v1213_v52, 0.0  ;;  %1165 = vmatmul.bf16.gmra.mxu2 %v4695_v60 }
 0x18a   : > { %1254 = vmatmul.bf16.gmra.mxu3 %v4697_v61  ;;  %v699_v57 = vpop.f32.mrf.mxu0  ;;  %2392 = vmatpush.bf16.msra.mxu2 %v3694_v43 }
 0x18b   : > { %v788_v55 = vpop.f32.mrf.mxu1  ;;  %v4701_v58 = vpack.c.bf16 %v1466_v54, %v1464_v53  ;;  %v700_v1 = vadd.f32 %v699_v57, %v4344_v16  ;;  %v3757_v54 = vld [vmem:[%s5617_s7 + $0xf0] sm:$0xf]  ;;  %v3956_v57 = vld [vmem:[%s5617_s7 + $0xf4] sm:$0xf0] }
 0x18c   : > { %v1126_v56 = vpop.f32.mrf.mxu2  ;;  %v789_v10 = vadd.f32 %v788_v55, %v4346_v17  ;;  %v3758_v55 = vor.u32 %v3956_v57, %v3757_v54 }
 0x18d   : > { %v1127_v62 = vadd.f32 %v1126_v56, %v4560_v36  ;;  %v1215_v63 = vpop.f32.mrf.mxu3  ;;  %1308 = vmatmul.bf16.gmra.mxu0 %v4502_v46  ;;  %v3915_v46 = vld [vmem:[%s5615_s5 + $0xb4] sm:$0xf]  ;;  %v854_v35 = vmax.f32 %v700_v1, 0.0 }
 0x18e   : > { %1397 = vmatmul.bf16.gmra.mxu1 %v4504_v47  ;;  %v3599_v47 = vld [vmem:[%s5615_s5 + $0xb8] sm:$0xf0]  ;;  %v855_v12 = vmax.f32 %v789_v10, 0.0  ;;  %2481 = vmatpush.bf16.msra.mxu3 %v3758_v55 }
 0x18f   : > { %v1216_v0 = vadd.f32 %v1215_v63, %v1127_v62  ;;  %v3602_v18 = vor.u32 %v3915_v46, %v3599_v47 }
 0x191   : > { %2013 = vmatpush.bf16.msra.mxu1 %v3602_v18  ;;  %v1468_v21 = vmax.f32 %v1216_v0, 0.0 }
 0x192   : > { %v701_v11 = vpop.f32.mrf.mxu0 }
 0x193   : > { %v702_v15 = vadd.f32 %v701_v11, %v4344_v16  ;;  %v790_v38 = vpop.f32.mrf.mxu1 }
 0x194   : > { %v791_v19 = vadd.f32 %v790_v38, %v4346_v17  ;;  %v1128_v34 = vpop.f32.mrf.mxu2 }
 0x195   : > { %v856_v23 = vmax.f32 %v702_v15, 0.0  ;;  %v1129_v24 = vadd.f32 %v1128_v34, %v4560_v36  ;;  %v1217_v25 = vpop.f32.mrf.mxu3 }
 0x196   : > { %v857_v13 = vmax.f32 %v791_v19, 0.0 }
 0x197   : > { %v1218_v28 = vadd.f32 %v1217_v25, %v1129_v24  ;;  %v4723_v29 = vpack.c.bf16 %v856_v23, %v854_v35 }
 0x198   : > { %v4725_v39 = vpack.c.bf16 %v857_v13, %v855_v12 }
 0x199   : > { %v1470_v40 = vmax.f32 %v1218_v28, 0.0  ;;  %1170 = vmatmul.bf16.gmra.mxu2 %v4723_v29  ;;  %v3897_v28 = vld [vmem:[%s5615_s5 + $0x24] sm:$0xf] }
 0x19a   : > { %1259 = vmatmul.bf16.gmra.mxu3 %v4725_v39  ;;  %v704_v42 = vpop.f32.mrf.mxu0 }
 0x19b   : > { %v793_v44 = vpop.f32.mrf.mxu1  ;;  %v4735_v45 = vpack.c.bf16 %v1470_v40, %v1468_v21  ;;  %v705_v56 = vadd.f32 %v704_v42, %v4344_v16 }
 0x19c   : > { %v1131_v48 = vpop.f32.mrf.mxu2  ;;  %v794_v62 = vadd.f32 %v793_v44, %v4346_v17 }
 0x19d   : > { %v1132_v49 = vadd.f32 %v1131_v48, %v4560_v36  ;;  %v1220_v52 = vpop.f32.mrf.mxu3  ;;  %1313 = vmatmul.bf16.gmra.mxu0 %v4525_v7  ;;  %v858_v2 = vmax.f32 %v705_v56, 0.0 }
 0x19e   : > { %1402 = vmatmul.bf16.gmra.mxu1 %v4527_v8  ;;  %v859_v37 = vmax.f32 %v794_v62, 0.0 }
 0x19f   : > { %v1221_v53 = vadd.f32 %v1220_v52, %v1132_v49 }
 0x1a1   : > { %v1472_v18 = vmax.f32 %v1221_v53, 0.0 }
 0x1a2   : > { %v706_v63 = vpop.f32.mrf.mxu0 }
 0x1a3   : > { %v707_v7 = vadd.f32 %v706_v63, %v4344_v16  ;;  %v795_v0 = vpop.f32.mrf.mxu1  ;;  %v3685_v63 = vld [vmem:[%s5617_s7 + $0x60] sm:$0xf] }
 0x1a4   : > { %v796_v8 = vadd.f32 %v795_v0, %v4346_v17  ;;  %v1133_v1 = vpop.f32.mrf.mxu2  ;;  %v4758_v17 = vperm.slane %v4552_v31, 1  ;;  %v3527_v31 = vld [vmem:[%s5615_s5 + $0x28] sm:$0xf0] }
 0x1a5   : > { %v860_v3 = vmax.f32 %v707_v7, 0.0  ;;  %v1134_v10 = vadd.f32 %v1133_v1, %v4560_v36  ;;  %v1222_v11 = vpop.f32.mrf.mxu3  ;;  %v3530_v40 = vor.u32 %v3897_v28, %v3527_v31  ;;  %v3938_v7 = vld [vmem:[%s5617_s7 + $0x64] sm:$0xf0] }
 0x1a6   : > { %v861_v46 = vmax.f32 %v796_v8, 0.0  ;;  %v3686_v8 = vor.u32 %v3938_v7, %v3685_v63 }
 0x1a7   : > { %v1223_v47 = vadd.f32 %v1222_v11, %v1134_v10  ;;  %v4751_v15 = vpack.c.bf16 %v860_v3, %v858_v2  ;;  %1925 = vmatpush.bf16.msra.mxu0 %v3530_v40 }
 0x1a8   : > { %v4753_v38 = vpack.c.bf16 %v861_v46, %v859_v37  ;;  %2393 = vmatpush.bf16.msra.mxu2 %v3686_v8 }
 0x1a9   : > { %v1474_v19 = vmax.f32 %v1223_v47, 0.0  ;;  %1175 = vmatmul.bf16.gmra.mxu2 %v4751_v15  ;;  %v3749_v47 = vld [vmem:[%s5617_s7 + $0xe0] sm:$0xf] }
 0x1aa   : > { %1264 = vmatmul.bf16.gmra.mxu3 %v4753_v38  ;;  %v1279_v16 = vpop.f32.mrf.mxu0 }
 0x1ab   : > { %v1368_v34 = vpop.f32.mrf.mxu1  ;;  %v4760_v35 = vpack.c.bf16 %v1474_v19, %v1472_v18  ;;  %v1280_v12 = vadd.f32 %v1279_v16, %v4758_v17  ;;  %v3954_v18 = vld [vmem:[%s5617_s7 + $0xe4] sm:$0xf0] }
 0x1ac   : > { %v1136_v23 = vpop.f32.mrf.mxu2  ;;  %v3750_v19 = vor.u32 %v3954_v18, %v3749_v47 }
 0x1ad   : > { %v1137_v24 = vadd.f32 %v1136_v23, %v4560_v36  ;;  %v1225_v25 = vpop.f32.mrf.mxu3  ;;  %1318 = vmatmul.bf16.gmra.mxu0 %v4554_v32  ;;  %v3591_v32 = vld [vmem:[%s5615_s5 + $0xa8] sm:$0xf0] }
 0x1ae   : > { %1407 = vmatmul.bf16.gmra.mxu1 %v4556_v33  ;;  %v1369_v33 = vadd.f32 %v1368_v34, %v1280_v12  ;;  %v3594_v43 = vor.u32 %v3913_v22, %v3591_v32  ;;  %2482 = vmatpush.bf16.msra.mxu3 %v3750_v19  ;;  %v3677_v19 = vld [vmem:[%s5617_s7 + $0x50] sm:$0xf] }
 0x1af   : > { %v1226_v13 = vadd.f32 %v1225_v25, %v1137_v24 }
 0x1b0   : > { %2014 = vmatpush.bf16.msra.mxu1 %v3594_v43  ;;  %v1449_v53 = vmax.f32 %v1369_v33, 0.0 }
 0x1b1   : > { %v1476_v55 = vmax.f32 %v1226_v13, 0.0 }
 0x1b2   : > { %v1281_v21 = vpop.f32.mrf.mxu0 }
 0x1b3   : > { %v1282_v41 = vadd.f32 %v1281_v21, %v4758_v17  ;;  %v1370_v42 = vpop.f32.mrf.mxu1 }
 0x1b4   : > { %v1138_v44 = vpop.f32.mrf.mxu2 }
 0x1b5   : > { %v1371_v48 = vadd.f32 %v1370_v42, %v1282_v41  ;;  %v1139_v49 = vadd.f32 %v1138_v44, %v4560_v36  ;;  %v1227_v52 = vpop.f32.mrf.mxu3 }
 0x1b7   : > { %v1451_v54 = vmax.f32 %v1371_v48, 0.0  ;;  %v1228_v57 = vadd.f32 %v1227_v52, %v1139_v49  ;;  %v3895_v52 = vld [vmem:[%s5615_s5 + $0x14] sm:$0xf] }
 0x1b9   : > { %v4780_v56 = vpack.c.bf16 %v1451_v54, %v1449_v53  ;;  %v1478_v62 = vmax.f32 %v1228_v57, 0.0  ;;  %1750 = vmatmul.bf16.vlgmr.msrb.gmra.mxu2 %v4589_v14  ;;  %v3519_v53 = vld [vmem:[%s5615_s5 + $0x18] sm:$0xf0] }
 0x1ba   : > { %v1284_v0 = vpop.f32.mrf.mxu0  ;;  %v3522_v57 = vor.u32 %v3895_v52, %v3519_v53 }
 0x1bb   : > { %v1373_v1 = vpop.f32.mrf.mxu1  ;;  %1839 = vmatmul.bf16.vlgmr.msrb.gmra.mxu3 %v4780_v56  ;;  %v4790_v2 = vpack.c.bf16 %v1478_v62, %v1476_v55  ;;  %v1285_v37 = vadd.f32 %v1284_v0, %v4758_v17  ;;  %v3911_v55 = vld [vmem:[%s5615_s5 + $0x94] sm:$0xf] }
 0x1bc   : > { %v1141_v3 = vpop.f32.mrf.mxu2  ;;  %1926 = vmatpush.bf16.msra.mxu0 %v3522_v57 }
 0x1bd   : > { %v1142_v10 = vadd.f32 %v1141_v3, %v4560_v36  ;;  %v1230_v11 = vpop.f32.mrf.mxu3  ;;  %1323 = vmatmul.bf16.gmra.mxu0 %v4583_v5  ;;  %v1374_v34 = vadd.f32 %v1373_v1, %v1285_v37 }
 0x1be   : > { %1412 = vmatmul.bf16.gmra.mxu1 %v4585_v6 }
 0x1bf   : > { %v1231_v46 = vadd.f32 %v1230_v11, %v1142_v10  ;;  %v1453_v13 = vmax.f32 %v1374_v34, 0.0 }
 0x1c1   : > { %v1480_v21 = vmax.f32 %v1231_v46, 0.0 }
 0x1c2   : > { %v1286_v16 = vpop.f32.mrf.mxu0 }
 0x1c3   : > { %v1287_v23 = vadd.f32 %v1286_v16, %v4758_v17  ;;  %v1375_v5 = vpop.f32.mrf.mxu1  ;;  %v3936_v16 = vld [vmem:[%s5617_s7 + $0x54] sm:$0xf0] }
 0x1c4   : > { %v1143_v24 = vpop.f32.mrf.mxu2 }
 0x1c5   : > { %v1376_v6 = vadd.f32 %v1375_v5, %v1287_v23  ;;  %v1144_v25 = vadd.f32 %v1143_v24, %v4560_v36  ;;  %v1232_v12 = vpop.f32.mrf.mxu3  ;;  %v3678_v23 = vor.u32 %v3936_v16, %v3677_v19 }
 0x1c7   : > { %v1455_v28 = vmax.f32 %v1376_v6, 0.0  ;;  %v1233_v31 = vadd.f32 %v1232_v12, %v1144_v25  ;;  %2394 = vmatpush.bf16.msra.mxu2 %v3678_v23 }
 0x1c9   : > { %v1482_v40 = vmax.f32 %v1233_v31, 0.0  ;;  %1755 = vmatmul.bf16.gmra.mxu2 %v4623_v59  ;;  %v4805_v22 = vpack.c.bf16 %v1455_v28, %v1453_v13  ;;  %v3741_v31 = vld [vmem:[%s5617_s7 + $0xd0] sm:$0xf] }
 0x1ca   : > { %v1289_v32 = vpop.f32.mrf.mxu0 }
 0x1cb   : > { %v1378_v33 = vpop.f32.mrf.mxu1  ;;  %1844 = vmatmul.bf16.gmra.mxu3 %v4805_v22  ;;  %v4808_v41 = vpack.c.bf16 %v1482_v40, %v1480_v21  ;;  %v1290_v48 = vadd.f32 %v1289_v32, %v4758_v17  ;;  %v3952_v21 = vld [vmem:[%s5617_s7 + $0xd4] sm:$0xf0] }
 0x1cc   : > { %v1146_v42 = vpop.f32.mrf.mxu2  ;;  %v3742_v40 = vor.u32 %v3952_v21, %v3741_v31 }
 0x1cd   : > { %v1147_v43 = vadd.f32 %v1146_v42, %v4560_v36  ;;  %v1235_v44 = vpop.f32.mrf.mxu3  ;;  %1328 = vmatmul.bf16.gmra.mxu0 %v4611_v50  ;;  %v3583_v50 = vld [vmem:[%s5615_s5 + $0x98] sm:$0xf0] }
 0x1ce   : > { %1417 = vmatmul.bf16.gmra.mxu1 %v4613_v51  ;;  %v1379_v51 = vadd.f32 %v1378_v33, %v1290_v48  ;;  %v3586_v7 = vor.u32 %v3911_v55, %v3583_v50  ;;  %2483 = vmatpush.bf16.msra.mxu3 %v3742_v40  ;;  %v3669_v40 = vld [vmem:[%s5617_s7 + $0x40] sm:$0xf] }
 0x1cf   : > { %v1236_v49 = vadd.f32 %v1235_v44, %v1147_v43 }
 0x1d0   : > { %2015 = vmatpush.bf16.msra.mxu1 %v3586_v7  ;;  %v1457_v10 = vmax.f32 %v1379_v51, 0.0 }
 0x1d1   : > { %v1484_v46 = vmax.f32 %v1236_v49, 0.0 }
 0x1d2   : > { %v1291_v54 = vpop.f32.mrf.mxu0 }
 0x1d3   : > { %v1292_v62 = vadd.f32 %v1291_v54, %v4758_v17  ;;  %v1380_v63 = vpop.f32.mrf.mxu1 }
 0x1d4   : > { %v1148_v0 = vpop.f32.mrf.mxu2 }
 0x1d5   : > { %v1381_v8 = vadd.f32 %v1380_v63, %v1292_v62  ;;  %v1149_v1 = vadd.f32 %v1148_v0, %v4560_v36  ;;  %v1237_v3 = vpop.f32.mrf.mxu3 }
 0x1d7   : > { %v1459_v11 = vmax.f32 %v1381_v8, 0.0  ;;  %v1238_v37 = vadd.f32 %v1237_v3, %v1149_v1  ;;  %v3893_v3 = vld [vmem:[%s5615_s5 + $0x4] sm:$0xf] }
 0x1d9   : > { %v1486_v47 = vmax.f32 %v1238_v37, 0.0  ;;  %1760 = vmatmul.bf16.gmra.mxu2 %v4645_v30  ;;  %v4829_v18 = vpack.c.bf16 %v1459_v11, %v1457_v10  ;;  %v3511_v10 = vld [vmem:[%s5615_s5 + $0x8] sm:$0xf0] }
 0x1da   : > { %v1294_v34 = vpop.f32.mrf.mxu0  ;;  %v3514_v37 = vor.u32 %v3893_v3, %v3511_v10 }
 0x1db   : > { %v1383_v5 = vpop.f32.mrf.mxu1  ;;  %1849 = vmatmul.bf16.gmra.mxu3 %v4829_v18  ;;  %v4838_v24 = vpack.c.bf16 %v1486_v47, %v1484_v46  ;;  %v1295_v13 = vadd.f32 %v1294_v34, %v4758_v17  ;;  %v3909_v46 = vld [vmem:[%s5615_s5 + $0x84] sm:$0xf] }
 0x1dc   : > { %v1151_v6 = vpop.f32.mrf.mxu2  ;;  %1927 = vmatpush.bf16.msra.mxu0 %v3514_v37 }
 0x1dd   : > { %v1152_v25 = vadd.f32 %v1151_v6, %v4560_v36  ;;  %v1240_v12 = vpop.f32.mrf.mxu3  ;;  %1333 = vmatmul.bf16.gmra.mxu0 %v4639_v26  ;;  %v1384_v33 = vadd.f32 %v1383_v5, %v1295_v13 }
 0x1de   : > { %1422 = vmatmul.bf16.gmra.mxu1 %v4641_v27 }
 0x1df   : > { %v1241_v28 = vadd.f32 %v1240_v12, %v1152_v25  ;;  %v1461_v49 = vmax.f32 %v1384_v33, 0.0 }
 0x1e1   : > { %v1488_v54 = vmax.f32 %v1241_v28, 0.0 }
 0x1e2   : > { %v1296_v32 = vpop.f32.mrf.mxu0 }
 0x1e3   : > { %v1297_v42 = vadd.f32 %v1296_v32, %v4758_v17  ;;  %v1385_v26 = vpop.f32.mrf.mxu1  ;;  %v3934_v32 = vld [vmem:[%s5617_s7 + $0x44] sm:$0xf0] }
 0x1e4   : > { %v1153_v43 = vpop.f32.mrf.mxu2 }
 0x1e5   : > { %v1386_v27 = vadd.f32 %v1385_v26, %v1297_v42  ;;  %v1154_v44 = vadd.f32 %v1153_v43, %v4560_v36  ;;  %v1242_v48 = vpop.f32.mrf.mxu3  ;;  %v3670_v42 = vor.u32 %v3934_v32, %v3669_v40 }
 0x1e7   : > { %v1463_v52 = vmax.f32 %v1386_v27, 0.0  ;;  %v1243_v53 = vadd.f32 %v1242_v48, %v1154_v44  ;;  %2395 = vmatpush.bf16.msra.mxu2 %v3670_v42 }
 0x1e9   : > { %v1490_v57 = vmax.f32 %v1243_v53, 0.0  ;;  %1765 = vmatmul.bf16.gmra.mxu2 %v4679_v20  ;;  %v4853_v55 = vpack.c.bf16 %v1463_v52, %v1461_v49  ;;  %v3733_v53 = vld [vmem:[%s5617_s7 + $0xc0] sm:$0xf] }
 0x1ea   : > { %v1299_v50 = vpop.f32.mrf.mxu0 }
 0x1eb   : > { %v1388_v51 = vpop.f32.mrf.mxu1  ;;  %1854 = vmatmul.bf16.gmra.mxu3 %v4853_v55  ;;  %v4856_v62 = vpack.c.bf16 %v1490_v57, %v1488_v54  ;;  %v1300_v8 = vadd.f32 %v1299_v50, %v4758_v17  ;;  %v3950_v54 = vld [vmem:[%s5617_s7 + $0xc4] sm:$0xf0] }
 0x1ec   : > { %v1156_v63 = vpop.f32.mrf.mxu2  ;;  %v3734_v57 = vor.u32 %v3950_v54, %v3733_v53 }
 0x1ed   : > { %v1157_v7 = vadd.f32 %v1156_v63, %v4560_v36  ;;  %v1245_v0 = vpop.f32.mrf.mxu3  ;;  %1338 = vmatmul.bf16.gmra.mxu0 %v4667_v4  ;;  %v3575_v4 = vld [vmem:[%s5615_s5 + $0x88] sm:$0xf0] }
 0x1ee   : > { %1427 = vmatmul.bf16.gmra.mxu1 %v4669_v9  ;;  %v1389_v9 = vadd.f32 %v1388_v51, %v1300_v8  ;;  %v3578_v16 = vor.u32 %v3909_v46, %v3575_v4  ;;  %2484 = vmatpush.bf16.msra.mxu3 %v3734_v57  ;;  %v3661_v57 = vld [vmem:[%s5617_s7 + $0x30] sm:$0xf] }
 0x1ef   : > { %v1246_v1 = vadd.f32 %v1245_v0, %v1157_v7 }
 0x1f0   : > { %2016 = vmatpush.bf16.msra.mxu1 %v3578_v16  ;;  %v1465_v25 = vmax.f32 %v1389_v9, 0.0 }
 0x1f1   : > { %v1492_v28 = vmax.f32 %v1246_v1, 0.0 }
 0x1f2   : > { %v1301_v11 = vpop.f32.mrf.mxu0 }
 0x1f3   : > { %v1302_v47 = vadd.f32 %v1301_v11, %v4758_v17  ;;  %v1390_v19 = vpop.f32.mrf.mxu1 }
 0x1f4   : > { %v1158_v34 = vpop.f32.mrf.mxu2 }
 0x1f5   : > { %v1391_v23 = vadd.f32 %v1390_v19, %v1302_v47  ;;  %v1159_v5 = vadd.f32 %v1158_v34, %v4560_v36  ;;  %v1247_v6 = vpop.f32.mrf.mxu3 }
 0x1f7   : > { %v1467_v12 = vmax.f32 %v1391_v23, 0.0  ;;  %v1248_v13 = vadd.f32 %v1247_v6, %v1159_v5  ;;  %v3939_v6 = vld [vmem:[%s5617_s7 + $0x74] sm:$0xf] }
 0x1f9   : > { %v1494_v31 = vmax.f32 %v1248_v13, 0.0  ;;  %1770 = vmatmul.bf16.gmra.mxu2 %v4701_v58  ;;  %v4877_v21 = vpack.c.bf16 %v1467_v12, %v1465_v25  ;;  %v3695_v25 = vld [vmem:[%s5617_s7 + $0x78] sm:$0xf0] }
 0x1fa   : > { %v1304_v33 = vpop.f32.mrf.mxu0  ;;  %v3698_v13 = vor.u32 %v3939_v6, %v3695_v25 }
 0x1fb   : > { %v1393_v26 = vpop.f32.mrf.mxu1  ;;  %1859 = vmatmul.bf16.gmra.mxu3 %v4877_v21  ;;  %v4886_v43 = vpack.c.bf16 %v1494_v31, %v1492_v28  ;;  %v1305_v49 = vadd.f32 %v1304_v33, %v4758_v17  ;;  %v3955_v28 = vld [vmem:[%s5617_s7 + $0xf4] sm:$0xf] }
 0x1fc   : > { %v1161_v27 = vpop.f32.mrf.mxu2  ;;  %2570 = vmatpush.bf16.msrb.mxu0 %v3698_v13 }
 0x1fd   : > { %v1162_v44 = vadd.f32 %v1161_v27, %v4560_v36  ;;  %v1250_v48 = vpop.f32.mrf.mxu3  ;;  %1343 = vmatmul.bf16.gmra.mxu0 %v4695_v60  ;;  %v1394_v51 = vadd.f32 %v1393_v26, %v1305_v49 }
 0x1fe   : > { %1432 = vmatmul.bf16.gmra.mxu1 %v4697_v61 }
 0x1ff   : > { %v1251_v52 = vadd.f32 %v1250_v48, %v1162_v44  ;;  %v1469_v1 = vmax.f32 %v1394_v51, 0.0 }
 0x201   : > { %v1496_v11 = vmax.f32 %v1251_v52, 0.0 }
 0x202   : > { %v1306_v50 = vpop.f32.mrf.mxu0 }
 0x203   : > { %v1307_v63 = vadd.f32 %v1306_v50, %v4758_v17  ;;  %v1395_v60 = vpop.f32.mrf.mxu1  ;;  %v3932_v50 = vld [vmem:[%s5617_s7 + $0x34] sm:$0xf0] }
 0x204   : > { %v1163_v7 = vpop.f32.mrf.mxu2 }
 0x205   : > { %v1396_v61 = vadd.f32 %v1395_v60, %v1307_v63  ;;  %v1164_v0 = vadd.f32 %v1163_v7, %v4560_v36  ;;  %v1252_v8 = vpop.f32.mrf.mxu3  ;;  %v3662_v63 = vor.u32 %v3932_v50, %v3661_v57 }
 0x207   : > { %v1471_v3 = vmax.f32 %v1396_v61, 0.0  ;;  %v1253_v10 = vadd.f32 %v1252_v8, %v1164_v0  ;;  %2396 = vmatpush.bf16.msra.mxu2 %v3662_v63 }
 0x209   : > { %v1498_v37 = vmax.f32 %v1253_v10, 0.0  ;;  %1775 = vmatmul.bf16.gmra.mxu2 %v4735_v45  ;;  %v4901_v46 = vpack.c.bf16 %v1471_v3, %v1469_v1  ;;  %v3725_v10 = vld [vmem:[%s5617_s7 + $0xb0] sm:$0xf] }
 0x20a   : > { %v1309_v4 = vpop.f32.mrf.mxu0 }
 0x20b   : > { %v1398_v9 = vpop.f32.mrf.mxu1  ;;  %1864 = vmatmul.bf16.gmra.mxu3 %v4901_v46  ;;  %v4904_v47 = vpack.c.bf16 %v1498_v37, %v1496_v11  ;;  %v1310_v23 = vadd.f32 %v1309_v4, %v4758_v17  ;;  %v3948_v11 = vld [vmem:[%s5617_s7 + $0xb4] sm:$0xf0] }
 0x20c   : > { %v1166_v19 = vpop.f32.mrf.mxu2  ;;  %v3726_v37 = vor.u32 %v3948_v11, %v3725_v10 }
 0x20d   : > { %v1167_v16 = vadd.f32 %v1166_v19, %v4560_v36  ;;  %v1255_v34 = vpop.f32.mrf.mxu3  ;;  %1348 = vmatmul.bf16.gmra.mxu0 %v4723_v29  ;;  %v3759_v29 = vld [vmem:[%s5617_s7 + $0xf8] sm:$0xf0] }
 0x20e   : > { %1437 = vmatmul.bf16.gmra.mxu1 %v4725_v39  ;;  %v1399_v39 = vadd.f32 %v1398_v9, %v1310_v23  ;;  %v3762_v32 = vor.u32 %v3955_v28, %v3759_v29  ;;  %2485 = vmatpush.bf16.msra.mxu3 %v3726_v37 }
 0x20f   : > { %v1256_v5 = vadd.f32 %v1255_v34, %v1167_v16 }
 0x210   : > { %2659 = vmatpush.bf16.msrb.mxu1 %v3762_v32  ;;  %v1473_v44 = vmax.f32 %v1399_v39, 0.0 }
 0x211   : > { %v1500_v52 = vmax.f32 %v1256_v5, 0.0 }
 0x212   : > { %v1311_v12 = vpop.f32.mrf.mxu0 }
 0x213   : > { %v1312_v31 = vadd.f32 %v1311_v12, %v4758_v17  ;;  %v1400_v40 = vpop.f32.mrf.mxu1 }
 0x214   : > { %v1168_v33 = vpop.f32.mrf.mxu2 }
 0x215   : > { %v1401_v42 = vadd.f32 %v1400_v40, %v1312_v31  ;;  %v1169_v26 = vadd.f32 %v1168_v33, %v4560_v36  ;;  %v1257_v27 = vpop.f32.mrf.mxu3 }
 0x217   : > { %v1475_v48 = vmax.f32 %v1401_v42, 0.0  ;;  %v1258_v49 = vadd.f32 %v1257_v27, %v1169_v26  ;;  %v3937_v27 = vld [vmem:[%s5617_s7 + $0x64] sm:$0xf] }
 0x219   : > { %v1502_v53 = vmax.f32 %v1258_v49, 0.0  ;;  %1780 = vmatmul.bf16.gmra.mxu2 %v4760_v35  ;;  %v4925_v54 = vpack.c.bf16 %v1475_v48, %v1473_v44  ;;  %v3687_v44 = vld [vmem:[%s5617_s7 + $0x68] sm:$0xf0]  ;;  %v3953_v49 = vld [vmem:[%s5617_s7 + $0xe4] sm:$0xf] }
 0x21a   : > { %v1314_v51 = vpop.f32.mrf.mxu0  ;;  %v3690_v48 = vor.u32 %v3937_v27, %v3687_v44 }
 0x21b   : > { %v1403_v60 = vpop.f32.mrf.mxu1  ;;  %1869 = vmatmul.bf16.gmra.mxu3 %v4925_v54  ;;  %v4934_v7 = vpack.c.bf16 %v1502_v53, %v1500_v52  ;;  %v1315_v1 = vadd.f32 %v1314_v51, %v4758_v17 }
 0x21c   : > { %v1171_v61 = vpop.f32.mrf.mxu2  ;;  %2571 = vmatpush.bf16.msrb.mxu0 %v3690_v48 }
 0x21d   : > { %v1172_v0 = vadd.f32 %v1171_v61, %v4560_v36  ;;  %v1260_v8 = vpop.f32.mrf.mxu3  ;;  %1353 = vmatmul.bf16.gmra.mxu0 %v4751_v15  ;;  %v1404_v9 = vadd.f32 %v1403_v60, %v1315_v1  ;;  %v4975_v61 = vld [vmem:[%s5616_s6] sm:$0x3] }
 0x21e   : > { %1442 = vmatmul.bf16.gmra.mxu1 %v4753_v38  ;;  %v4978_v10 = vperm.slane %v4975_v61, 0 }
 0x21f   : > { %v1261_v3 = vadd.f32 %v1260_v8, %v1172_v0  ;;  %v1477_v5 = vmax.f32 %v1404_v9, 0.0  ;;  %v3930_v9 = vld [vmem:[%s5617_s7 + $0x24] sm:$0xf0] }
 0x221   : > { %v1504_v12 = vmax.f32 %v1261_v3, 0.0 }
 0x222   : > { %v1316_v4 = vpop.f32.mrf.mxu0 }
 0x223   : > { %v1317_v19 = vadd.f32 %v1316_v4, %v4758_v17  ;;  %v1405_v15 = vpop.f32.mrf.mxu1 }
 0x224   : > { %v1173_v16 = vpop.f32.mrf.mxu2 }
 0x225   : > { %v1406_v38 = vadd.f32 %v1405_v15, %v1317_v19  ;;  %v1174_v34 = vadd.f32 %v1173_v16, %v4560_v36  ;;  %v1262_v23 = vpop.f32.mrf.mxu3 }
 0x227   : > { %v1479_v6 = vmax.f32 %v1406_v38, 0.0  ;;  %v1263_v25 = vadd.f32 %v1262_v23, %v1174_v34 }
 0x229   : > { %v1506_v13 = vmax.f32 %v1263_v25, 0.0  ;;  %1785 = vmatmul.bf16.gmra.mxu2 %v4790_v2  ;;  %v4949_v28 = vpack.c.bf16 %v1479_v6, %v1477_v5 }
 0x22a   : > { %v1319_v29 = vpop.f32.mrf.mxu0 }
 0x22b   : > { %v1408_v39 = vpop.f32.mrf.mxu1  ;;  %1874 = vmatmul.bf16.gmra.mxu3 %v4949_v28  ;;  %v4952_v31 = vpack.c.bf16 %v1506_v13, %v1504_v12  ;;  %v1320_v42 = vadd.f32 %v1319_v29, %v4758_v17  ;;  %v3717_v12 = vld [vmem:[%s5617_s7 + $0xa0] sm:$0xf]  ;;  %v3946_v13 = vld [vmem:[%s5617_s7 + $0xa4] sm:$0xf0] }
 0x22c   : > { %v1176_v40 = vpop.f32.mrf.mxu2  ;;  %v3718_v29 = vor.u32 %v3946_v13, %v3717_v12 }
 0x22d   : > { %v1177_v32 = vadd.f32 %v1176_v40, %v4560_v36  ;;  %v1265_v33 = vpop.f32.mrf.mxu3  ;;  %1928 = vmatmul.bf16.vlgmr.msra.gmra.mxu0 %v4589_v14  ;;  %v3751_v14 = vld [vmem:[%s5617_s7 + $0xe8] sm:$0xf0]  ;;  %v1409_v53 = vadd.f32 %v1408_v39, %v1320_v42 }
 0x22e   : > { %2017 = vmatmul.bf16.vlgmr.msra.gmra.mxu1 %v4780_v56  ;;  %v3754_v52 = vor.u32 %v3953_v49, %v3751_v14  ;;  %2486 = vmatpush.bf16.msra.mxu3 %v3718_v29 }
 0x22f   : > { %v1266_v26 = vadd.f32 %v1265_v33, %v1177_v32  ;;  %v1481_v8 = vmax.f32 %v1409_v53, 0.0 }
 0x230   : > { %2660 = vmatpush.bf16.msrb.mxu1 %v3754_v52 }
 0x231   : > { %v1508_v11 = vmax.f32 %v1266_v26, 0.0 }
 0x232   : > { %v1321_v56 = vpop.f32.mrf.mxu0 }
 0x233   : > { %v1322_v57 = vadd.f32 %v1321_v56, %v4758_v17  ;;  %v1410_v50 = vpop.f32.mrf.mxu1 }
 0x234   : > { %v1178_v51 = vpop.f32.mrf.mxu2 }
 0x235   : > { %v1411_v63 = vadd.f32 %v1410_v50, %v1322_v57  ;;  %v1179_v60 = vadd.f32 %v1178_v51, %v4560_v36  ;;  %v1267_v0 = vpop.f32.mrf.mxu3  ;;  %v3653_v36 = vld [vmem:[%s5617_s7 + $0x20] sm:$0xf] }
 0x236   : > { %v3654_v15 = vor.u32 %v3930_v9, %v3653_v36 }
 0x237   : > { %v1483_v1 = vmax.f32 %v1411_v63, 0.0  ;;  %v1268_v3 = vadd.f32 %v1267_v0, %v1179_v60 }
 0x238   : > { %2397 = vmatpush.bf16.msra.mxu2 %v3654_v15 }
 0x239   : > { %v1510_v37 = vmax.f32 %v1268_v3, 0.0  ;;  %1790 = vmatmul.bf16.gmra.mxu2 %v4808_v41  ;;  %v4981_v4 = vpack.c.bf16 %v1483_v1, %v1481_v8  ;;  %v3935_v8 = vld [vmem:[%s5617_s7 + $0x54] sm:$0xf]  ;;  %v3679_v1 = vld [vmem:[%s5617_s7 + $0x58] sm:$0xf0] }
 0x23a   : > { %v1324_v19 = vpop.f32.mrf.mxu0  ;;  %v3682_v3 = vor.u32 %v3935_v8, %v3679_v1 }
 0x23b   : > { %v1413_v16 = vpop.f32.mrf.mxu1  ;;  %1879 = vmatmul.bf16.gmra.mxu3 %v4981_v4  ;;  %v4990_v38 = vpack.c.bf16 %v1510_v37, %v1508_v11  ;;  %v1325_v6 = vadd.f32 %v1324_v19, %v4758_v17  ;;  %v3951_v11 = vld [vmem:[%s5617_s7 + $0xd4] sm:$0xf] }
 0x23c   : > { %v1751_v34 = vpop.f32.mrf.mxu2  ;;  %2572 = vmatpush.bf16.msrb.mxu0 %v3682_v3 }
 0x23d   : > { %v1752_v23 = vadd.f32 %v1751_v34, %v4978_v10  ;;  %1933 = vmatmul.bf16.gmra.mxu0 %v4623_v59  ;;  %v1414_v40 = vadd.f32 %v1413_v16, %v1325_v6 }
 0x23e   : > { %2022 = vmatmul.bf16.gmra.mxu1 %v4805_v22  ;;  %v1840_v5 = vpop.f32.mrf.mxu3 }
 0x23f   : > { %v1841_v25 = vadd.f32 %v1840_v5, %v1752_v23  ;;  %v1485_v27 = vmax.f32 %v1414_v40, 0.0  ;;  %v3928_v40 = vld [vmem:[%s5617_s7 + $0x14] sm:$0xf0] }
 0x241   : > { %v2098_v49 = vmax.f32 %v1841_v25, 0.0 }
 0x242   : > { %v1326_v39 = vpop.f32.mrf.mxu0 }
 0x243   : > { %v1327_v59 = vadd.f32 %v1326_v39, %v4758_v17  ;;  %v1415_v32 = vpop.f32.mrf.mxu1  ;;  %v3645_v39 = vld [vmem:[%s5617_s7 + $0x10] sm:$0xf] }
 0x244   : > { %v1753_v22 = vpop.f32.mrf.mxu2 }
 0x245   : > { %v1416_v33 = vadd.f32 %v1415_v32, %v1327_v59  ;;  %v1754_v42 = vadd.f32 %v1753_v22, %v4978_v10  ;;  %v3646_v32 = vor.u32 %v3928_v40, %v3645_v39 }
 0x246   : > { %v1842_v26 = vpop.f32.mrf.mxu3 }
 0x247   : > { %v1487_v44 = vmax.f32 %v1416_v33, 0.0  ;;  %v1843_v48 = vadd.f32 %v1842_v26, %v1754_v42  ;;  %2398 = vmatpush.bf16.msra.mxu2 %v3646_v32 }
 0x249   : > { %v2100_v14 = vmax.f32 %v1843_v48, 0.0  ;;  %1795 = vmatmul.bf16.gmra.mxu2 %v4838_v24  ;;  %v5005_v56 = vpack.c.bf16 %v1487_v44, %v1485_v27 }
 0x24a   : > { %v1329_v52 = vpop.f32.mrf.mxu0 }
 0x24b   : > { %v5007_v53 = vpack.c.bf16 %v2100_v14, %v2098_v49  ;;  %v1418_v57 = vpop.f32.mrf.mxu1  ;;  %1884 = vmatmul.bf16.gmra.mxu3 %v5005_v56  ;;  %v1330_v60 = vadd.f32 %v1329_v52, %v4758_v17  ;;  %v3709_v49 = vld [vmem:[%s5617_s7 + $0x90] sm:$0xf]  ;;  %v3944_v14 = vld [vmem:[%s5617_s7 + $0x94] sm:$0xf0] }
 0x24c   : > { %v1756_v50 = vpop.f32.mrf.mxu2  ;;  %v3710_v52 = vor.u32 %v3944_v14, %v3709_v49 }
 0x24d   : > { %v1757_v51 = vadd.f32 %v1756_v50, %v4978_v10  ;;  %1938 = vmatmul.bf16.gmra.mxu0 %v4645_v30  ;;  %v3743_v30 = vld [vmem:[%s5617_s7 + $0xd8] sm:$0xf0]  ;;  %v1419_v36 = vadd.f32 %v1418_v57, %v1330_v60 }
 0x24e   : > { %2027 = vmatmul.bf16.gmra.mxu1 %v4829_v18  ;;  %v1845_v63 = vpop.f32.mrf.mxu3  ;;  %v3746_v37 = vor.u32 %v3951_v11, %v3743_v30  ;;  %2487 = vmatpush.bf16.msra.mxu3 %v3710_v52 }
 0x24f   : > { %v1846_v0 = vadd.f32 %v1845_v63, %v1757_v51  ;;  %v1489_v5 = vmax.f32 %v1419_v36, 0.0 }
 0x250   : > { %2661 = vmatpush.bf16.msrb.mxu1 %v3746_v37 }
 0x251   : > { %v2102_v12 = vmax.f32 %v1846_v0, 0.0 }
 0x252   : > { %v1331_v18 = vpop.f32.mrf.mxu0 }
 0x253   : > { %v1332_v9 = vadd.f32 %v1331_v18, %v4758_v17  ;;  %v1420_v19 = vpop.f32.mrf.mxu1 }
 0x254   : > { %v1758_v15 = vpop.f32.mrf.mxu2 }
 0x255   : > { %v1421_v16 = vadd.f32 %v1420_v19, %v1332_v9  ;;  %v1759_v34 = vadd.f32 %v1758_v15, %v4978_v10 }
 0x256   : > { %v1847_v23 = vpop.f32.mrf.mxu3 }
 0x257   : > { %v1491_v6 = vmax.f32 %v1421_v16, 0.0  ;;  %v1848_v25 = vadd.f32 %v1847_v23, %v1759_v34 }
 0x259   : > { %v2104_v13 = vmax.f32 %v1848_v25, 0.0  ;;  %1800 = vmatmul.bf16.gmra.mxu2 %v4856_v62  ;;  %v5029_v29 = vpack.c.bf16 %v1491_v6, %v1489_v5  ;;  %v3933_v5 = vld [vmem:[%s5617_s7 + $0x44] sm:$0xf]  ;;  %v3671_v6 = vld [vmem:[%s5617_s7 + $0x48] sm:$0xf0] }
 0x25a   : > { %v1334_v59 = vpop.f32.mrf.mxu0  ;;  %v3674_v25 = vor.u32 %v3933_v5, %v3671_v6 }
 0x25b   : > { %v1423_v22 = vpop.f32.mrf.mxu1  ;;  %1889 = vmatmul.bf16.gmra.mxu3 %v5029_v29  ;;  %v5038_v33 = vpack.c.bf16 %v2104_v13, %v2102_v12  ;;  %v1335_v44 = vadd.f32 %v1334_v59, %v4758_v17  ;;  %v3949_v12 = vld [vmem:[%s5617_s7 + $0xc4] sm:$0xf] }
 0x25c   : > { %v1761_v42 = vpop.f32.mrf.mxu2  ;;  %2573 = vmatpush.bf16.msrb.mxu0 %v3674_v25 }
 0x25d   : > { %v1762_v26 = vadd.f32 %v1761_v42, %v4978_v10  ;;  %1943 = vmatmul.bf16.gmra.mxu0 %v4679_v20  ;;  %v1424_v50 = vadd.f32 %v1423_v22, %v1335_v44 }
 0x25e   : > { %2032 = vmatmul.bf16.gmra.mxu1 %v4853_v55  ;;  %v1850_v27 = vpop.f32.mrf.mxu3 }
 0x25f   : > { %v1851_v48 = vadd.f32 %v1850_v27, %v1762_v26  ;;  %v1493_v8 = vmax.f32 %v1424_v50, 0.0  ;;  %v3926_v50 = vld [vmem:[%s5617_s7 + $0x4] sm:$0xf0] }
 0x261   : > { %v2106_v11 = vmax.f32 %v1851_v48, 0.0 }
 0x262   : > { %v1336_v57 = vpop.f32.mrf.mxu0 }
 0x263   : > { %v1337_v20 = vadd.f32 %v1336_v57, %v4758_v17  ;;  %v1425_v51 = vpop.f32.mrf.mxu1  ;;  %v3637_v57 = vld [vmem:[%s5617_s7] sm:$0xf] }
 0x264   : > { %v1763_v55 = vpop.f32.mrf.mxu2 }
 0x265   : > { %v1426_v63 = vadd.f32 %v1425_v51, %v1337_v20  ;;  %v1764_v60 = vadd.f32 %v1763_v55, %v4978_v10  ;;  %v3638_v51 = vor.u32 %v3926_v50, %v3637_v57 }
 0x266   : > { %v1852_v0 = vpop.f32.mrf.mxu3 }
 0x267   : > { %v1495_v1 = vmax.f32 %v1426_v63, 0.0  ;;  %v1853_v3 = vadd.f32 %v1852_v0, %v1764_v60  ;;  %2399 = vmatpush.bf16.msra.mxu2 %v3638_v51 }
 0x269   : > { %v2108_v30 = vmax.f32 %v1853_v3, 0.0  ;;  %1805 = vmatmul.bf16.gmra.mxu2 %v4886_v43  ;;  %v5053_v18 = vpack.c.bf16 %v1495_v1, %v1493_v8 }
 0x26a   : > { %v1339_v37 = vpop.f32.mrf.mxu0 }
 0x26b   : > { %v1428_v36 = vpop.f32.mrf.mxu1  ;;  %1894 = vmatmul.bf16.gmra.mxu3 %v5053_v18  ;;  %v5056_v9 = vpack.c.bf16 %v2108_v30, %v2106_v11  ;;  %v1340_v34 = vadd.f32 %v1339_v37, %v4758_v17  ;;  %v3701_v11 = vld [vmem:[%s5617_s7 + $0x80] sm:$0xf]  ;;  %v3942_v30 = vld [vmem:[%s5617_s7 + $0x84] sm:$0xf0] }
 0x26c   : > { %v1766_v19 = vpop.f32.mrf.mxu2  ;;  %v3702_v37 = vor.u32 %v3942_v30, %v3701_v11 }
 0x26d   : > { %v1767_v15 = vadd.f32 %v1766_v19, %v4978_v10  ;;  %1948 = vmatmul.bf16.gmra.mxu0 %v4701_v58  ;;  %v3735_v58 = vld [vmem:[%s5617_s7 + $0xc8] sm:$0xf0]  ;;  %v1429_v39 = vadd.f32 %v1428_v36, %v1340_v34 }
 0x26e   : > { %2037 = vmatmul.bf16.gmra.mxu1 %v4877_v21  ;;  %v1855_v16 = vpop.f32.mrf.mxu3  ;;  %v3738_v13 = vor.u32 %v3949_v12, %v3735_v58  ;;  %2488 = vmatpush.bf16.msra.mxu3 %v3702_v37 }
 0x26f   : > { %v1856_v23 = vadd.f32 %v1855_v16, %v1767_v15  ;;  %v1497_v27 = vmax.f32 %v1429_v39, 0.0 }
 0x270   : > { %2662 = vmatpush.bf16.msrb.mxu1 %v3738_v13 }
 0x271   : > { %v2110_v49 = vmax.f32 %v1856_v23, 0.0 }
 0x272   : > { %v1341_v21 = vpop.f32.mrf.mxu0 }
 0x273   : > { %v1342_v40 = vadd.f32 %v1341_v21, %v4758_v17  ;;  %v1430_v59 = vpop.f32.mrf.mxu1 }
 0x274   : > { %v1768_v32 = vpop.f32.mrf.mxu2 }
 0x275   : > { %v1431_v22 = vadd.f32 %v1430_v59, %v1342_v40  ;;  %v1769_v42 = vadd.f32 %v1768_v32, %v4978_v10 }
 0x276   : > { %v1857_v26 = vpop.f32.mrf.mxu3 }
 0x277   : > { %v1499_v44 = vmax.f32 %v1431_v22, 0.0  ;;  %v1858_v48 = vadd.f32 %v1857_v26, %v1769_v42 }
 0x279   : > { %v2112_v14 = vmax.f32 %v1858_v48, 0.0  ;;  %1810 = vmatmul.bf16.gmra.mxu2 %v4904_v47  ;;  %v5077_v52 = vpack.c.bf16 %v1499_v44, %v1497_v27  ;;  %v3931_v27 = vld [vmem:[%s5617_s7 + $0x34] sm:$0xf]  ;;  %v3663_v44 = vld [vmem:[%s5617_s7 + $0x38] sm:$0xf0] }
 0x27a   : > { %v1344_v20 = vpop.f32.mrf.mxu0  ;;  %v3666_v48 = vor.u32 %v3931_v27, %v3663_v44 }
 0x27b   : > { %v1433_v55 = vpop.f32.mrf.mxu1  ;;  %1899 = vmatmul.bf16.gmra.mxu3 %v5077_v52  ;;  %v5086_v63 = vpack.c.bf16 %v2112_v14, %v2110_v49  ;;  %v1345_v1 = vadd.f32 %v1344_v20, %v4758_v17  ;;  %v3947_v49 = vld [vmem:[%s5617_s7 + $0xb4] sm:$0xf] }
 0x27c   : > { %v1771_v60 = vpop.f32.mrf.mxu2  ;;  %2574 = vmatpush.bf16.msrb.mxu0 %v3666_v48 }
 0x27d   : > { %v1772_v0 = vadd.f32 %v1771_v60, %v4978_v10  ;;  %1953 = vmatmul.bf16.gmra.mxu0 %v4735_v45  ;;  %v1434_v19 = vadd.f32 %v1433_v55, %v1345_v1 }
 0x27e   : > { %2042 = vmatmul.bf16.gmra.mxu1 %v4901_v46  ;;  %v1860_v8 = vpop.f32.mrf.mxu3 }
 0x27f   : > { %v1861_v3 = vadd.f32 %v1860_v8, %v1772_v0  ;;  %v1501_v5 = vmax.f32 %v1434_v19, 0.0 }
 0x281   : > { %v2114_v12 = vmax.f32 %v1861_v3, 0.0 }
 0x282   : > { %v1346_v36 = vpop.f32.mrf.mxu0 }
 0x283   : > { %v1347_v45 = vadd.f32 %v1346_v36, %v4758_v17  ;;  %v1435_v15 = vpop.f32.mrf.mxu1  ;;  %v3964_v36 = vld [vmem:[%s5619_s9 + $0x38] sm:$0xff] }
 0x284   : > { %v1773_v46 = vpop.f32.mrf.mxu2  ;;  %2976 = vmatpush.bf16.msrb.mxu2 %v3964_v36 }
 0x285   : > { %v1436_v16 = vadd.f32 %v1435_v15, %v1347_v45  ;;  %v1774_v34 = vadd.f32 %v1773_v46, %v4978_v10 }
 0x286   : > { %v1862_v23 = vpop.f32.mrf.mxu3 }
 0x287   : > { %v1503_v6 = vmax.f32 %v1436_v16, 0.0  ;;  %v1863_v25 = vadd.f32 %v1862_v23, %v1774_v34 }
 0x289   : > { %v2116_v58 = vmax.f32 %v1863_v25, 0.0  ;;  %1815 = vmatmul.bf16.gmra.mxu2 %v4934_v7  ;;  %v5101_v21 = vpack.c.bf16 %v1503_v6, %v1501_v5  ;;  %v3972_v6 = vld [vmem:[%s5619_s9 + $0x78] sm:$0xff] }
 0x28a   : > { %v1349_v13 = vpop.f32.mrf.mxu0  ;;  %3065 = vmatpush.bf16.msrb.mxu3 %v3972_v6  ;;  %v3963_v6 = vld [vmem:[%s5619_s9 + $0x30] sm:$0xff] }
 0x28b   : > { %v1438_v39 = vpop.f32.mrf.mxu1  ;;  %1904 = vmatmul.bf16.gmra.mxu3 %v5101_v21  ;;  %v5104_v40 = vpack.c.bf16 %v2116_v58, %v2114_v12  ;;  %v1350_v42 = vadd.f32 %v1349_v13, %v4758_v17  ;;  %2977 = vmatpush.bf16.msrb.mxu2 %v3963_v6 }
 0x28c   : > { %v1776_v59 = vpop.f32.mrf.mxu2 }
 0x28d   : > { %v1777_v32 = vadd.f32 %v1776_v59, %v4978_v10  ;;  %1958 = vmatmul.bf16.gmra.mxu0 %v4760_v35  ;;  %v3727_v35 = vld [vmem:[%s5617_s7 + $0xb8] sm:$0xf0]  ;;  %v1439_v57 = vadd.f32 %v1438_v39, %v1350_v42 }
 0x28e   : > { %2047 = vmatmul.bf16.gmra.mxu1 %v4925_v54  ;;  %v1865_v22 = vpop.f32.mrf.mxu3  ;;  %v3730_v14 = vor.u32 %v3947_v49, %v3727_v35  ;;  %v5146_v49 = vperm.slane %v4975_v61, 1  ;;  %v3929_v61 = vld [vmem:[%s5617_s7 + $0x24] sm:$0xf] }
 0x28f   : > { %v1866_v26 = vadd.f32 %v1865_v22, %v1777_v32  ;;  %v1505_v8 = vmax.f32 %v1439_v57, 0.0 }
 0x290   : > { %2663 = vmatpush.bf16.msrb.mxu1 %v3730_v14 }
 0x291   : > { %v2118_v11 = vmax.f32 %v1866_v26, 0.0 }
 0x292   : > { %v1351_v54 = vpop.f32.mrf.mxu0 }
 0x293   : > { %v1352_v50 = vadd.f32 %v1351_v54, %v4758_v17  ;;  %v1440_v20 = vpop.f32.mrf.mxu1 }
 0x294   : > { %v1778_v51 = vpop.f32.mrf.mxu2 }
 0x295   : > { %v1441_v55 = vadd.f32 %v1440_v20, %v1352_v50  ;;  %v1779_v60 = vadd.f32 %v1778_v51, %v4978_v10  ;;  %v3655_v51 = vld [vmem:[%s5617_s7 + $0x28] sm:$0xf0] }
 0x296   : > { %v1867_v0 = vpop.f32.mrf.mxu3 }
 0x297   : > { %v1507_v1 = vmax.f32 %v1441_v55, 0.0  ;;  %v1868_v3 = vadd.f32 %v1867_v0, %v1779_v60  ;;  %v3658_v55 = vor.u32 %v3929_v61, %v3655_v51  ;;  %v3945_v60 = vld [vmem:[%s5617_s7 + $0xa4] sm:$0xf] }
 0x299   : > { %v2120_v30 = vmax.f32 %v1868_v3, 0.0  ;;  %1820 = vmatmul.bf16.gmra.mxu2 %v4952_v31  ;;  %v5125_v37 = vpack.c.bf16 %v1507_v1, %v1505_v8  ;;  %2575 = vmatpush.bf16.msrb.mxu0 %v3658_v55 }
 0x29a   : > { %v1354_v19 = vpop.f32.mrf.mxu0 }
 0x29b   : > { %v1443_v45 = vpop.f32.mrf.mxu1  ;;  %1909 = vmatmul.bf16.gmra.mxu3 %v5125_v37  ;;  %v5131_v15 = vpack.c.bf16 %v2120_v30, %v2118_v11  ;;  %v1355_v23 = vadd.f32 %v1354_v19, %v4758_v17 }
 0x29c   : > { %v1781_v46 = vpop.f32.mrf.mxu2 }
 0x29d   : > { %v1782_v16 = vadd.f32 %v1781_v46, %v4978_v10  ;;  %1963 = vmatmul.bf16.gmra.mxu0 %v4790_v2  ;;  %v1444_v12 = vadd.f32 %v1443_v45, %v1355_v23 }
 0x29e   : > { %2052 = vmatmul.bf16.gmra.mxu1 %v4949_v28  ;;  %v1870_v34 = vpop.f32.mrf.mxu3 }
 0x29f   : > { %v1871_v5 = vadd.f32 %v1870_v34, %v1782_v16  ;;  %v1509_v28 = vmax.f32 %v1444_v12, 0.0 }
 0x2a1   : > { %v2122_v26 = vmax.f32 %v1871_v5, 0.0 }
 0x2a2   : > { %v1356_v25 = vpop.f32.mrf.mxu0 }
 0x2a3   : > { %v1357_v58 = vadd.f32 %v1356_v25, %v4758_v17  ;;  %v1445_v13 = vpop.f32.mrf.mxu1 }
 0x2a4   : > { %v1783_v39 = vpop.f32.mrf.mxu2 }
 0x2a5   : > { %v1446_v59 = vadd.f32 %v1445_v13, %v1357_v58  ;;  %v1784_v2 = vadd.f32 %v1783_v39, %v4978_v10 }
 0x2a6   : > { %v1872_v32 = vpop.f32.mrf.mxu3 }
 0x2a7   : > { %v1511_v22 = vmax.f32 %v1446_v59, 0.0  ;;  %v1873_v42 = vadd.f32 %v1872_v32, %v1784_v2 }
 0x2a9   : > { %v2124_v27 = vmax.f32 %v1873_v42, 0.0  ;;  %1825 = vmatmul.bf16.gmra.mxu2 %v4990_v38  ;;  %v5143_v44 = vpack.c.bf16 %v1511_v22, %v1509_v28  ;;  %v3971_v28 = vld [vmem:[%s5619_s9 + $0x70] sm:$0xff] }
 0x2aa   : > { %v1929_v48 = vpop.f32.mrf.mxu0  ;;  %3066 = vmatpush.bf16.msrb.mxu3 %v3971_v28  ;;  %v3962_v28 = vld [vmem:[%s5619_s9 + $0x28] sm:$0xff] }
 0x2ab   : > { %v2018_v17 = vpop.f32.mrf.mxu1  ;;  %1914 = vmatmul.bf16.gmra.mxu3 %v5143_v44  ;;  %v5149_v35 = vpack.c.bf16 %v2124_v27, %v2122_v26  ;;  %v1930_v50 = vadd.f32 %v1929_v48, %v5146_v49  ;;  %2978 = vmatpush.bf16.msrb.mxu2 %v3962_v28 }
 0x2ac   : > { %v1786_v54 = vpop.f32.mrf.mxu2 }
 0x2ad   : > { %v1787_v14 = vadd.f32 %v1786_v54, %v4978_v10  ;;  %1968 = vmatmul.bf16.gmra.mxu0 %v4808_v41  ;;  %v3719_v41 = vld [vmem:[%s5617_s7 + $0xa8] sm:$0xf0]  ;;  %v2019_v8 = vadd.f32 %v2018_v17, %v1930_v50 }
 0x2ae   : > { %2057 = vmatmul.bf16.gmra.mxu1 %v4981_v4  ;;  %v1875_v57 = vpop.f32.mrf.mxu3  ;;  %v3722_v0 = vor.u32 %v3945_v60, %v3719_v41 }
 0x2af   : > { %v1876_v20 = vadd.f32 %v1875_v57, %v1787_v14  ;;  %v2099_v45 = vmax.f32 %v2019_v8, 0.0 }
 0x2b0   : > { %2664 = vmatpush.bf16.msrb.mxu1 %v3722_v0 }
 0x2b1   : > { %v2126_v34 = vmax.f32 %v1876_v20, 0.0 }
 0x2b2   : > { %v1931_v4 = vpop.f32.mrf.mxu0 }
 0x2b3   : > { %v1932_v1 = vadd.f32 %v1931_v4, %v5146_v49  ;;  %v2020_v3 = vpop.f32.mrf.mxu1 }
 0x2b4   : > { %v1788_v11 = vpop.f32.mrf.mxu2 }
 0x2b5   : > { %v2021_v30 = vadd.f32 %v2020_v3, %v1932_v1  ;;  %v1789_v36 = vadd.f32 %v1788_v11, %v4978_v10  ;;  %v3927_v3 = vld [vmem:[%s5617_s7 + $0x14] sm:$0xf]  ;;  %v3647_v11 = vld [vmem:[%s5617_s7 + $0x18] sm:$0xf0] }
 0x2b6   : > { %v1877_v19 = vpop.f32.mrf.mxu3 }
 0x2b7   : > { %v2101_v46 = vmax.f32 %v2021_v30, 0.0  ;;  %v1878_v16 = vadd.f32 %v1877_v19, %v1789_v36  ;;  %v3650_v30 = vor.u32 %v3927_v3, %v3647_v11  ;;  %v3943_v36 = vld [vmem:[%s5617_s7 + $0x94] sm:$0xf] }
 0x2b9   : > { %v5169_v23 = vpack.c.bf16 %v2101_v46, %v2099_v45  ;;  %v2128_v5 = vmax.f32 %v1878_v16, 0.0  ;;  %2400 = vmatmul.bf16.vlgmr.msra.gmra.mxu2 %v5007_v53  ;;  %2576 = vmatpush.bf16.msrb.mxu0 %v3650_v30 }
 0x2ba   : > { %v1934_v25 = vpop.f32.mrf.mxu0 }
 0x2bb   : > { %v2023_v12 = vpop.f32.mrf.mxu1  ;;  %2489 = vmatmul.bf16.vlgmr.msra.gmra.mxu3 %v5169_v23  ;;  %v5176_v58 = vpack.c.bf16 %v2128_v5, %v2126_v34  ;;  %v1935_v2 = vadd.f32 %v1934_v25, %v5146_v49 }
 0x2bc   : > { %v1791_v13 = vpop.f32.mrf.mxu2 }
 0x2bd   : > { %v1792_v39 = vadd.f32 %v1791_v13, %v4978_v10  ;;  %1973 = vmatmul.bf16.gmra.mxu0 %v4838_v24  ;;  %v2024_v42 = vadd.f32 %v2023_v12, %v1935_v2 }
 0x2be   : > { %2062 = vmatmul.bf16.gmra.mxu1 %v5005_v56  ;;  %v1880_v59 = vpop.f32.mrf.mxu3 }
 0x2bf   : > { %v1881_v32 = vadd.f32 %v1880_v59, %v1792_v39  ;;  %v2103_v56 = vmax.f32 %v2024_v42, 0.0 }
 0x2c1   : > { %v2130_v50 = vmax.f32 %v1881_v32, 0.0 }
 0x2c2   : > { %v1936_v22 = vpop.f32.mrf.mxu0 }
 0x2c3   : > { %v1937_v26 = vadd.f32 %v1936_v22, %v5146_v49  ;;  %v2025_v27 = vpop.f32.mrf.mxu1 }
 0x2c4   : > { %v1793_v48 = vpop.f32.mrf.mxu2 }
 0x2c5   : > { %v2026_v17 = vadd.f32 %v2025_v27, %v1937_v26  ;;  %v1794_v24 = vadd.f32 %v1793_v48, %v4978_v10 }
 0x2c6   : > { %v1882_v54 = vpop.f32.mrf.mxu3 }
 0x2c7   : > { %v2105_v14 = vmax.f32 %v2026_v17, 0.0  ;;  %v1883_v57 = vadd.f32 %v1882_v54, %v1794_v24 }
 0x2c9   : > { %v2132_v20 = vmax.f32 %v1883_v57, 0.0  ;;  %2405 = vmatmul.bf16.gmra.mxu2 %v5038_v33  ;;  %v5188_v61 = vpack.c.bf16 %v2105_v14, %v2103_v56  ;;  %v3970_v56 = vld [vmem:[%s5619_s9 + $0x68] sm:$0xff] }
 0x2ca   : > { %v1939_v51 = vpop.f32.mrf.mxu0  ;;  %3067 = vmatpush.bf16.msrb.mxu3 %v3970_v56  ;;  %v3961_v56 = vld [vmem:[%s5619_s9 + $0x20] sm:$0xff] }
 0x2cb   : > { %v2028_v55 = vpop.f32.mrf.mxu1  ;;  %2494 = vmatmul.bf16.gmra.mxu3 %v5188_v61  ;;  %v5191_v60 = vpack.c.bf16 %v2132_v20, %v2130_v50  ;;  %v1940_v8 = vadd.f32 %v1939_v51, %v5146_v49  ;;  %2979 = vmatpush.bf16.msrb.mxu2 %v3961_v56 }
 0x2cc   : > { %v1796_v41 = vpop.f32.mrf.mxu2 }
 0x2cd   : > { %v1797_v4 = vadd.f32 %v1796_v41, %v4978_v10  ;;  %1978 = vmatmul.bf16.gmra.mxu0 %v4856_v62  ;;  %v3711_v62 = vld [vmem:[%s5617_s7 + $0x98] sm:$0xf0]  ;;  %v2029_v45 = vadd.f32 %v2028_v55, %v1940_v8 }
 0x2ce   : > { %2067 = vmatmul.bf16.gmra.mxu1 %v5029_v29  ;;  %v1885_v0 = vpop.f32.mrf.mxu3  ;;  %v3714_v19 = vor.u32 %v3943_v36, %v3711_v62 }
 0x2cf   : > { %v1886_v1 = vadd.f32 %v1885_v0, %v1797_v4  ;;  %v2107_v12 = vmax.f32 %v2029_v45, 0.0 }
 0x2d0   : > { %2665 = vmatpush.bf16.msrb.mxu1 %v3714_v19 }
 0x2d1   : > { %v2134_v59 = vmax.f32 %v1886_v1, 0.0 }
 0x2d2   : > { %v1941_v29 = vpop.f32.mrf.mxu0 }
 0x2d3   : > { %v1942_v46 = vadd.f32 %v1941_v29, %v5146_v49  ;;  %v2030_v16 = vpop.f32.mrf.mxu1 }
 0x2d4   : > { %v1798_v34 = vpop.f32.mrf.mxu2 }
 0x2d5   : > { %v2031_v5 = vadd.f32 %v2030_v16, %v1942_v46  ;;  %v1799_v6 = vadd.f32 %v1798_v34, %v4978_v10  ;;  %v3925_v16 = vld [vmem:[%s5617_s7 + $0x4] sm:$0xf]  ;;  %v3639_v34 = vld [vmem:[%s5617_s7 + $0x8] sm:$0xf0] }
 0x2d6   : > { %v1887_v25 = vpop.f32.mrf.mxu3 }
 0x2d7   : > { %v2109_v13 = vmax.f32 %v2031_v5, 0.0  ;;  %v1888_v39 = vadd.f32 %v1887_v25, %v1799_v6  ;;  %v3642_v5 = vor.u32 %v3925_v16, %v3639_v34  ;;  %v3941_v6 = vld [vmem:[%s5617_s7 + $0x84] sm:$0xf] }
 0x2d9   : > { %v2136_v2 = vmax.f32 %v1888_v39, 0.0  ;;  %2410 = vmatmul.bf16.gmra.mxu2 %v5056_v9  ;;  %v5212_v32 = vpack.c.bf16 %v2109_v13, %v2107_v12  ;;  %2577 = vmatpush.bf16.msrb.mxu0 %v3642_v5 }
 0x2da   : > { %v1944_v22 = vpop.f32.mrf.mxu0 }
 0x2db   : > { %v2033_v42 = vpop.f32.mrf.mxu1  ;;  %2499 = vmatmul.bf16.gmra.mxu3 %v5212_v32  ;;  %v5218_v26 = vpack.c.bf16 %v2136_v2, %v2134_v59  ;;  %v1945_v24 = vadd.f32 %v1944_v22, %v5146_v49 }
 0x2dc   : > { %v1801_v27 = vpop.f32.mrf.mxu2 }
 0x2dd   : > { %v1802_v48 = vadd.f32 %v1801_v27, %v4978_v10  ;;  %1983 = vmatmul.bf16.gmra.mxu0 %v4886_v43  ;;  %v2034_v57 = vadd.f32 %v2033_v42, %v1945_v24 }
 0x2de   : > { %2072 = vmatmul.bf16.gmra.mxu1 %v5053_v18  ;;  %v1890_v17 = vpop.f32.mrf.mxu3 }
 0x2df   : > { %v1891_v54 = vadd.f32 %v1890_v17, %v1802_v48  ;;  %v2111_v18 = vmax.f32 %v2034_v57, 0.0 }
 0x2e1   : > { %v2138_v8 = vmax.f32 %v1891_v54, 0.0 }
 0x2e2   : > { %v1946_v14 = vpop.f32.mrf.mxu0 }
 0x2e3   : > { %v1947_v50 = vadd.f32 %v1946_v14, %v5146_v49  ;;  %v2035_v20 = vpop.f32.mrf.mxu1 }
 0x2e4   : > { %v1803_v51 = vpop.f32.mrf.mxu2 }
 0x2e5   : > { %v2036_v55 = vadd.f32 %v2035_v20, %v1947_v50  ;;  %v1804_v43 = vadd.f32 %v1803_v51, %v4978_v10 }
 0x2e6   : > { %v1892_v41 = vpop.f32.mrf.mxu3 }
 0x2e7   : > { %v2113_v4 = vmax.f32 %v2036_v55, 0.0  ;;  %v1893_v0 = vadd.f32 %v1892_v41, %v1804_v43 }
 0x2e9   : > { %v2140_v1 = vmax.f32 %v1893_v0, 0.0  ;;  %2415 = vmatmul.bf16.gmra.mxu2 %v5086_v63  ;;  %v5230_v3 = vpack.c.bf16 %v2113_v4, %v2111_v18  ;;  %v3969_v18 = vld [vmem:[%s5619_s9 + $0x60] sm:$0xff] }
 0x2ea   : > { %v1949_v11 = vpop.f32.mrf.mxu0  ;;  %3068 = vmatpush.bf16.msrb.mxu3 %v3969_v18 }
 0x2eb   : > { %v2038_v30 = vpop.f32.mrf.mxu1  ;;  %2504 = vmatmul.bf16.gmra.mxu3 %v5230_v3  ;;  %v5233_v36 = vpack.c.bf16 %v2140_v1, %v2138_v8  ;;  %v1950_v45 = vadd.f32 %v1949_v11, %v5146_v49 }
 0x2ec   : > { %v1806_v62 = vpop.f32.mrf.mxu2 }
 0x2ed   : > { %v1807_v29 = vadd.f32 %v1806_v62, %v4978_v10  ;;  %1988 = vmatmul.bf16.gmra.mxu0 %v4904_v47  ;;  %v3703_v47 = vld [vmem:[%s5617_s7 + $0x88] sm:$0xf0]  ;;  %v2039_v12 = vadd.f32 %v2038_v30, %v1950_v45 }
 0x2ee   : > { %2077 = vmatmul.bf16.gmra.mxu1 %v5077_v52  ;;  %v1895_v19 = vpop.f32.mrf.mxu3  ;;  %v3706_v25 = vor.u32 %v3941_v6, %v3703_v47 }
 0x2ef   : > { %v1896_v46 = vadd.f32 %v1895_v19, %v1807_v29  ;;  %v2115_v42 = vmax.f32 %v2039_v12, 0.0 }
 0x2f0   : > { %2666 = vmatpush.bf16.msrb.mxu1 %v3706_v25 }
 0x2f1   : > { %v2142_v17 = vmax.f32 %v1896_v46, 0.0 }
 0x2f2   : > { %v1951_v52 = vpop.f32.mrf.mxu0 }
 0x2f3   : > { %v1952_v13 = vadd.f32 %v1951_v52, %v5146_v49  ;;  %v2040_v39 = vpop.f32.mrf.mxu1 }
 0x2f4   : > { %v1808_v59 = vpop.f32.mrf.mxu2 }
 0x2f5   : > { %v2041_v2 = vadd.f32 %v2040_v39, %v1952_v13  ;;  %v1809_v28 = vadd.f32 %v1808_v59, %v4978_v10 }
 0x2f6   : > { %v1897_v22 = vpop.f32.mrf.mxu3 }
 0x2f7   : > { %v2117_v27 = vmax.f32 %v2041_v2, 0.0  ;;  %v1898_v48 = vadd.f32 %v1897_v22, %v1809_v28 }
 0x2f9   : > { %v2144_v24 = vmax.f32 %v1898_v48, 0.0  ;;  %2420 = vmatmul.bf16.gmra.mxu2 %v5104_v40  ;;  %v5254_v54 = vpack.c.bf16 %v2117_v27, %v2115_v42 }
 0x2fa   : > { %v1954_v14 = vpop.f32.mrf.mxu0 }
 0x2fb   : > { %v2043_v57 = vpop.f32.mrf.mxu1  ;;  %2509 = vmatmul.bf16.gmra.mxu3 %v5254_v54  ;;  %v5260_v50 = vpack.c.bf16 %v2144_v24, %v2142_v17  ;;  %v1955_v43 = vadd.f32 %v1954_v14, %v5146_v49 }
 0x2fc   : > { %v1811_v20 = vpop.f32.mrf.mxu2 }
 0x2fd   : > { %v1812_v51 = vadd.f32 %v1811_v20, %v4978_v10  ;;  %1993 = vmatmul.bf16.gmra.mxu0 %v4934_v7  ;;  %v2044_v0 = vadd.f32 %v2043_v57, %v1955_v43  ;;  %v3960_v57 = vld [vmem:[%s5619_s9 + $0x18] sm:$0xff] }
 0x2fe   : > { %2082 = vmatmul.bf16.gmra.mxu1 %v5101_v21  ;;  %v1900_v55 = vpop.f32.mrf.mxu3  ;;  %2980 = vmatpush.bf16.msrb.mxu2 %v3960_v57 }
 0x2ff   : > { %v1901_v41 = vadd.f32 %v1900_v55, %v1812_v51  ;;  %v2119_v21 = vmax.f32 %v2044_v0, 0.0 }
 0x301   : > { %v2146_v45 = vmax.f32 %v1901_v41, 0.0 }
 0x302   : > { %v1956_v4 = vpop.f32.mrf.mxu0 }
 0x303   : > { %v1957_v8 = vadd.f32 %v1956_v4, %v5146_v49  ;;  %v2045_v1 = vpop.f32.mrf.mxu1 }
 0x304   : > { %v1813_v11 = vpop.f32.mrf.mxu2 }
 0x305   : > { %v2046_v30 = vadd.f32 %v2045_v1, %v1957_v8  ;;  %v1814_v7 = vadd.f32 %v1813_v11, %v4978_v10  ;;  %v3968_v8 = vld [vmem:[%s5619_s9 + $0x58] sm:$0xff] }
 0x306   : > { %v1902_v62 = vpop.f32.mrf.mxu3  ;;  %3069 = vmatpush.bf16.msrb.mxu3 %v3968_v8 }
 0x307   : > { %v2121_v29 = vmax.f32 %v2046_v30, 0.0  ;;  %v1903_v19 = vadd.f32 %v1902_v62, %v1814_v7 }
 0x309   : > { %v2148_v46 = vmax.f32 %v1903_v19, 0.0  ;;  %2425 = vmatmul.bf16.gmra.mxu2 %v5131_v15  ;;  %v5272_v16 = vpack.c.bf16 %v2121_v29, %v2119_v21 }
 0x30a   : > { %v1959_v34 = vpop.f32.mrf.mxu0 }
 0x30b   : > { %v2048_v5 = vpop.f32.mrf.mxu1  ;;  %2514 = vmatmul.bf16.gmra.mxu3 %v5272_v16  ;;  %v5275_v6 = vpack.c.bf16 %v2148_v46, %v2146_v45  ;;  %v1960_v12 = vadd.f32 %v1959_v34, %v5146_v49 }
 0x30c   : > { %v1816_v47 = vpop.f32.mrf.mxu2 }
 0x30d   : > { %v1817_v52 = vadd.f32 %v1816_v47, %v4978_v10  ;;  %1998 = vmatmul.bf16.gmra.mxu0 %v4952_v31  ;;  %v2049_v59 = vadd.f32 %v2048_v5, %v1960_v12 }
 0x30e   : > { %2087 = vmatmul.bf16.gmra.mxu1 %v5125_v37  ;;  %v1905_v25 = vpop.f32.mrf.mxu3 }
 0x30f   : > { %v1906_v13 = vadd.f32 %v1905_v25, %v1817_v52  ;;  %v2123_v17 = vmax.f32 %v2049_v59, 0.0 }
 0x311   : > { %v2150_v31 = vmax.f32 %v1906_v13, 0.0 }
 0x312   : > { %v1961_v39 = vpop.f32.mrf.mxu0 }
 0x313   : > { %v1962_v2 = vadd.f32 %v1961_v39, %v5146_v49  ;;  %v2050_v28 = vpop.f32.mrf.mxu1 }
 0x314   : > { %v1818_v22 = vpop.f32.mrf.mxu2 }
 0x315   : > { %v2051_v42 = vadd.f32 %v2050_v28, %v1962_v2  ;;  %v1819_v27 = vadd.f32 %v1818_v22, %v4978_v10 }
 0x316   : > { %v1907_v48 = vpop.f32.mrf.mxu3 }
 0x317   : > { %v2125_v24 = vmax.f32 %v2051_v42, 0.0  ;;  %v1908_v56 = vadd.f32 %v1907_v48, %v1819_v27 }
 0x319   : > { %v2152_v14 = vmax.f32 %v1908_v56, 0.0  ;;  %2430 = vmatmul.bf16.gmra.mxu2 %v5149_v35  ;;  %v5284_v37 = vpack.c.bf16 %v2125_v24, %v2123_v17 }
 0x31a   : > { %v1964_v20 = vpop.f32.mrf.mxu0 }
 0x31b   : > { %v2053_v51 = vpop.f32.mrf.mxu1  ;;  %2519 = vmatmul.bf16.gmra.mxu3 %v5284_v37  ;;  %v5290_v55 = vpack.c.bf16 %v2152_v14, %v2150_v31  ;;  %v1965_v4 = vadd.f32 %v1964_v20, %v5146_v49 }
 0x31c   : > { %v1821_v43 = vpop.f32.mrf.mxu2 }
 0x31d   : > { %v1822_v41 = vadd.f32 %v1821_v43, %v4978_v10  ;;  %2003 = vmatmul.bf16.gmra.mxu0 %v4990_v38  ;;  %v2054_v11 = vadd.f32 %v2053_v51, %v1965_v4 }
 0x31e   : > { %2092 = vmatmul.bf16.gmra.mxu1 %v5143_v44  ;;  %v1910_v18 = vpop.f32.mrf.mxu3 }
 0x31f   : > { %v1911_v0 = vadd.f32 %v1910_v18, %v1822_v41  ;;  %v2127_v44 = vmax.f32 %v2054_v11, 0.0 }
 0x321   : > { %v2154_v46 = vmax.f32 %v1911_v0, 0.0 }
 0x322   : > { %v1966_v1 = vpop.f32.mrf.mxu0 }
 0x323   : > { %v1967_v30 = vadd.f32 %v1966_v1, %v5146_v49  ;;  %v2055_v7 = vpop.f32.mrf.mxu1 }
 0x324   : > { %v1823_v62 = vpop.f32.mrf.mxu2 }
 0x325   : > { %v2056_v21 = vadd.f32 %v2055_v7, %v1967_v30  ;;  %v1824_v38 = vadd.f32 %v1823_v62, %v4978_v10  ;;  %v3967_v7 = vld [vmem:[%s5619_s9 + $0x50] sm:$0xff] }
 0x326   : > { %v1912_v29 = vpop.f32.mrf.mxu3  ;;  %3070 = vmatpush.bf16.msrb.mxu3 %v3967_v7 }
 0x327   : > { %v2129_v19 = vmax.f32 %v2056_v21, 0.0  ;;  %v1913_v45 = vadd.f32 %v1912_v29, %v1824_v38 }
 0x329   : > { %v2156_v34 = vmax.f32 %v1913_v45, 0.0  ;;  %2435 = vmatmul.bf16.gmra.mxu2 %v5176_v58  ;;  %v5302_v5 = vpack.c.bf16 %v2129_v19, %v2127_v44 }
 0x32a   : > { %v1969_v47 = vpop.f32.mrf.mxu0 }
 0x32b   : > { %v2058_v52 = vpop.f32.mrf.mxu1  ;;  %2524 = vmatmul.bf16.gmra.mxu3 %v5302_v5  ;;  %v5305_v25 = vpack.c.bf16 %v2156_v34, %v2154_v46  ;;  %v1970_v59 = vadd.f32 %v1969_v47, %v5146_v49 }
 0x32c   : > { %v1826_v12 = vpop.f32.mrf.mxu2 }
 0x32d   : > { %v1827_v13 = vadd.f32 %v1826_v12, %v4978_v10  ;;  %2578 = vmatmul.bf16.vlgmr.msrb.gmra.mxu0 %v5007_v53  ;;  %v2059_v22 = vadd.f32 %v2058_v52, %v1970_v59  ;;  %v5316_v53 = vld [vmem:[%s5618_s8] sm:$0x3] }
 0x32e   : > { %2667 = vmatmul.bf16.vlgmr.msrb.gmra.mxu1 %v5169_v23  ;;  %v1915_v39 = vpop.f32.mrf.mxu3  ;;  %v5322_v43 = vperm.slane %v5316_v53, 0 }
 0x32f   : > { %v1916_v2 = vadd.f32 %v1915_v39, %v1827_v13  ;;  %v2131_v23 = vmax.f32 %v2059_v22, 0.0 }
 0x331   : > { %v2158_v57 = vmax.f32 %v1916_v2, 0.0 }
 0x332   : > { %v1971_v28 = vpop.f32.mrf.mxu0 }
 0x333   : > { %v1972_v42 = vadd.f32 %v1971_v28, %v5146_v49  ;;  %v2060_v27 = vpop.f32.mrf.mxu1 }
 0x334   : > { %v1828_v48 = vpop.f32.mrf.mxu2 }
 0x335   : > { %v2061_v17 = vadd.f32 %v2060_v27, %v1972_v42  ;;  %v1829_v24 = vadd.f32 %v1828_v48, %v4978_v10  ;;  %v3959_v10 = vld [vmem:[%s5619_s9 + $0x10] sm:$0xff] }
 0x336   : > { %v1917_v56 = vpop.f32.mrf.mxu3  ;;  %2981 = vmatpush.bf16.msrb.mxu2 %v3959_v10 }
 0x337   : > { %v2133_v31 = vmax.f32 %v2061_v17, 0.0  ;;  %v1918_v14 = vadd.f32 %v1917_v56, %v1829_v24 }
 0x339   : > { %v2160_v20 = vmax.f32 %v1918_v14, 0.0  ;;  %2440 = vmatmul.bf16.gmra.mxu2 %v5191_v60  ;;  %v5319_v51 = vpack.c.bf16 %v2133_v31, %v2131_v23 }
 0x33a   : > { %v1974_v41 = vpop.f32.mrf.mxu0 }
 0x33b   : > { %v2063_v18 = vpop.f32.mrf.mxu1  ;;  %2529 = vmatmul.bf16.gmra.mxu3 %v5319_v51  ;;  %v5328_v4 = vpack.c.bf16 %v2160_v20, %v2158_v57  ;;  %v1975_v11 = vadd.f32 %v1974_v41, %v5146_v49 }
 0x33c   : > { %v2401_v0 = vpop.f32.mrf.mxu2 }
 0x33d   : > { %v2402_v8 = vadd.f32 %v2401_v0, %v5322_v43  ;;  %2583 = vmatmul.bf16.gmra.mxu0 %v5038_v33  ;;  %v2064_v21 = vadd.f32 %v2063_v18, %v1975_v11  ;;  %v3958_v0 = vld [vmem:[%s5619_s9 + $0x8] sm:$0xff] }
 0x33e   : > { %2672 = vmatmul.bf16.gmra.mxu1 %v5188_v61  ;;  %v2490_v1 = vpop.f32.mrf.mxu3  ;;  %2982 = vmatpush.bf16.msrb.mxu2 %v3958_v0 }
 0x33f   : > { %v2491_v30 = vadd.f32 %v2490_v1, %v2402_v8  ;;  %v2135_v61 = vmax.f32 %v2064_v21, 0.0 }
 0x341   : > { %v2748_v47 = vmax.f32 %v2491_v30, 0.0 }
 0x342   : > { %v1976_v62 = vpop.f32.mrf.mxu0 }
 0x343   : > { %v1977_v38 = vadd.f32 %v1976_v62, %v5146_v49  ;;  %v2065_v29 = vpop.f32.mrf.mxu1 }
 0x344   : > { %v2403_v44 = vpop.f32.mrf.mxu2 }
 0x345   : > { %v2066_v19 = vadd.f32 %v2065_v29, %v1977_v38  ;;  %v2404_v33 = vadd.f32 %v2403_v44, %v5322_v43  ;;  %v3966_v29 = vld [vmem:[%s5619_s9 + $0x48] sm:$0xff] }
 0x346   : > { %v2492_v45 = vpop.f32.mrf.mxu3  ;;  %3071 = vmatpush.bf16.msrb.mxu3 %v3966_v29 }
 0x347   : > { %v2137_v46 = vmax.f32 %v2066_v19, 0.0  ;;  %v2493_v34 = vadd.f32 %v2492_v45, %v2404_v33 }
 0x349   : > { %v2750_v52 = vmax.f32 %v2493_v34, 0.0  ;;  %2445 = vmatmul.bf16.gmra.mxu2 %v5218_v26  ;;  %v5340_v12 = vpack.c.bf16 %v2137_v46, %v2135_v61 }
 0x34a   : > { %v1979_v13 = vpop.f32.mrf.mxu0 }
 0x34b   : > { %v5342_v39 = vpack.c.bf16 %v2750_v52, %v2748_v47  ;;  %v2068_v59 = vpop.f32.mrf.mxu1  ;;  %2534 = vmatmul.bf16.gmra.mxu3 %v5340_v12  ;;  %v1980_v42 = vadd.f32 %v1979_v13, %v5146_v49 }
 0x34c   : > { %v2406_v2 = vpop.f32.mrf.mxu2 }
 0x34d   : > { %v2407_v28 = vadd.f32 %v2406_v2, %v5322_v43  ;;  %2588 = vmatmul.bf16.gmra.mxu0 %v5056_v9  ;;  %v2069_v17 = vadd.f32 %v2068_v59, %v1980_v42 }
 0x34e   : > { %2677 = vmatmul.bf16.gmra.mxu1 %v5212_v32  ;;  %v2495_v22 = vpop.f32.mrf.mxu3 }
 0x34f   : > { %v2496_v27 = vadd.f32 %v2495_v22, %v2407_v28  ;;  %v2139_v20 = vmax.f32 %v2069_v17, 0.0 }
 0x351   : > { %v2752_v9 = vmax.f32 %v2496_v27, 0.0 }
 0x352   : > { %v1981_v48 = vpop.f32.mrf.mxu0 }
 0x353   : > { %v1982_v24 = vadd.f32 %v1981_v48, %v5146_v49  ;;  %v2070_v56 = vpop.f32.mrf.mxu1 }
 0x354   : > { %v2408_v23 = vpop.f32.mrf.mxu2 }
 0x355   : > { %v2071_v31 = vadd.f32 %v2070_v56, %v1982_v24  ;;  %v2409_v14 = vadd.f32 %v2408_v23, %v5322_v43 }
 0x356   : > { %v2497_v57 = vpop.f32.mrf.mxu3 }
 0x357   : > { %v2141_v10 = vmax.f32 %v2071_v31, 0.0  ;;  %v2498_v41 = vadd.f32 %v2497_v57, %v2409_v14 }
 0x359   : > { %v2754_v18 = vmax.f32 %v2498_v41, 0.0  ;;  %2450 = vmatmul.bf16.gmra.mxu2 %v5233_v36  ;;  %v5352_v32 = vpack.c.bf16 %v2141_v10, %v2139_v20 }
 0x35a   : > { %v1984_v8 = vpop.f32.mrf.mxu0 }
 0x35b   : > { %v2073_v1 = vpop.f32.mrf.mxu1  ;;  %2539 = vmatmul.bf16.gmra.mxu3 %v5352_v32  ;;  %v5358_v11 = vpack.c.bf16 %v2754_v18, %v2752_v9  ;;  %v1985_v21 = vadd.f32 %v1984_v8, %v5146_v49 }
 0x35c   : > { %v2411_v30 = vpop.f32.mrf.mxu2 }
 0x35d   : > { %v2412_v7 = vadd.f32 %v2411_v30, %v5322_v43  ;;  %2593 = vmatmul.bf16.gmra.mxu0 %v5086_v63  ;;  %v2074_v19 = vadd.f32 %v2073_v1, %v1985_v21  ;;  %v3957_v30 = vld [vmem:[%s5619_s9] sm:$0xff] }
 0x35e   : > { %2682 = vmatmul.bf16.gmra.mxu1 %v5230_v3  ;;  %v2500_v62 = vpop.f32.mrf.mxu3  ;;  %2983 = vmatpush.bf16.msrb.mxu2 %v3957_v30 }
 0x35f   : > { %v2501_v38 = vadd.f32 %v2500_v62, %v2412_v7  ;;  %v2143_v3 = vmax.f32 %v2074_v19, 0.0 }
 0x361   : > { %v2756_v13 = vmax.f32 %v2501_v38, 0.0 }
 0x362   : > { %v1986_v44 = vpop.f32.mrf.mxu0 }
 0x363   : > { %v1987_v33 = vadd.f32 %v1986_v44, %v5146_v49  ;;  %v2075_v45 = vpop.f32.mrf.mxu1 }
 0x364   : > { %v2413_v61 = vpop.f32.mrf.mxu2 }
 0x365   : > { %v2076_v46 = vadd.f32 %v2075_v45, %v1987_v33  ;;  %v2414_v63 = vadd.f32 %v2413_v61, %v5322_v43  ;;  %v3965_v45 = vld [vmem:[%s5619_s9 + $0x40] sm:$0xff] }
 0x366   : > { %v2502_v34 = vpop.f32.mrf.mxu3  ;;  %3072 = vmatpush.bf16.msrb.mxu3 %v3965_v45 }
 0x367   : > { %v2145_v47 = vmax.f32 %v2076_v46, 0.0  ;;  %v2503_v52 = vadd.f32 %v2502_v34, %v2414_v63 }
 0x369   : > { %v2758_v59 = vmax.f32 %v2503_v52, 0.0  ;;  %2455 = vmatmul.bf16.gmra.mxu2 %v5260_v50  ;;  %v5370_v2 = vpack.c.bf16 %v2145_v47, %v2143_v3 }
 0x36a   : > { %v1989_v28 = vpop.f32.mrf.mxu0 }
 0x36b   : > { %v2078_v22 = vpop.f32.mrf.mxu1  ;;  %2544 = vmatmul.bf16.gmra.mxu3 %v5370_v2  ;;  %v5373_v42 = vpack.c.bf16 %v2758_v59, %v2756_v13  ;;  %v1990_v24 = vadd.f32 %v1989_v28, %v5146_v49 }
 0x36c   : > { %v2416_v27 = vpop.f32.mrf.mxu2 }
 0x36d   : > { %v2417_v48 = vadd.f32 %v2416_v27, %v5322_v43  ;;  %2598 = vmatmul.bf16.gmra.mxu0 %v5104_v40  ;;  %v2079_v31 = vadd.f32 %v2078_v22, %v1990_v24 }
 0x36e   : > { %2687 = vmatmul.bf16.gmra.mxu1 %v5254_v54  ;;  %v2505_v17 = vpop.f32.mrf.mxu3 }
 0x36f   : > { %v2506_v56 = vadd.f32 %v2505_v17, %v2417_v48  ;;  %v2147_v18 = vmax.f32 %v2079_v31, 0.0 }
 0x371   : > { %v2760_v40 = vmax.f32 %v2506_v56, 0.0 }
 0x372   : > { %v1991_v23 = vpop.f32.mrf.mxu0 }
 0x373   : > { %v1992_v14 = vadd.f32 %v1991_v23, %v5146_v49  ;;  %v2080_v57 = vpop.f32.mrf.mxu1 }
 0x374   : > { %v2418_v20 = vpop.f32.mrf.mxu2 }
 0x375   : > { %v2081_v10 = vadd.f32 %v2080_v57, %v1992_v14  ;;  %v2419_v41 = vadd.f32 %v2418_v20, %v5322_v43 }
 0x376   : > { %v2507_v9 = vpop.f32.mrf.mxu3 }
 0x377   : > { %v2149_v0 = vmax.f32 %v2081_v10, 0.0  ;;  %v2508_v8 = vadd.f32 %v2507_v9, %v2419_v41 }
 0x379   : > { %v2762_v1 = vmax.f32 %v2508_v8, 0.0  ;;  %2460 = vmatmul.bf16.gmra.mxu2 %v5275_v6  ;;  %v5382_v54 = vpack.c.bf16 %v2149_v0, %v2147_v18 }
 0x37a   : > { %v1994_v7 = vpop.f32.mrf.mxu0 }
 0x37b   : > { %v2083_v62 = vpop.f32.mrf.mxu1  ;;  %2549 = vmatmul.bf16.gmra.mxu3 %v5382_v54  ;;  %v5388_v21 = vpack.c.bf16 %v2762_v1, %v2760_v40  ;;  %v1995_v19 = vadd.f32 %v1994_v7, %v5146_v49 }
 0x37c   : > { %v2421_v38 = vpop.f32.mrf.mxu2 }
 0x37d   : > { %v2422_v29 = vadd.f32 %v2421_v38, %v5322_v43  ;;  %2603 = vmatmul.bf16.gmra.mxu0 %v5131_v15  ;;  %v2084_v46 = vadd.f32 %v2083_v62, %v1995_v19 }
 0x37e   : > { %2692 = vmatmul.bf16.gmra.mxu1 %v5272_v16  ;;  %v2510_v44 = vpop.f32.mrf.mxu3 }
 0x37f   : > { %v2511_v33 = vadd.f32 %v2510_v44, %v2422_v29  ;;  %v2151_v16 = vmax.f32 %v2084_v46, 0.0 }
 0x381   : > { %v2764_v28 = vmax.f32 %v2511_v33, 0.0 }
 0x382   : > { %v1996_v61 = vpop.f32.mrf.mxu0 }
 0x383   : > { %v1997_v63 = vadd.f32 %v1996_v61, %v5146_v49  ;;  %v2085_v34 = vpop.f32.mrf.mxu1 }
 0x384   : > { %v2423_v3 = vpop.f32.mrf.mxu2 }
 0x385   : > { %v2086_v47 = vadd.f32 %v2085_v34, %v1997_v63  ;;  %v2424_v15 = vadd.f32 %v2423_v3, %v5322_v43 }
 0x386   : > { %v2512_v52 = vpop.f32.mrf.mxu3 }
 0x387   : > { %v2153_v13 = vmax.f32 %v2086_v47, 0.0  ;;  %v2513_v59 = vadd.f32 %v2512_v52, %v2424_v15 }
 0x389   : > { %v2766_v22 = vmax.f32 %v2513_v59, 0.0  ;;  %2465 = vmatmul.bf16.gmra.mxu2 %v5290_v55  ;;  %v5400_v27 = vpack.c.bf16 %v2153_v13, %v2151_v16 }
 0x38a   : > { %v1999_v48 = vpop.f32.mrf.mxu0 }
 0x38b   : > { %v2088_v17 = vpop.f32.mrf.mxu1  ;;  %2554 = vmatmul.bf16.gmra.mxu3 %v5400_v27  ;;  %v5403_v24 = vpack.c.bf16 %v2766_v22, %v2764_v28  ;;  %v2000_v14 = vadd.f32 %v1999_v48, %v5146_v49 }
 0x38c   : > { %v2426_v56 = vpop.f32.mrf.mxu2 }
 0x38d   : > { %v2427_v23 = vadd.f32 %v2426_v56, %v5322_v43  ;;  %2608 = vmatmul.bf16.gmra.mxu0 %v5149_v35  ;;  %v2089_v10 = vadd.f32 %v2088_v17, %v2000_v14  ;;  %v5427_v56 = vperm.slane %v5316_v53, 1 }
 0x38e   : > { %2697 = vmatmul.bf16.gmra.mxu1 %v5284_v37  ;;  %v2515_v31 = vpop.f32.mrf.mxu3 }
 0x38f   : > { %v2516_v57 = vadd.f32 %v2515_v31, %v2427_v23  ;;  %v2155_v1 = vmax.f32 %v2089_v10, 0.0 }
 0x391   : > { %v2768_v35 = vmax.f32 %v2516_v57, 0.0 }
 0x392   : > { %v2001_v20 = vpop.f32.mrf.mxu0 }
 0x393   : > { %v2002_v41 = vadd.f32 %v2001_v20, %v5146_v49  ;;  %v2090_v9 = vpop.f32.mrf.mxu1 }
 0x394   : > { %v2428_v18 = vpop.f32.mrf.mxu2 }
 0x395   : > { %v2091_v0 = vadd.f32 %v2090_v9, %v2002_v41  ;;  %v2429_v8 = vadd.f32 %v2428_v18, %v5322_v43 }
 0x396   : > { %v2517_v40 = vpop.f32.mrf.mxu3 }
 0x397   : > { %v2157_v30 = vmax.f32 %v2091_v0, 0.0  ;;  %v2518_v7 = vadd.f32 %v2517_v40, %v2429_v8 }
 0x399   : > { %v2770_v62 = vmax.f32 %v2518_v7, 0.0  ;;  %2470 = vmatmul.bf16.gmra.mxu2 %v5305_v25  ;;  %v5412_v37 = vpack.c.bf16 %v2157_v30, %v2155_v1 }
 0x39a   : > { %v2004_v38 = vpop.f32.mrf.mxu0 }
 0x39b   : > { %v2093_v29 = vpop.f32.mrf.mxu1  ;;  %2559 = vmatmul.bf16.gmra.mxu3 %v5412_v37  ;;  %v5415_v44 = vpack.c.bf16 %v2770_v62, %v2768_v35  ;;  %v2005_v61 = vadd.f32 %v2004_v38, %v5146_v49 }
 0x39c   : > { %v2431_v19 = vpop.f32.mrf.mxu2 }
 0x39d   : > { %v2432_v33 = vadd.f32 %v2431_v19, %v5322_v43  ;;  %2613 = vmatmul.bf16.gmra.mxu0 %v5176_v58  ;;  %v2094_v34 = vadd.f32 %v2093_v29, %v2005_v61 }
 0x39e   : > { %2702 = vmatmul.bf16.gmra.mxu1 %v5302_v5  ;;  %v2520_v45 = vpop.f32.mrf.mxu3 }
 0x39f   : > { %v2521_v46 = vadd.f32 %v2520_v45, %v2432_v33  ;;  %v2159_v59 = vmax.f32 %v2094_v34, 0.0 }
 0x3a1   : > { %v2772_v58 = vmax.f32 %v2521_v46, 0.0 }
 0x3a2   : > { %v2006_v63 = vpop.f32.mrf.mxu0 }
 0x3a3   : > { %v2007_v3 = vadd.f32 %v2006_v63, %v5146_v49  ;;  %v2095_v47 = vpop.f32.mrf.mxu1 }
 0x3a4   : > { %v2433_v15 = vpop.f32.mrf.mxu2 }
 0x3a5   : > { %v2096_v52 = vadd.f32 %v2095_v47, %v2007_v3  ;;  %v2434_v16 = vadd.f32 %v2433_v15, %v5322_v43 }
 0x3a6   : > { %v2522_v13 = vpop.f32.mrf.mxu3 }
 0x3a7   : > { %v2161_v28 = vmax.f32 %v2096_v52, 0.0  ;;  %v2523_v22 = vadd.f32 %v2522_v13, %v2434_v16 }
 0x3a9   : > { %v2774_v48 = vmax.f32 %v2523_v22, 0.0  ;;  %2475 = vmatmul.bf16.gmra.mxu2 %v5328_v4  ;;  %v5424_v5 = vpack.c.bf16 %v2161_v28, %v2159_v59 }
 0x3aa   : > { %v2579_v17 = vpop.f32.mrf.mxu0 }
 0x3ab   : > { %v2668_v49 = vpop.f32.mrf.mxu1  ;;  %2564 = vmatmul.bf16.gmra.mxu3 %v5424_v5  ;;  %v5430_v23 = vpack.c.bf16 %v2774_v48, %v2772_v58  ;;  %v2580_v20 = vadd.f32 %v2579_v17, %v5427_v56 }
 0x3ac   : > { %v2436_v31 = vpop.f32.mrf.mxu2 }
 0x3ad   : > { %v2437_v14 = vadd.f32 %v2436_v31, %v5322_v43  ;;  %2618 = vmatmul.bf16.gmra.mxu0 %v5191_v60  ;;  %v2669_v9 = vadd.f32 %v2668_v49, %v2580_v20 }
 0x3ae   : > { %2707 = vmatmul.bf16.gmra.mxu1 %v5319_v51  ;;  %v2525_v57 = vpop.f32.mrf.mxu3 }
 0x3af   : > { %v2526_v10 = vadd.f32 %v2525_v57, %v2437_v14  ;;  %v2749_v30 = vmax.f32 %v2669_v9, 0.0 }
 0x3b1   : > { %v2776_v60 = vmax.f32 %v2526_v10, 0.0 }
 0x3b2   : > { %v2581_v41 = vpop.f32.mrf.mxu0 }
 0x3b3   : > { %v2582_v53 = vadd.f32 %v2581_v41, %v5427_v56  ;;  %v2670_v18 = vpop.f32.mrf.mxu1 }
 0x3b4   : > { %v2438_v0 = vpop.f32.mrf.mxu2 }
 0x3b5   : > { %v2671_v8 = vadd.f32 %v2670_v18, %v2582_v53  ;;  %v2439_v40 = vadd.f32 %v2438_v0, %v5322_v43 }
 0x3b6   : > { %v2527_v1 = vpop.f32.mrf.mxu3 }
 0x3b7   : > { %v2751_v7 = vmax.f32 %v2671_v8, 0.0  ;;  %v2528_v35 = vadd.f32 %v2527_v1, %v2439_v40 }
 0x3b9   : > { %v2813_v62 = vpack.c.bf16 %v2751_v7, %v2749_v30  ;;  %v2778_v51 = vmax.f32 %v2528_v35, 0.0  ;;  %2984 = vmatmul.bf16.vlgmr.msrb.gmra.mxu2 %v5342_v39 }
 0x3ba   : > { %v2584_v38 = vpop.f32.mrf.mxu0 }
 0x3bb   : > { %v2673_v29 = vpop.f32.mrf.mxu1  ;;  %3073 = vmatmul.bf16.vlgmr.msrb.gmra.mxu3 %v2813_v62  ;;  %v5439_v19 = vpack.c.bf16 %v2778_v51, %v2776_v60  ;;  %v2585_v46 = vadd.f32 %v2584_v38, %v5427_v56 }
 0x3bc   : > { %v2441_v33 = vpop.f32.mrf.mxu2 }
 0x3bd   : > { %v2442_v45 = vadd.f32 %v2441_v33, %v5322_v43  ;;  %2623 = vmatmul.bf16.gmra.mxu0 %v5218_v26  ;;  %v2674_v3 = vadd.f32 %v2673_v29, %v2585_v46 }
 0x3be   : > { %2712 = vmatmul.bf16.gmra.mxu1 %v5340_v12  ;;  %v2530_v61 = vpop.f32.mrf.mxu3 }
 0x3bf   : > { %v2531_v63 = vadd.f32 %v2530_v61, %v2442_v45  ;;  %v2753_v59 = vmax.f32 %v2674_v3, 0.0 }
 0x3c1   : > { %v2780_v26 = vmax.f32 %v2531_v63, 0.0 }
 0x3c2   : > { %v2586_v34 = vpop.f32.mrf.mxu0 }
 0x3c3   : > { %v2587_v39 = vadd.f32 %v2586_v34, %v5427_v56  ;;  %v2675_v47 = vpop.f32.mrf.mxu1 }
 0x3c4   : > { %v2443_v15 = vpop.f32.mrf.mxu2 }
 0x3c5   : > { %v2676_v52 = vadd.f32 %v2675_v47, %v2587_v39  ;;  %v2444_v16 = vadd.f32 %v2443_v15, %v5322_v43 }
 0x3c6   : > { %v2532_v13 = vpop.f32.mrf.mxu3 }
 0x3c7   : > { %v2755_v28 = vmax.f32 %v2676_v52, 0.0  ;;  %v2533_v22 = vadd.f32 %v2532_v13, %v2444_v16 }
 0x3c9   : > { %v2782_v58 = vmax.f32 %v2533_v22, 0.0  ;;  %2989 = vmatmul.bf16.gmra.mxu2 %v5358_v11  ;;  %v2815_v12 = vpack.c.bf16 %v2755_v28, %v2753_v59 }
 0x3ca   : > { %v2589_v48 = vpop.f32.mrf.mxu0 }
 0x3cb   : > { %v2678_v17 = vpop.f32.mrf.mxu1  ;;  %3078 = vmatmul.bf16.gmra.mxu3 %v2815_v12  ;;  %v5448_v49 = vpack.c.bf16 %v2782_v58, %v2780_v26  ;;  %v2590_v20 = vadd.f32 %v2589_v48, %v5427_v56 }
 0x3cc   : > { %v2446_v31 = vpop.f32.mrf.mxu2 }
 0x3cd   : > { %v2447_v14 = vadd.f32 %v2446_v31, %v5322_v43  ;;  %2628 = vmatmul.bf16.gmra.mxu0 %v5233_v36  ;;  %v2679_v9 = vadd.f32 %v2678_v17, %v2590_v20 }
 0x3ce   : > { %2717 = vmatmul.bf16.gmra.mxu1 %v5352_v32  ;;  %v2535_v57 = vpop.f32.mrf.mxu3 }
 0x3cf   : > { %v2536_v10 = vadd.f32 %v2535_v57, %v2447_v14  ;;  %v2757_v1 = vmax.f32 %v2679_v9, 0.0 }
 0x3d1   : > { %v2784_v36 = vmax.f32 %v2536_v10, 0.0 }
 0x3d2   : > { %v2591_v41 = vpop.f32.mrf.mxu0 }
 0x3d3   : > { %v2592_v11 = vadd.f32 %v2591_v41, %v5427_v56  ;;  %v2680_v53 = vpop.f32.mrf.mxu1 }
 0x3d4   : > { %v2448_v18 = vpop.f32.mrf.mxu2 }
 0x3d5   : > { %v2681_v0 = vadd.f32 %v2680_v53, %v2592_v11  ;;  %v2449_v8 = vadd.f32 %v2448_v18, %v5322_v43 }
 0x3d6   : > { %v2537_v40 = vpop.f32.mrf.mxu3 }
 0x3d7   : > { %v2759_v30 = vmax.f32 %v2681_v0, 0.0  ;;  %v2538_v7 = vadd.f32 %v2537_v40, %v2449_v8 }
 0x3d9   : > { %v2786_v35 = vmax.f32 %v2538_v7, 0.0  ;;  %2994 = vmatmul.bf16.gmra.mxu2 %v5373_v42  ;;  %v2817_v32 = vpack.c.bf16 %v2759_v30, %v2757_v1 }
 0x3da   : > { %v2594_v60 = vpop.f32.mrf.mxu0 }
 0x3db   : > { %v2683_v62 = vpop.f32.mrf.mxu1  ;;  %3083 = vmatmul.bf16.gmra.mxu3 %v2817_v32  ;;  %v5457_v51 = vpack.c.bf16 %v2786_v35, %v2784_v36  ;;  %v2595_v45 = vadd.f32 %v2594_v60, %v5427_v56 }
 0x3dc   : > { %v2451_v38 = vpop.f32.mrf.mxu2 }
 0x3dd   : > { %v2452_v29 = vadd.f32 %v2451_v38, %v5322_v43  ;;  %2633 = vmatmul.bf16.gmra.mxu0 %v5260_v50  ;;  %v2684_v63 = vadd.f32 %v2683_v62, %v2595_v45 }
 0x3de   : > { %2722 = vmatmul.bf16.gmra.mxu1 %v5370_v2  ;;  %v2540_v33 = vpop.f32.mrf.mxu3 }
 0x3df   : > { %v2541_v61 = vadd.f32 %v2540_v33, %v2452_v29  ;;  %v2761_v52 = vmax.f32 %v2684_v63, 0.0 }
 0x3e1   : > { %v2788_v50 = vmax.f32 %v2541_v61, 0.0 }
 0x3e2   : > { %v2596_v46 = vpop.f32.mrf.mxu0 }
 0x3e3   : > { %v2597_v42 = vadd.f32 %v2596_v46, %v5427_v56  ;;  %v2685_v34 = vpop.f32.mrf.mxu1 }
 0x3e4   : > { %v2453_v3 = vpop.f32.mrf.mxu2 }
 0x3e5   : > { %v2686_v39 = vadd.f32 %v2685_v34, %v2597_v42  ;;  %v2454_v47 = vadd.f32 %v2453_v3, %v5322_v43 }
 0x3e6   : > { %v2542_v15 = vpop.f32.mrf.mxu3 }
 0x3e7   : > { %v2763_v16 = vmax.f32 %v2686_v39, 0.0  ;;  %v2543_v13 = vadd.f32 %v2542_v15, %v2454_v47 }
 0x3e9   : > { %v2790_v59 = vmax.f32 %v2543_v13, 0.0  ;;  %2999 = vmatmul.bf16.gmra.mxu2 %v5388_v21  ;;  %v2819_v2 = vpack.c.bf16 %v2763_v16, %v2761_v52 }
 0x3ea   : > { %v2599_v28 = vpop.f32.mrf.mxu0 }
 0x3eb   : > { %v2688_v22 = vpop.f32.mrf.mxu1  ;;  %3088 = vmatmul.bf16.gmra.mxu3 %v2819_v2  ;;  %v5466_v26 = vpack.c.bf16 %v2790_v59, %v2788_v50  ;;  %v2600_v17 = vadd.f32 %v2599_v28, %v5427_v56 }
 0x3ec   : > { %v2456_v58 = vpop.f32.mrf.mxu2 }
 0x3ed   : > { %v2457_v12 = vadd.f32 %v2456_v58, %v5322_v43  ;;  %2638 = vmatmul.bf16.gmra.mxu0 %v5275_v6  ;;  %v2689_v57 = vadd.f32 %v2688_v22, %v2600_v17 }
 0x3ee   : > { %2727 = vmatmul.bf16.gmra.mxu1 %v5382_v54  ;;  %v2545_v48 = vpop.f32.mrf.mxu3 }
 0x3ef   : > { %v2546_v31 = vadd.f32 %v2545_v48, %v2457_v12  ;;  %v2765_v53 = vmax.f32 %v2689_v57, 0.0 }
 0x3f1   : > { %v2792_v6 = vmax.f32 %v2546_v31, 0.0 }
 0x3f2   : > { %v2601_v14 = vpop.f32.mrf.mxu0 }
 0x3f3   : > { %v2602_v21 = vadd.f32 %v2601_v14, %v5427_v56  ;;  %v2690_v20 = vpop.f32.mrf.mxu1 }
 0x3f4   : > { %v2458_v10 = vpop.f32.mrf.mxu2 }
 0x3f5   : > { %v2691_v41 = vadd.f32 %v2690_v20, %v2602_v21  ;;  %v2459_v9 = vadd.f32 %v2458_v10, %v5322_v43 }
 0x3f6   : > { %v2547_v11 = vpop.f32.mrf.mxu3 }
 0x3f7   : > { %v2767_v18 = vmax.f32 %v2691_v41, 0.0  ;;  %v2548_v0 = vadd.f32 %v2547_v11, %v2459_v9 }
 0x3f9   : > { %v2821_v8 = vpack.c.bf16 %v2767_v18, %v2765_v53  ;;  %v2794_v54 = vmax.f32 %v2548_v0, 0.0  ;;  %3004 = vmatmul.bf16.gmra.mxu2 %v5403_v24 }
 0x3fa   : > { %v2604_v40 = vpop.f32.mrf.mxu0 }
 0x3fb   : > { %v2693_v1 = vpop.f32.mrf.mxu1  ;;  %3093 = vmatmul.bf16.gmra.mxu3 %v2821_v8  ;;  %v5475_v30 = vpack.c.bf16 %v2794_v54, %v2792_v6  ;;  %v2605_v32 = vadd.f32 %v2604_v40, %v5427_v56 }
 0x3fc   : > { %v2461_v7 = vpop.f32.mrf.mxu2 }
 0x3fd   : > { %v2462_v36 = vadd.f32 %v2461_v7, %v5322_v43  ;;  %2643 = vmatmul.bf16.gmra.mxu0 %v5290_v55  ;;  %v2694_v38 = vadd.f32 %v2693_v1, %v2605_v32 }
 0x3fe   : > { %2732 = vmatmul.bf16.gmra.mxu1 %v5400_v27  ;;  %v2550_v35 = vpop.f32.mrf.mxu3 }
 0x3ff   : > { %v2551_v60 = vadd.f32 %v2550_v35, %v2462_v36  ;;  %v2769_v63 = vmax.f32 %v2694_v38, 0.0 }
 0x401   : > { %v2796_v55 = vmax.f32 %v2551_v60, 0.0 }
 0x402   : > { %v2606_v62 = vpop.f32.mrf.mxu0 }
 0x403   : > { %v2607_v24 = vadd.f32 %v2606_v62, %v5427_v56  ;;  %v2695_v29 = vpop.f32.mrf.mxu1 }
 0x404   : > { %v2463_v33 = vpop.f32.mrf.mxu2 }
 0x405   : > { %v2696_v45 = vadd.f32 %v2695_v29, %v2607_v24  ;;  %v2464_v61 = vadd.f32 %v2463_v33, %v5322_v43 }
 0x406   : > { %v2552_v46 = vpop.f32.mrf.mxu3 }
 0x407   : > { %v2771_v42 = vmax.f32 %v2696_v45, 0.0  ;;  %v2553_v34 = vadd.f32 %v2552_v46, %v2464_v61 }
 0x409   : > { %v2823_v3 = vpack.c.bf16 %v2771_v42, %v2769_v63  ;;  %v2798_v27 = vmax.f32 %v2553_v34, 0.0  ;;  %3009 = vmatmul.bf16.gmra.mxu2 %v5415_v44 }
 0x40a   : > { %v2609_v39 = vpop.f32.mrf.mxu0 }
 0x40b   : > { %v2698_v47 = vpop.f32.mrf.mxu1  ;;  %3098 = vmatmul.bf16.gmra.mxu3 %v2823_v3  ;;  %v5484_v15 = vpack.c.bf16 %v2798_v27, %v2796_v55  ;;  %v2610_v50 = vadd.f32 %v2609_v39, %v5427_v56 }
 0x40c   : > { %v2466_v52 = vpop.f32.mrf.mxu2 }
 0x40d   : > { %v2467_v16 = vadd.f32 %v2466_v52, %v5322_v43  ;;  %2648 = vmatmul.bf16.gmra.mxu0 %v5305_v25  ;;  %v2699_v28 = vadd.f32 %v2698_v47, %v2610_v50 }
 0x40e   : > { %2737 = vmatmul.bf16.gmra.mxu1 %v5412_v37  ;;  %v2555_v13 = vpop.f32.mrf.mxu3 }
 0x40f   : > { %v2556_v59 = vadd.f32 %v2555_v13, %v2467_v16  ;;  %v2773_v31 = vmax.f32 %v2699_v28, 0.0  ;;  %v5512_v28 = vld [vmem:[%s5620_s10] ss:$0 sm:$0xff] }
 0x411   : > { %v2800_v25 = vmax.f32 %v2556_v59, 0.0 }
 0x412   : > { %v2611_v2 = vpop.f32.mrf.mxu0 }
 0x413   : > { %v2612_v44 = vadd.f32 %v2611_v2, %v5427_v56  ;;  %v2700_v22 = vpop.f32.mrf.mxu1 }
 0x414   : > { %v2468_v58 = vpop.f32.mrf.mxu2 }
 0x415   : > { %v2701_v12 = vadd.f32 %v2700_v22, %v2612_v44  ;;  %v2469_v48 = vadd.f32 %v2468_v58, %v5322_v43 }
 0x416   : > { %v2557_v17 = vpop.f32.mrf.mxu3 }
 0x417   : > { %v2775_v14 = vmax.f32 %v2701_v12, 0.0  ;;  %v2558_v57 = vadd.f32 %v2557_v17, %v2469_v48 }
 0x419   : > { %v2825_v21 = vpack.c.bf16 %v2775_v14, %v2773_v31  ;;  %v2802_v37 = vmax.f32 %v2558_v57, 0.0  ;;  %3014 = vmatmul.bf16.gmra.mxu2 %v5430_v23 }
 0x41a   : > { %v2614_v20 = vpop.f32.mrf.mxu0 }
 0x41b   : > { %v2703_v10 = vpop.f32.mrf.mxu1  ;;  %3103 = vmatmul.bf16.gmra.mxu3 %v2825_v21  ;;  %v5493_v41 = vpack.c.bf16 %v2802_v37, %v2800_v25  ;;  %v2615_v18 = vadd.f32 %v2614_v20, %v5427_v56 }
 0x41c   : > { %v2471_v9 = vpop.f32.mrf.mxu2 }
 0x41d   : > { %v2472_v11 = vadd.f32 %v2471_v9, %v5322_v43  ;;  %2653 = vmatmul.bf16.gmra.mxu0 %v5328_v4  ;;  %v2704_v8 = vadd.f32 %v2703_v10, %v2615_v18 }
 0x41e   : > { %2742 = vmatmul.bf16.gmra.mxu1 %v5424_v5  ;;  %v2560_v53 = vpop.f32.mrf.mxu3 }
 0x41f   : > { %v2561_v0 = vadd.f32 %v2560_v53, %v2472_v11  ;;  %v2777_v35 = vmax.f32 %v2704_v8, 0.0 }
 0x421   : > { %v2804_v4 = vmax.f32 %v2561_v0, 0.0 }
 0x422   : > { %v2616_v6 = vpop.f32.mrf.mxu0 }
 0x423   : > { %v2617_v23 = vadd.f32 %v2616_v6, %v5427_v56  ;;  %v2705_v54 = vpop.f32.mrf.mxu1 }
 0x424   : > { %v2473_v40 = vpop.f32.mrf.mxu2 }
 0x425   : > { %v2706_v1 = vadd.f32 %v2705_v54, %v2617_v23  ;;  %v2474_v7 = vadd.f32 %v2473_v40, %v5322_v43 }
 0x426   : > { %v2562_v36 = vpop.f32.mrf.mxu3 }
 0x427   : > { %v2779_v32 = vmax.f32 %v2706_v1, 0.0  ;;  %v2563_v60 = vadd.f32 %v2562_v36, %v2474_v7 }
 0x429   : > { %v2827_v62 = vpack.c.bf16 %v2779_v32, %v2777_v35  ;;  %v2806_v5 = vmax.f32 %v2563_v60, 0.0  ;;  %3019 = vmatmul.bf16.gmra.mxu2 %v5439_v19 }
 0x42a   : > { %v2619_v38 = vpop.f32.mrf.mxu0 }
 0x42b   : > { %v2708_v24 = vpop.f32.mrf.mxu1  ;;  %3108 = vmatmul.bf16.gmra.mxu3 %v2827_v62  ;;  %v5502_v29 = vpack.c.bf16 %v2806_v5, %v2804_v4  ;;  %v2620_v46 = vadd.f32 %v2619_v38, %v5427_v56 }
 0x42c   : > { %v2476_v33 = vpop.f32.mrf.mxu2 }
 0x42d   : > { %v2477_v45 = vadd.f32 %v2476_v33, %v5322_v43  ;;  %v2709_v34 = vadd.f32 %v2708_v24, %v2620_v46 }
 0x42e   : > { %v2565_v61 = vpop.f32.mrf.mxu3 }
 0x42f   : > { %v2566_v63 = vadd.f32 %v2565_v61, %v2477_v45  ;;  %v2781_v52 = vmax.f32 %v2709_v34, 0.0 }
 0x431   : > { %v2808_v50 = vmax.f32 %v2566_v63, 0.0 }
 0x432   : > { %v2621_v42 = vpop.f32.mrf.mxu0 }
 0x433   : > { %v2622_v55 = vadd.f32 %v2621_v42, %v5427_v56  ;;  %v2710_v3 = vpop.f32.mrf.mxu1 }
 0x434   : > { %v2478_v27 = vpop.f32.mrf.mxu2 }
 0x435   : > { %v2711_v19 = vadd.f32 %v2710_v3, %v2622_v55  ;;  %v2479_v39 = vadd.f32 %v2478_v27, %v5322_v43 }
 0x436   : > { %v2567_v47 = vpop.f32.mrf.mxu3 }
 0x437   : > { %v2783_v16 = vmax.f32 %v2711_v19, 0.0  ;;  %v2568_v13 = vadd.f32 %v2567_v47, %v2479_v39 }
 0x439   : > { %v2829_v59 = vpack.c.bf16 %v2783_v16, %v2781_v52  ;;  %v2810_v2 = vmax.f32 %v2568_v13, 0.0  ;;  %3024 = vmatmul.bf16.gmra.mxu2 %v5448_v49 }
 0x43a   : > { %v2624_v44 = vpop.f32.mrf.mxu0 }
 0x43b   : > { %v2713_v22 = vpop.f32.mrf.mxu1  ;;  %3113 = vmatmul.bf16.gmra.mxu3 %v2829_v59  ;;  %v5515_v58 = vpack.c.bf16 %v2810_v2, %v2808_v50  ;;  %v2625_v48 = vadd.f32 %v2624_v44, %v5427_v56 }
 0x43c   : > { %v2985_v43 = vpop.f32.mrf.mxu2 }
 0x43d   : > { %v2986_v12 = vadd.f32 %v5512_v28, %v2985_v43  ;;  %v2714_v14 = vadd.f32 %v2713_v22, %v2625_v48 }
 0x43e   : > { %v3074_v49 = vpop.f32.mrf.mxu3 }
 0x43f   : > { %v3075_v17 = vadd.f32 %v3074_v49, %v2986_v12  ;;  %v2785_v9 = vmax.f32 %v2714_v14, 0.0 }
 0x441   : > { %3154 = vst [vmem:[%s5521_s18] sm:$0xff] %v3075_v17 }
 0x442   : > { %v2626_v31 = vpop.f32.mrf.mxu0 }
 0x443   : > { %v2627_v57 = vadd.f32 %v2626_v31, %v5427_v56  ;;  %v2715_v25 = vpop.f32.mrf.mxu1 }
 0x444   : > { %v2987_v21 = vpop.f32.mrf.mxu2 }
 0x445   : > { %v2716_v37 = vadd.f32 %v2715_v25, %v2627_v57  ;;  %v2988_v20 = vadd.f32 %v5512_v28, %v2987_v21 }
 0x446   : > { %v3076_v10 = vpop.f32.mrf.mxu3 }
 0x447   : > { %v2787_v11 = vmax.f32 %v2716_v37, 0.0  ;;  %v3077_v53 = vadd.f32 %v3076_v10, %v2988_v20 }
 0x449   : > { %v2831_v18 = vpack.c.bf16 %v2787_v11, %v2785_v9  ;;  %3155 = vst [vmem:[%s5521_s18 + $0x8] sm:$0xff] %v3077_v53  ;;  %3029 = vmatmul.bf16.gmra.mxu2 %v5457_v51 }
 0x44a   : > { %v2629_v0 = vpop.f32.mrf.mxu0 }
 0x44b   : > { %v2718_v6 = vpop.f32.mrf.mxu1  ;;  %3118 = vmatmul.bf16.gmra.mxu3 %v2831_v18  ;;  %v2630_v40 = vadd.f32 %v2629_v0, %v5427_v56 }
 0x44c   : > { %v2990_v8 = vpop.f32.mrf.mxu2 }
 0x44d   : > { %v2991_v23 = vadd.f32 %v5512_v28, %v2990_v8  ;;  %v2719_v36 = vadd.f32 %v2718_v6, %v2630_v40 }
 0x44e   : > { %v3079_v54 = vpop.f32.mrf.mxu3 }
 0x44f   : > { %v3080_v1 = vadd.f32 %v3079_v54, %v2991_v23  ;;  %v2789_v5 = vmax.f32 %v2719_v36, 0.0 }
 0x451   : > { %3156 = vst [vmem:[%s5521_s18 + $0x10] sm:$0xff] %v3080_v1 }
 0x452   : > { %v2631_v7 = vpop.f32.mrf.mxu0 }
 0x453   : > { %v2632_v35 = vadd.f32 %v2631_v7, %v5427_v56  ;;  %v2720_v32 = vpop.f32.mrf.mxu1 }
 0x454   : > { %v2992_v60 = vpop.f32.mrf.mxu2 }
 0x455   : > { %v2721_v4 = vadd.f32 %v2720_v32, %v2632_v35  ;;  %v2993_v51 = vadd.f32 %v5512_v28, %v2992_v60 }
 0x456   : > { %v3081_v62 = vpop.f32.mrf.mxu3 }
 0x457   : > { %v2791_v38 = vmax.f32 %v2721_v4, 0.0  ;;  %v3082_v24 = vadd.f32 %v3081_v62, %v2993_v51 }
 0x459   : > { %v2833_v33 = vpack.c.bf16 %v2791_v38, %v2789_v5  ;;  %3157 = vst [vmem:[%s5521_s18 + $0x18] sm:$0xff] %v3082_v24  ;;  %3034 = vmatmul.bf16.gmra.mxu2 %v5466_v26 }
 0x45a   : > { %v2634_v45 = vpop.f32.mrf.mxu0 }
 0x45b   : > { %v2723_v61 = vpop.f32.mrf.mxu1  ;;  %3123 = vmatmul.bf16.gmra.mxu3 %v2833_v33  ;;  %v2635_v34 = vadd.f32 %v2634_v45, %v5427_v56 }
 0x45c   : > { %v2995_v46 = vpop.f32.mrf.mxu2 }
 0x45d   : > { %v2996_v63 = vadd.f32 %v5512_v28, %v2995_v46  ;;  %v2724_v27 = vadd.f32 %v2723_v61, %v2635_v34 }
 0x45e   : > { %v3084_v42 = vpop.f32.mrf.mxu3 }
 0x45f   : > { %v3085_v55 = vadd.f32 %v3084_v42, %v2996_v63  ;;  %v2793_v13 = vmax.f32 %v2724_v27, 0.0 }
 0x461   : > { %3158 = vst [vmem:[%s5521_s18 + $0x20] sm:$0xff] %v3085_v55 }
 0x462   : > { %v2636_v3 = vpop.f32.mrf.mxu0 }
 0x463   : > { %v2637_v19 = vadd.f32 %v2636_v3, %v5427_v56  ;;  %v2725_v39 = vpop.f32.mrf.mxu1 }
 0x464   : > { %v2997_v47 = vpop.f32.mrf.mxu2 }
 0x465   : > { %v2726_v52 = vadd.f32 %v2725_v39, %v2637_v19  ;;  %v2998_v26 = vadd.f32 %v5512_v28, %v2997_v47 }
 0x466   : > { %v3086_v16 = vpop.f32.mrf.mxu3 }
 0x467   : > { %v2795_v50 = vmax.f32 %v2726_v52, 0.0  ;;  %v3087_v59 = vadd.f32 %v3086_v16, %v2998_v26 }
 0x469   : > { %v2835_v2 = vpack.c.bf16 %v2795_v50, %v2793_v13  ;;  %3159 = vst [vmem:[%s5521_s18 + $0x28] sm:$0xff] %v3087_v59  ;;  %3039 = vmatmul.bf16.gmra.mxu2 %v5475_v30 }
 0x46a   : > { %v2639_v44 = vpop.f32.mrf.mxu0 }
 0x46b   : > { %v2728_v22 = vpop.f32.mrf.mxu1  ;;  %3128 = vmatmul.bf16.gmra.mxu3 %v2835_v2  ;;  %v2640_v48 = vadd.f32 %v2639_v44, %v5427_v56 }
 0x46c   : > { %v3000_v43 = vpop.f32.mrf.mxu2 }
 0x46d   : > { %v3001_v12 = vadd.f32 %v5512_v28, %v3000_v43  ;;  %v2729_v14 = vadd.f32 %v2728_v22, %v2640_v48 }
 0x46e   : > { %v3089_v49 = vpop.f32.mrf.mxu3 }
 0x46f   : > { %v3090_v17 = vadd.f32 %v3089_v49, %v3001_v12  ;;  %v2797_v10 = vmax.f32 %v2729_v14, 0.0 }
 0x471   : > { %3160 = vst [vmem:[%s5521_s18 + $0x30] sm:$0xff] %v3090_v17 }
 0x472   : > { %v2641_v31 = vpop.f32.mrf.mxu0 }
 0x473   : > { %v2642_v57 = vadd.f32 %v2641_v31, %v5427_v56  ;;  %v2730_v25 = vpop.f32.mrf.mxu1 }
 0x474   : > { %v3002_v21 = vpop.f32.mrf.mxu2 }
 0x475   : > { %v2731_v37 = vadd.f32 %v2730_v25, %v2642_v57  ;;  %v3003_v30 = vadd.f32 %v5512_v28, %v3002_v21 }
 0x476   : > { %v3091_v20 = vpop.f32.mrf.mxu3 }
 0x477   : > { %v2799_v9 = vmax.f32 %v2731_v37, 0.0  ;;  %v3092_v11 = vadd.f32 %v3091_v20, %v3003_v30 }
 0x479   : > { %v2837_v53 = vpack.c.bf16 %v2799_v9, %v2797_v10  ;;  %3161 = vst [vmem:[%s5521_s18 + $0x38] sm:$0xff] %v3092_v11  ;;  %3044 = vmatmul.bf16.gmra.mxu2 %v5484_v15 }
 0x47a   : > { %v2644_v18 = vpop.f32.mrf.mxu0 }
 0x47b   : > { %v2733_v0 = vpop.f32.mrf.mxu1  ;;  %3133 = vmatmul.bf16.gmra.mxu3 %v2837_v53  ;;  %v2645_v54 = vadd.f32 %v2644_v18, %v5427_v56 }
 0x47c   : > { %v3005_v6 = vpop.f32.mrf.mxu2 }
 0x47d   : > { %v3006_v8 = vadd.f32 %v5512_v28, %v3005_v6  ;;  %v2734_v7 = vadd.f32 %v2733_v0, %v2645_v54 }
 0x47e   : > { %v3094_v23 = vpop.f32.mrf.mxu3 }
 0x47f   : > { %v3095_v40 = vadd.f32 %v3094_v23, %v3006_v8  ;;  %v2801_v51 = vmax.f32 %v2734_v7, 0.0 }
 0x481   : > { %3162 = vst [vmem:[%s5521_s18 + $0x40] sm:$0xff] %v3095_v40 }
 0x482   : > { %v2646_v1 = vpop.f32.mrf.mxu0 }
 0x483   : > { %v2647_v36 = vadd.f32 %v2646_v1, %v5427_v56  ;;  %v2735_v35 = vpop.f32.mrf.mxu1 }
 0x484   : > { %v3007_v32 = vpop.f32.mrf.mxu2 }
 0x485   : > { %v2736_v60 = vadd.f32 %v2735_v35, %v2647_v36  ;;  %v3008_v15 = vadd.f32 %v5512_v28, %v3007_v32 }
 0x486   : > { %v3096_v4 = vpop.f32.mrf.mxu3 }
 0x487   : > { %v2803_v62 = vmax.f32 %v2736_v60, 0.0  ;;  %v3097_v5 = vadd.f32 %v3096_v4, %v3008_v15 }
 0x489   : > { %v2839_v38 = vpack.c.bf16 %v2803_v62, %v2801_v51  ;;  %3163 = vst [vmem:[%s5521_s18 + $0x48] sm:$0xff] %v3097_v5  ;;  %3049 = vmatmul.bf16.gmra.mxu2 %v5493_v41 }
 0x48a   : > { %v2649_v24 = vpop.f32.mrf.mxu0 }
 0x48b   : > { %v2738_v33 = vpop.f32.mrf.mxu1  ;;  %3138 = vmatmul.bf16.gmra.mxu3 %v2839_v38  ;;  %v2650_v63 = vadd.f32 %v2649_v24, %v5427_v56 }
 0x48c   : > { %v3010_v45 = vpop.f32.mrf.mxu2 }
 0x48d   : > { %v3011_v61 = vadd.f32 %v5512_v28, %v3010_v45  ;;  %v2739_v55 = vadd.f32 %v2738_v33, %v2650_v63 }
 0x48e   : > { %v3099_v46 = vpop.f32.mrf.mxu3 }
 0x48f   : > { %v3100_v42 = vadd.f32 %v3099_v46, %v3011_v61  ;;  %v2805_v52 = vmax.f32 %v2739_v55, 0.0 }
 0x491   : > { %3164 = vst [vmem:[%s5521_s18 + $0x50] sm:$0xff] %v3100_v42 }
 0x492   : > { %v2651_v34 = vpop.f32.mrf.mxu0 }
 0x493   : > { %v2652_v3 = vadd.f32 %v2651_v34, %v5427_v56  ;;  %v2740_v27 = vpop.f32.mrf.mxu1 }
 0x494   : > { %v3012_v19 = vpop.f32.mrf.mxu2 }
 0x495   : > { %v2741_v39 = vadd.f32 %v2740_v27, %v2652_v3  ;;  %v3013_v41 = vadd.f32 %v5512_v28, %v3012_v19 }
 0x496   : > { %v3101_v47 = vpop.f32.mrf.mxu3 }
 0x497   : > { %v2807_v26 = vmax.f32 %v2741_v39, 0.0  ;;  %v3102_v16 = vadd.f32 %v3101_v47, %v3013_v41 }
 0x499   : > { %v2841_v13 = vpack.c.bf16 %v2807_v26, %v2805_v52  ;;  %3165 = vst [vmem:[%s5521_s18 + $0x58] sm:$0xff] %v3102_v16  ;;  %3054 = vmatmul.bf16.gmra.mxu2 %v5502_v29 }
 0x49a   : > { %v2654_v50 = vpop.f32.mrf.mxu0 }
 0x49b   : > { %v2743_v59 = vpop.f32.mrf.mxu1  ;;  %3143 = vmatmul.bf16.gmra.mxu3 %v2841_v13  ;;  %v2655_v43 = vadd.f32 %v2654_v50, %v5427_v56 }
 0x49c   : > { %v3015_v2 = vpop.f32.mrf.mxu2 }
 0x49d   : > { %v3016_v44 = vadd.f32 %v5512_v28, %v3015_v2  ;;  %v2744_v48 = vadd.f32 %v2743_v59, %v2655_v43 }
 0x49e   : > { %v3104_v22 = vpop.f32.mrf.mxu3 }
 0x49f   : > { %v3105_v12 = vadd.f32 %v3104_v22, %v3016_v44  ;;  %v2809_v21 = vmax.f32 %v2744_v48, 0.0 }
 0x4a1   : > { %3166 = vst [vmem:[%s5521_s18 + $0x60] sm:$0xff] %v3105_v12 }
 0x4a2   : > { %v2656_v49 = vpop.f32.mrf.mxu0 }
 0x4a3   : > { %v2657_v17 = vadd.f32 %v2656_v49, %v5427_v56  ;;  %v2745_v31 = vpop.f32.mrf.mxu1 }
 0x4a4   : > { %v3017_v14 = vpop.f32.mrf.mxu2 }
 0x4a5   : > { %v2746_v29 = vadd.f32 %v2745_v31, %v2657_v17  ;;  %v3018_v57 = vadd.f32 %v5512_v28, %v3017_v14 }
 0x4a6   : > { %v3106_v25 = vpop.f32.mrf.mxu3 }
 0x4a7   : > { %v2811_v37 = vmax.f32 %v2746_v29, 0.0  ;;  %v3107_v30 = vadd.f32 %v3106_v25, %v3018_v57 }
 0x4a9   : > { %v2843_v20 = vpack.c.bf16 %v2811_v37, %v2809_v21  ;;  %3167 = vst [vmem:[%s5521_s18 + $0x68] sm:$0xff] %v3107_v30  ;;  %3059 = vmatmul.bf16.gmra.mxu2 %v5515_v58 }
 0x4ab   : > { %3148 = vmatmul.bf16.gmra.mxu3 %v2843_v20 }
 0x4ac   : > { %v3020_v10 = vpop.f32.mrf.mxu2 }
 0x4ad   : > { %v3021_v56 = vadd.f32 %v5512_v28, %v3020_v10 }
 0x4ae   : > { %v3109_v9 = vpop.f32.mrf.mxu3 }
 0x4af   : > { %v3110_v11 = vadd.f32 %v3109_v9, %v3021_v56 }
 0x4b1   : > { %3168 = vst [vmem:[%s5521_s18 + $0x70] sm:$0xff] %v3110_v11 }
 0x4b4   : > { %v3022_v53 = vpop.f32.mrf.mxu2 }
 0x4b5   : > { %v3023_v18 = vadd.f32 %v5512_v28, %v3022_v53 }
 0x4b6   : > { %v3111_v0 = vpop.f32.mrf.mxu3 }
 0x4b7   : > { %v3112_v6 = vadd.f32 %v3111_v0, %v3023_v18 }
 0x4b9   : > { %3169 = vst [vmem:[%s5521_s18 + $0x78] sm:$0xff] %v3112_v6 }
 0x4bc   : > { %v3025_v8 = vpop.f32.mrf.mxu2 }
 0x4bd   : > { %v3026_v23 = vadd.f32 %v5512_v28, %v3025_v8 }
 0x4be   : > { %v3114_v58 = vpop.f32.mrf.mxu3 }
 0x4bf   : > { %v3115_v54 = vadd.f32 %v3114_v58, %v3026_v23 }
 0x4c1   : > { %3170 = vst [vmem:[%s5521_s18 + $0x80] sm:$0xff] %v3115_v54 }
 0x4c4   : > { %v3027_v40 = vpop.f32.mrf.mxu2 }
 0x4c5   : > { %v3028_v1 = vadd.f32 %v5512_v28, %v3027_v40 }
 0x4c6   : > { %v3116_v7 = vpop.f32.mrf.mxu3 }
 0x4c7   : > { %v3117_v36 = vadd.f32 %v3116_v7, %v3028_v1 }
 0x4c9   : > { %3171 = vst [vmem:[%s5521_s18 + $0x88] sm:$0xff] %v3117_v36 }
 0x4cc   : > { %v3030_v35 = vpop.f32.mrf.mxu2 }
 0x4cd   : > { %v3031_v32 = vadd.f32 %v5512_v28, %v3030_v35 }
 0x4ce   : > { %v3119_v60 = vpop.f32.mrf.mxu3 }
 0x4cf   : > { %v3120_v15 = vadd.f32 %v3119_v60, %v3031_v32 }
 0x4d1   : > { %3172 = vst [vmem:[%s5521_s18 + $0x90] sm:$0xff] %v3120_v15 }
 0x4d4   : > { %v3032_v4 = vpop.f32.mrf.mxu2 }
 0x4d5   : > { %v3033_v51 = vadd.f32 %v5512_v28, %v3032_v4 }
 0x4d6   : > { %v3121_v62 = vpop.f32.mrf.mxu3 }
 0x4d7   : > { %v3122_v5 = vadd.f32 %v3121_v62, %v3033_v51 }
 0x4d9   : > { %3173 = vst [vmem:[%s5521_s18 + $0x98] sm:$0xff] %v3122_v5 }
 0x4dc   : > { %v3035_v38 = vpop.f32.mrf.mxu2 }
 0x4dd   : > { %v3036_v24 = vadd.f32 %v5512_v28, %v3035_v38 }
 0x4de   : > { %v3124_v33 = vpop.f32.mrf.mxu3 }
 0x4df   : > { %v3125_v45 = vadd.f32 %v3124_v33, %v3036_v24 }
 0x4e1   : > { %3174 = vst [vmem:[%s5521_s18 + $0xa0] sm:$0xff] %v3125_v45 }
 0x4e4   : > { %v3037_v61 = vpop.f32.mrf.mxu2 }
 0x4e5   : > { %v3038_v46 = vadd.f32 %v5512_v28, %v3037_v61 }
 0x4e6   : > { %v3126_v63 = vpop.f32.mrf.mxu3 }
 0x4e7   : > { %v3127_v42 = vadd.f32 %v3126_v63, %v3038_v46 }
 0x4e9   : > { %3175 = vst [vmem:[%s5521_s18 + $0xa8] sm:$0xff] %v3127_v42 }
 0x4ec   : > { %v3040_v34 = vpop.f32.mrf.mxu2 }
 0x4ed   : > { %v3041_v55 = vadd.f32 %v5512_v28, %v3040_v34 }
 0x4ee   : > { %v3129_v3 = vpop.f32.mrf.mxu3 }
 0x4ef   : > { %v3130_v27 = vadd.f32 %v3129_v3, %v3041_v55 }
 0x4f1   : > { %3176 = vst [vmem:[%s5521_s18 + $0xb0] sm:$0xff] %v3130_v27 }
 0x4f4   : > { %v3042_v19 = vpop.f32.mrf.mxu2 }
 0x4f5   : > { %v3043_v39 = vadd.f32 %v5512_v28, %v3042_v19 }
 0x4f6   : > { %v3131_v41 = vpop.f32.mrf.mxu3 }
 0x4f7   : > { %v3132_v47 = vadd.f32 %v3131_v41, %v3043_v39 }
 0x4f9   : > { %3177 = vst [vmem:[%s5521_s18 + $0xb8] sm:$0xff] %v3132_v47 }
 0x4fc   : > { %v3045_v52 = vpop.f32.mrf.mxu2 }
 0x4fd   : > { %v3046_v26 = vadd.f32 %v5512_v28, %v3045_v52 }
 0x4fe   : > { %v3134_v16 = vpop.f32.mrf.mxu3 }
 0x4ff   : > { %v3135_v13 = vadd.f32 %v3134_v16, %v3046_v26 }
 0x501   : > { %3178 = vst [vmem:[%s5521_s18 + $0xc0] sm:$0xff] %v3135_v13 }
 0x504   : > { %v3047_v50 = vpop.f32.mrf.mxu2 }
 0x505   : > { %v3048_v59 = vadd.f32 %v5512_v28, %v3047_v50 }
 0x506   : > { %v3136_v2 = vpop.f32.mrf.mxu3 }
 0x507   : > { %v3137_v44 = vadd.f32 %v3136_v2, %v3048_v59 }
 0x509   : > { %3179 = vst [vmem:[%s5521_s18 + $0xc8] sm:$0xff] %v3137_v44 }
 0x50c   : > { %v3050_v22 = vpop.f32.mrf.mxu2 }
 0x50d   : > { %v3051_v43 = vadd.f32 %v5512_v28, %v3050_v22 }
 0x50e   : > { %v3139_v12 = vpop.f32.mrf.mxu3 }
 0x50f   : > { %v3140_v49 = vadd.f32 %v3139_v12, %v3051_v43 }
 0x511   : > { %3180 = vst [vmem:[%s5521_s18 + $0xd0] sm:$0xff] %v3140_v49 }
 0x514   : > { %v3052_v48 = vpop.f32.mrf.mxu2 }
 0x515   : > { %v3053_v17 = vadd.f32 %v5512_v28, %v3052_v48 }
 0x516   : > { %v3141_v31 = vpop.f32.mrf.mxu3 }
 0x517   : > { %v3142_v14 = vadd.f32 %v3141_v31, %v3053_v17 }
 0x519   : > { %3181 = vst [vmem:[%s5521_s18 + $0xd8] sm:$0xff] %v3142_v14 }
 0x51c   : > { %v3055_v29 = vpop.f32.mrf.mxu2 }
 0x51d   : > { %v3056_v57 = vadd.f32 %v5512_v28, %v3055_v29 }
 0x51e   : > { %v3144_v25 = vpop.f32.mrf.mxu3 }
 0x51f   : > { %v3145_v21 = vadd.f32 %v3144_v25, %v3056_v57 }
 0x521   : > { %3182 = vst [vmem:[%s5521_s18 + $0xe0] sm:$0xff] %v3145_v21 }
 0x524   : > { %v3057_v37 = vpop.f32.mrf.mxu2 }
 0x525   : > { %v3058_v30 = vadd.f32 %v5512_v28, %v3057_v37 }
 0x526   : > { %v3146_v20 = vpop.f32.mrf.mxu3 }
 0x527   : > { %v3147_v10 = vadd.f32 %v3146_v20, %v3058_v30 }
 0x529   : > { %3183 = vst [vmem:[%s5521_s18 + $0xe8] sm:$0xff] %v3147_v10 }
 0x52c   : > { %v3060_v56 = vpop.f32.mrf.mxu2 }
 0x52d   : > { %v3061_v9 = vadd.f32 %v5512_v28, %v3060_v56 }
 0x52e   : > { %v3149_v11 = vpop.f32.mrf.mxu3 }
 0x52f   : > { %v3150_v53 = vadd.f32 %v3149_v11, %v3061_v9 }
 0x531   : > { %3184 = vst [vmem:[%s5521_s18 + $0xf0] sm:$0xff] %v3150_v53 }
 0x534   : > { %v3062_v18 = vpop.f32.mrf.mxu2 }
 0x535   : > { %v3063_v0 = vadd.f32 %v5512_v28, %v3062_v18 }
 0x536   : > { %v3151_v6 = vpop.f32.mrf.mxu3 }
 0x537   : > { %v3152_v8 = vadd.f32 %v3151_v6, %v3063_v0 }
 0x539   : > { %3185 = vst [vmem:[%s5521_s18 + $0xf8] sm:$0xff] %v3152_v8 }
 0x53a PF: > { %s21_s17 = sadd.s32 1, %s3988_s17  }
 0x53b   : > { %p18_p4 = scmp.ge.s32.totalorder %s21_s17, 6  }
 0x53d   :  { %20 = sbr.rel (!%p18_p4) target bundleno = 1 (0x1), region = 94 }

</bundles_post_ra>
